<compile_context>
chip_gen: v7x
topology: tpu7x:2x2x1
jax: 0.10.0
libtpu: 0.0.40
codegen_flags: <defaults>
</compile_context>

<pallas_src>
import math

import jax
import jax.numpy as jnp
from jax.experimental import pallas as pl
from jax.experimental.pallas import tpu as pltpu

BN_EPS = 1e-5
LANE = 128
SUBLANE = 8


def _round_up(x, m):
    return ((x + m - 1) // m) * m


def _cdiv(a, b):
    return -(-a // b)


# ----------------------------------------------------------------------------
# Chip-dependent tiling configuration
# ----------------------------------------------------------------------------
def _chip_config():
    cfg = {"tn_pref": 128, "max_tp": 512, "vmem_limit": 32 * 1024 * 1024, "multi_tc": False}
    try:
        kind = jax.devices()[0].device_kind.lower()
    except Exception:
        return cfg
    if "v5" in kind:        # 4x128x128 MXU, 128 MiB VMEM (default scoped limit 16 MiB)
        cfg.update(tn_pref=128, max_tp=512, vmem_limit=64 * 1024 * 1024, multi_tc=False)
    elif "v6" in kind:      # 2x256x256 MXU, 128 MiB VMEM
        cfg.update(tn_pref=256, max_tp=1024, vmem_limit=64 * 1024 * 1024, multi_tc=False)
    elif "v7" in kind or "7x" in kind:   # 2 TCs/chip, 64 MiB VMEM per TC
        cfg.update(tn_pref=256, max_tp=512, vmem_limit=40 * 1024 * 1024, multi_tc=True)
    return cfg


def _pass1_tiling(P, kpad, cpad, cfg):
    # Weight-resident tn: if the double-buffered weight fits comfortably, DMA it exactly once.
    if 2 * kpad * cpad * 2 <= cfg["vmem_limit"] // 3:
        tn = cpad
    else:
        tn = min(cfg["tn_pref"], cpad)
        if cpad % tn:
            tn = LANE
    nn = cpad // tn

    ppad8 = _round_up(max(P, SUBLANE), SUBLANE)
    np_ = _cdiv(ppad8, cfg["max_tp"])
    # feed both TensorCores on v7x even for small layers
    if cfg["multi_tc"] and np_ * nn < 2 and ppad8 >= 2 * SUBLANE:
        np_ = 2

    def est(tp_):
        return (2 * (tp_ * kpad * 2 + kpad * tn * 2 + tp_ * tn * 2
                     + 2 * SUBLANE * tn * 4) + 2 * tp_ * tn * 4)

    tp = _round_up(_cdiv(ppad8, np_), SUBLANE)
    while est(tp) > int(cfg["vmem_limit"] * 0.7) and tp > SUBLANE:
        np_ += 1
        tp = _round_up(_cdiv(ppad8, np_), SUBLANE)
    return tp, tn, np_ * tp


def _pass2_tiling(ppad, cpad, tp1, has_res, cfg):
    # Pass 2 has no K operand -> lane-dense full-Cpad tiles, grow the row tile.
    tn = cpad
    nbuf = 4 if has_res else 3

    def est(tp_):
        return 2 * (nbuf * tp_ * tn * 2 + 2 * tn * 4) + tp_ * tn * 4

    tp = tp1
    np_ = ppad // tp
    min_steps = 2 if cfg["multi_tc"] else 1
    while (np_ % 2 == 0 and np_ // 2 >= min_steps and tp * 2 <= 2048
           and est(tp * 2) <= int(cfg["vmem_limit"] * 0.6)):
        tp *= 2
        np_ //= 2
    return tp, tn


# ----------------------------------------------------------------------------
# Pass 1 kernel: tiled MXU matmul (bf16 in, f32 acc) + per-tile BN stat partials
# ----------------------------------------------------------------------------
def _matmul_stats_kernel(p_ref, w_ref, y_ref, sum_ref, sq_ref):
    y = jnp.dot(p_ref[...], w_ref[...], preferred_element_type=jnp.float32)
    y_ref[...] = y.astype(y_ref.dtype)
    s = jnp.sum(y, axis=0, keepdims=True)            # (1, TN)
    sq = jnp.sum(y * y, axis=0, keepdims=True)       # (1, TN)
    sum_ref[...] = jnp.broadcast_to(s, sum_ref.shape)   # (8, TN), all sublanes identical
    sq_ref[...] = jnp.broadcast_to(sq, sq_ref.shape)


def _matmul_with_stats(patches, w_mat, tp, tn, cfg):
    """patches [Ppad,Kpad] bf16 @ w_mat [Kpad,Cpad] bf16 -> y [Ppad,Cpad] bf16 + stat partials."""
    ppad, kpad = patches.shape
    cpad = w_mat.shape[1]
    np_, nn = ppad // tp, cpad // tn

    flops = 2 * ppad * kpad * cpad + 3 * ppad * cpad
    bytes_accessed = (ppad * kpad * 2 + np_ * kpad * cpad * 2 + ppad * cpad * 2
                      + 2 * np_ * SUBLANE * cpad * 4)

    out_shape = (
        jax.ShapeDtypeStruct((ppad, cpad), jnp.bfloat16),
        jax.ShapeDtypeStruct((np_ * SUBLANE, cpad), jnp.float32),
        jax.ShapeDtypeStruct((np_ * SUBLANE, cpad), jnp.float32),
    )
    y, sums, sqs = pl.pallas_call(
        _matmul_stats_kernel,
        out_shape=out_shape,
        grid=(np_, nn),
        in_specs=[
            pl.BlockSpec((tp, kpad), lambda i, j: (i, 0)),
            pl.BlockSpec((kpad, tn), lambda i, j: (0, j)),
        ],
        out_specs=(
            pl.BlockSpec((tp, tn), lambda i, j: (i, j)),
            pl.BlockSpec((SUBLANE, tn), lambda i, j: (i, j)),
            pl.BlockSpec((SUBLANE, tn), lambda i, j: (i, j)),
        ),
        compiler_params=pltpu.CompilerParams(
            dimension_semantics=("parallel", "parallel"),
            vmem_limit_bytes=cfg["vmem_limit"]),
        cost_estimate=pl.CostEstimate(flops=flops, transcendentals=0,
                                      bytes_accessed=bytes_accessed),
    )(patches, w_mat)
    return y, sums, sqs


# ----------------------------------------------------------------------------
# Pass 2 kernel: y*scale + shift (+residual) (+ReLU), in place over y, bf16 out
# ----------------------------------------------------------------------------
def _make_bn_act_kernel(relu: bool, has_residual: bool):
    def _body(y_ref, sc_ref, sh_ref, r_ref, o_ref):
        out = y_ref[...].astype(jnp.float32) * sc_ref[...] + sh_ref[...]
        if has_residual:
            out = out + r_ref[...].astype(jnp.float32)
        if relu:
            out = jnp.maximum(out, 0.0)
        o_ref[...] = out.astype(o_ref.dtype)

    if has_residual:
        def kernel(y_ref, sc_ref, sh_ref, r_ref, o_ref):
            _body(y_ref, sc_ref, sh_ref, r_ref, o_ref)
    else:
        def kernel(y_ref, sc_ref, sh_ref, o_ref):
            _body(y_ref, sc_ref, sh_ref, None, o_ref)
    return kernel


def _bn_act(y, scale_row, shift_row, residual, relu, tp, tn, cfg):
    ppad, cpad = y.shape
    np_, nn = ppad // tp, cpad // tn
    args = [y, scale_row, shift_row]
    in_specs = [
        pl.BlockSpec((tp, tn), lambda i, j: (i, j)),
        pl.BlockSpec((1, tn), lambda i, j: (0, j)),
        pl.BlockSpec((1, tn), lambda i, j: (0, j)),
    ]
    nres = 0
    if residual is not None:
        args.append(residual)
        in_specs.append(pl.BlockSpec((tp, tn), lambda i, j: (i, j)))
        nres = 1
    kernel = _make_bn_act_kernel(relu, residual is not None)

    flops = (3 + nres) * ppad * cpad
    bytes_accessed = (2 + nres) * ppad * cpad * 2 + 2 * cpad * 4

    return pl.pallas_call(
        kernel,
        out_shape=jax.ShapeDtypeStruct((ppad, cpad), jnp.bfloat16),
        grid=(np_, nn),
        in_specs=in_specs,
        out_specs=pl.BlockSpec((tp, tn), lambda i, j: (i, j)),
        input_output_aliases={0: 0},     # normalized result overwrites the y buffer
        compiler_params=pltpu.CompilerParams(
            dimension_semantics=("parallel", "parallel"),
            vmem_limit_bytes=cfg["vmem_limit"]),
        cost_estimate=pl.CostEstimate(flops=flops, transcendentals=0,
                                      bytes_accessed=bytes_accessed),
    )(*args)


# ----------------------------------------------------------------------------
# JAX glue: patch extraction (layout plumbing only; K ordered (kh, kw, c) -> no transpose;
# K zero-padding folded into the concatenate; 1x1 convs skip im2col entirely)
# ----------------------------------------------------------------------------
def _im2col(x_nhwc, kh, kw, sh, sw, ph, pw, kpad):
    x = x_nhwc.astype(jnp.bfloat16)                   # no-op for internal bf16 activations
    N, H, W, C = x.shape
    Ho = (H + 2 * ph - kh) // sh + 1
    Wo = (W + 2 * pw - kw) // sw + 1
    K = kh * kw * C
    if kh == 1 and kw == 1 and ph == 0 and pw == 0:
        pat = x if (sh == 1 and sw == 1) else x[:, ::sh, ::sw, :]
        if kpad > K:
            pat = jnp.pad(pat, ((0, 0), (0, 0), (0, 0), (0, kpad - K)))
        return pat.reshape(N * Ho * Wo, kpad), (N, Ho, Wo)
    xp = jnp.pad(x, ((0, 0), (ph, ph), (pw, pw), (0, 0))) if (ph or pw) else x
    cols = [xp[:, i:i + (Ho - 1) * sh + 1:sh, j:j + (Wo - 1) * sw + 1:sw, :]
            for i in range(kh) for j in range(kw)]                  # each [N,Ho,Wo,C]
    if kpad > K:
        cols.append(jnp.zeros((N, Ho, Wo, kpad - K), jnp.bfloat16))  # fold K-pad into concat
    pat = jnp.concatenate(cols, axis=3)                              # [N,Ho,Wo,Kpad], (kh,kw,c)
    return pat.reshape(N * Ho * Wo, kpad), (N, Ho, Wo)


def conv_bn_act_nhwc(x, conv_p, stride, padding, relu=True, residual=None, cfg=None):
    """conv (tiled matmul) -> train-mode BN -> (+residual) -> ReLU in NHWC (bf16 out)."""
    sh, sw = (stride, stride) if isinstance(stride, int) else stride
    ph, pw = (padding, padding) if isinstance(padding, int) else padding
    kh, kw, cout = conv_p["kh"], conv_p["kw"], conv_p["cout"]
    w_mat = conv_p["w_mat"]                           # [Kpad, Cpad] bf16, pre-permuted/padded
    kpad, cpad = w_mat.shape

    patches, (N, Ho, Wo) = _im2col(x, kh, kw, sh, sw, ph, pw, kpad)
    P = patches.shape[0]

    tp, tn, ppad = _pass1_tiling(P, kpad, cpad, cfg)
    if ppad != P:
        patches = jnp.pad(patches, ((0, ppad - P), (0, 0)))   # zero rows -> stats unaffected

    # pass 1: tiled matmul + per-tile channel sum / sumsq partials (from the f32 accumulator)
    y, sums, sqs = _matmul_with_stats(patches, w_mat, tp, tn, cfg)

    # global train-mode BN statistics over the real N*Ho*Wo rows (biased variance).
    # Each tile partial is replicated across SUBLANE sublanes -> divide by SUBLANE*P.
    inv = 1.0 / (float(P) * SUBLANE)
    mean = jnp.sum(sums, axis=0) * inv                            # (Cpad,)
    var = jnp.maximum(jnp.sum(sqs, axis=0) * inv - mean * mean, 0.0)
    scale = conv_p["gamma_pad"] * jax.lax.rsqrt(var + BN_EPS)
    shift = conv_p["beta_pad"] - mean * scale

    res = None
    if residual is not None:
        res = residual.reshape(N * Ho * Wo, residual.shape[-1]).astype(jnp.bfloat16)
        pr, pc = ppad - P, cpad - res.shape[1]
        if pr or pc:
            res = jnp.pad(res, ((0, pr), (0, pc)))

    # pass 2: normalize + residual + ReLU (in place over y), decoupled lane-dense tiling
    tp2, tn2 = _pass2_tiling(ppad, cpad, tp, residual is not None, cfg)
    out = _bn_act(y, scale.reshape(1, cpad), shift.reshape(1, cpad), res, relu, tp2, tn2, cfg)

    # When cout is lane-aligned and P is a multiple of 8 this slice is the identity (no copy);
    # only small-channel layers pay a slice, which beats inflating the next layer's im2col.
    return out[:P, :cout].reshape(N, Ho, Wo, cout)


# ----------------------------------------------------------------------------
# Parameters (deterministic, mirrors the PyTorch __init__ / weight init)
# ----------------------------------------------------------------------------
def conv_w(key, cout, cin, kh, kw):
    n = kh * kw * cout
    return jax.random.normal(key, (cout, cin, kh, kw), jnp.float32) * math.sqrt(2.0 / n)


def bn_p(c):
    return {"gamma": jnp.ones((c,), jnp.float32), "beta": jnp.zeros((c,), jnp.float32)}


def make_block_params(key, inplanes, planes, stride):
    k1, k2, k3 = jax.random.split(key, 3)
    p = {"conv1": conv_w(k1, planes, inplanes, 3, 3), "bn1": bn_p(planes),
         "conv2": conv_w(k2, planes, planes, 3, 3), "bn2": bn_p(planes)}
    if stride != 1 or inplanes != planes:
        p["downsample"] = {"conv": conv_w(k3, planes, inplanes, 1, 1), "bn": bn_p(planes)}
    return p


def make_layer_params(key, inplanes, planes, blocks, stride):
    keys = jax.random.split(key, blocks)
    bl = [make_block_params(keys[0], inplanes, planes, stride)]
    for i in range(1, blocks):
        bl.append(make_block_params(keys[i], planes, planes, 1))
    return bl


def make_resnet_params(key, layers, strides, inpch=1, oupch=512, expf=1.0,
                       compress_layer=True):
    ks = jax.random.split(key, 8)
    c32 = int(32 * expf)
    params = {"conv1": conv_w(ks[0], c32, inpch, 3, 3), "bn1": bn_p(c32)}
    params["layer1"] = make_layer_params(ks[1], c32, int(64 * expf), layers[0], strides[1])
    params["layer2"] = make_layer_params(ks[2], int(64 * expf), int(128 * expf), layers[1], strides[2])
    params["layer3"] = make_layer_params(ks[3], int(oupch // 4 * expf), int(oupch // 2 * expf), layers[2], strides[3])
    params["layer4"] = make_layer_params(ks[4], int(oupch // 2 * expf), int(oupch * expf), layers[3], strides[4])
    l5_out = int(oupch * expf) if compress_layer else oupch
    params["layer5"] = make_layer_params(ks[5], int(oupch * expf), l5_out, layers[4], strides[5])
    if compress_layer:
        cin6 = int(512 * expf)
        fan_in = cin6 * 3 * 1
        bound = 1.0 / math.sqrt(fan_in)
        params["layer6"] = {
            "conv": conv_w(ks[6], oupch, cin6, 3, 1),
            # NOTE: this bias exists in the PyTorch module but is a mathematical no-op
            # (train-mode BN subtracts the per-channel mean), so it is never fed to the kernel.
            "bias": jax.random.uniform(ks[7], (oupch,), jnp.float32, -bound, bound),
            "bn": bn_p(oupch),
        }
    return params


# ----------------------------------------------------------------------------
# One-time parameter preprocessing: permute/reshape/pad weights to matmul-ready bf16
# [Kpad, Cpad] matrices with K ordered (kh, kw, cin) to match the transpose-free im2col.
# ----------------------------------------------------------------------------
def _prep_conv(weight_oihw, gamma, beta):
    cout, cin, kh, kw = weight_oihw.shape
    K = cin * kh * kw
    kpad = _round_up(max(K, LANE), LANE)
    cpad = _round_up(max(cout, LANE), LANE)
    w_mat = jnp.transpose(weight_oihw, (2, 3, 1, 0)).reshape(K, cout)   # (kh,kw,cin) x cout
    w_mat = jnp.pad(w_mat, ((0, kpad - K), (0, cpad - cout))).astype(jnp.bfloat16)
    return {
        "w_mat": w_mat, "kh": kh, "kw": kw, "cout": cout,
        "gamma_pad": jnp.pad(gamma, (0, cpad - cout)),
        "beta_pad": jnp.pad(beta, (0, cpad - cout)),
    }


def preprocess_params(params, compress_layer=True):
    pp = {"conv1": _prep_conv(params["conv1"], params["bn1"]["gamma"], params["bn1"]["beta"])}
    for name in ("layer1", "layer2", "layer3", "layer4", "layer5"):
        blocks = []
        for bp in params[name]:
            b = {"conv1": _prep_conv(bp["conv1"], bp["bn1"]["gamma"], bp["bn1"]["beta"]),
                 "conv2": _prep_conv(bp["conv2"], bp["bn2"]["gamma"], bp["bn2"]["beta"])}
            if "downsample" in bp:
                b["downsample"] = _prep_conv(bp["downsample"]["conv"],
                                             bp["downsample"]["bn"]["gamma"],
                                             bp["downsample"]["bn"]["beta"])
            blocks.append(b)
        pp[name] = blocks
    if compress_layer:
        l6 = params["layer6"]
        pp["layer6"] = _prep_conv(l6["conv"], l6["bn"]["gamma"], l6["bn"]["beta"])
    return pp


# ----------------------------------------------------------------------------
# Forward pass (mirrors dan_ResNet.forward)
# ----------------------------------------------------------------------------
def basic_block_forward(x, bp, stride, cfg):
    out = conv_bn_act_nhwc(x, bp["conv1"], stride, 1, relu=True, cfg=cfg)
    if "downsample" in bp:
        identity = conv_bn_act_nhwc(x, bp["downsample"], stride, 0, relu=False, cfg=cfg)
    else:
        identity = x
    out = conv_bn_act_nhwc(out, bp["conv2"], 1, 1, relu=True, residual=identity, cfg=cfg)
    return out


def reslayer_forward(x, layer_params, stride, cfg):
    for i, bp in enumerate(layer_params):
        x = basic_block_forward(x, bp, stride if i == 0 else 1, cfg)
    return x, []   # neko_reslayer returns (features, grid); grid carries no tensor compute


def dan_resnet_forward(x_nchw, pparams, strides, compress_layer=True, cfg=None):
    cfg = cfg or _chip_config()
    x = jnp.transpose(x_nchw, (0, 2, 3, 1))          # NCHW -> NHWC
    out_features, grids = [], []
    tmp_shape = x.shape[1:3]

    # pre_layers: conv1 -> bn1 -> relu
    x = conv_bn_act_nhwc(x, pparams["conv1"], strides[0], 1, relu=True, cfg=cfg)

    x, grid = reslayer_forward(x, pparams["layer1"], strides[1], cfg)
    grids += grid
    if x.shape[1:3] != tmp_shape:
        tmp_shape = x.shape[1:3]
        out_features.append(x)
    grids += grid                                     # (double add quirk of the reference)

    x, grid = reslayer_forward(x, pparams["layer2"], strides[2], cfg)
    if x.shape[1:3] != tmp_shape:
        tmp_shape = x.shape[1:3]
        out_features.append(x)

    x, grid = reslayer_forward(x, pparams["layer3"], strides[3], cfg)
    grids += grid
    if x.shape[1:3] != tmp_shape:
        tmp_shape = x.shape[1:3]
        out_features.append(x)

    x, grid = reslayer_forward(x, pparams["layer4"], strides[4], cfg)
    grids += grid
    if x.shape[1:3] != tmp_shape:
        tmp_shape = x.shape[1:3]
        out_features.append(x)

    x, grid = reslayer_forward(x, pparams["layer5"], strides[5], cfg)
    grids += grid
    if not compress_layer:
        out_features.append(x)
    else:
        if x.shape[1:3] != tmp_shape:
            tmp_shape = x.shape[1:3]
            out_features.append(x)
        x = conv_bn_act_nhwc(x, pparams["layer6"], (1, 1), (0, 0), relu=True, cfg=cfg)
        out_features.append(x)

    # back to PyTorch NCHW convention (external contract in f32)
    out_features = [jnp.transpose(f, (0, 3, 1, 2)).astype(jnp.float32) for f in out_features]
    return out_features, grids


# ----------------------------------------------------------------------------
if __name__ == "__main__":
    key = jax.random.PRNGKey(0)
    pkey, xkey = jax.random.split(key)

    # small configuration consistent with the module's channel arithmetic
    layers = [1, 1, 1, 1, 1]
    strides = [1, 2, 1, 2, 1, 1]
    inpch, oupch, expf = 1, 512, 0.125          # channels: 4,8,16,32,64,64 -> 512

    raw_params = make_resnet_params(pkey, layers, strides, inpch=inpch, oupch=oupch,
                                    expf=expf, compress_layer=True)
    pparams = preprocess_params(raw_params, compress_layer=True)
    cfg = _chip_config()

    x = jax.random.normal(xkey, (2, inpch, 16, 16), jnp.float32)   # NCHW, like PyTorch

    @jax.jit
    def run(x_in):
        # pparams / strides / cfg captured by closure so static metadata stays Python
        return dan_resnet_forward(x_in, pparams, strides, compress_layer=True, cfg=cfg)

    out_features, grids = run(x)
    for f in out_features:
        jax.block_until_ready(f)
    print("KERNEL_OK")
</pallas_src>

<mosaic_0001>
module attributes {stable_mosaic.version = 11 : i64} {
  func.func @_matmul_stats_kernel(%arg0: i32, %arg1: i32, %arg2: memref<512x128xbf16, #tpu.memory_space<vmem>>, %arg3: memref<128x128xbf16, #tpu.memory_space<vmem>>, %arg4: memref<512x128xbf16, #tpu.memory_space<vmem>>, %arg5: memref<8x128xf32, #tpu.memory_space<vmem>>, %arg6: memref<8x128xf32, #tpu.memory_space<vmem>>) attributes {dimension_semantics = [#tpu.dimension_semantics<parallel>, #tpu.dimension_semantics<parallel>], iteration_bounds = array<i64: 1, 1>, scalar_prefetch = 0 : i64, scratch_operands = 0 : i64, tpu.core_type = #tpu.core_type<tc>, window_params = [{transform_indices = @transform_0, window_bounds = array<i64: 512, 128>}, {transform_indices = @transform_1, window_bounds = array<i64: 128, 128>}, {transform_indices = @transform_2, window_bounds = array<i64: 512, 128>}, {transform_indices = @transform_3, window_bounds = array<i64: 8, 128>}, {transform_indices = @transform_4, window_bounds = array<i64: 8, 128>}]} {
    %c0 = arith.constant 0 : index
    %c0_0 = arith.constant 0 : index
    %0 = vector.load %arg2[%c0, %c0_0] : memref<512x128xbf16, #tpu.memory_space<vmem>>, vector<512x128xbf16>
    %c0_1 = arith.constant 0 : index
    %c0_2 = arith.constant 0 : index
    %1 = vector.load %arg3[%c0_1, %c0_2] : memref<128x128xbf16, #tpu.memory_space<vmem>>, vector<128x128xbf16>
    %cst = arith.constant dense<0.000000e+00> : vector<512x128xf32>
    %2 = tpu.matmul %0, %1, %cst {dimension_numbers = #tpu.dot_dimension_numbers<[1], [0], [0], [1], [0, 0, 1, 1], [], []>} : vector<512x128xbf16>, vector<128x128xbf16>, vector<512x128xf32> -> vector<512x128xf32>
    %3 = arith.truncf %2 : vector<512x128xf32> to vector<512x128xbf16>
    %c0_3 = arith.constant 0 : index
    %c0_4 = arith.constant 0 : index
    %4 = vector.load %arg4[%c0_3, %c0_4] : memref<512x128xbf16, #tpu.memory_space<vmem>>, vector<512x128xbf16>
    tpu.vector_store %arg4[%c0_3, %c0_4], %3 {strides = array<i32>} : memref<512x128xbf16, #tpu.memory_space<vmem>>, vector<512x128xbf16>,
    %cst_5 = arith.constant dense<0.000000e+00> : vector<128xf32>
    %5 = vector.multi_reduction <add>, %2, %cst_5 [0] : vector<512x128xf32> to vector<128xf32>
    %6 = vector.shape_cast %5 : vector<128xf32> to vector<1x128xf32>
    %7 = arith.mulf %2, %2 : vector<512x128xf32>
    %cst_6 = arith.constant dense<0.000000e+00> : vector<128xf32>
    %8 = vector.multi_reduction <add>, %7, %cst_6 [0] : vector<512x128xf32> to vector<128xf32>
    %9 = vector.shape_cast %8 : vector<128xf32> to vector<1x128xf32>
    %10 = vector.shape_cast %6 : vector<1x128xf32> to vector<1x128xf32>
    %11 = vector.broadcast %10 : vector<1x128xf32> to vector<8x128xf32>
    %c0_7 = arith.constant 0 : index
    %c0_8 = arith.constant 0 : index
    %12 = vector.load %arg5[%c0_7, %c0_8] : memref<8x128xf32, #tpu.memory_space<vmem>>, vector<8x128xf32>
    tpu.vector_store %arg5[%c0_7, %c0_8], %11 {strides = array<i32>} : memref<8x128xf32, #tpu.memory_space<vmem>>, vector<8x128xf32>,
    %13 = vector.shape_cast %9 : vector<1x128xf32> to vector<1x128xf32>
    %14 = vector.broadcast %13 : vector<1x128xf32> to vector<8x128xf32>
    %c0_9 = arith.constant 0 : index
    %c0_10 = arith.constant 0 : index
    %15 = vector.load %arg6[%c0_9, %c0_10] : memref<8x128xf32, #tpu.memory_space<vmem>>, vector<8x128xf32>
    tpu.vector_store %arg6[%c0_9, %c0_10], %14 {strides = array<i32>} : memref<8x128xf32, #tpu.memory_space<vmem>>, vector<8x128xf32>,
    return
  }
  func.func @transform_0(%arg0: i32, %arg1: i32) -> (i32, i32) {
    %c0_i32 = arith.constant 0 : i32
    %c0_i32_0 = arith.constant 0 : i32
    return %arg0, %c0_i32 : i32, i32
  }
  func.func @transform_1(%arg0: i32, %arg1: i32) -> (i32, i32) {
    %c0_i32 = arith.constant 0 : i32
    %c0_i32_0 = arith.constant 0 : i32
    return %c0_i32, %arg1 : i32, i32
  }
  func.func @transform_2(%arg0: i32, %arg1: i32) -> (i32, i32) {
    %c0_i32 = arith.constant 0 : i32
    return %arg0, %arg1 : i32, i32
  }
  func.func @transform_3(%arg0: i32, %arg1: i32) -> (i32, i32) {
    %c0_i32 = arith.constant 0 : i32
    return %arg0, %arg1 : i32, i32
  }
  func.func @transform_4(%arg0: i32, %arg1: i32) -> (i32, i32) {
    %c0_i32 = arith.constant 0 : i32
    return %arg0, %arg1 : i32, i32
  }
}

module attributes {stable_mosaic.version = 11 : i64} {
  func.func @kernel(%arg0: i32, %arg1: i32, %arg2: memref<512x128xbf16, #tpu.memory_space<vmem>>, %arg3: memref<1x128xf32, #tpu.memory_space<vmem>>, %arg4: memref<1x128xf32, #tpu.memory_space<vmem>>, %arg5: memref<512x128xbf16, #tpu.memory_space<vmem>>) attributes {dimension_semantics = [#tpu.dimension_semantics<parallel>, #tpu.dimension_semantics<parallel>], iteration_bounds = array<i64: 1, 1>, scalar_prefetch = 0 : i64, scratch_operands = 0 : i64, tpu.core_type = #tpu.core_type<tc>, window_params = [{transform_indices = @transform_0, window_bounds = array<i64: 512, 128>}, {transform_indices = @transform_1, window_bounds = array<i64: 1, 128>}, {transform_indices = @transform_2, window_bounds = array<i64: 1, 128>}, {transform_indices = @transform_3, window_bounds = array<i64: 512, 128>}]} {
    %c0 = arith.constant 0 : index
    %c0_0 = arith.constant 0 : index
    %0 = vector.load %arg2[%c0, %c0_0] : memref<512x128xbf16, #tpu.memory_space<vmem>>, vector<512x128xbf16>
    %1 = arith.extf %0 : vector<512x128xbf16> to vector<512x128xf32>
    %c0_1 = arith.constant 0 : index
    %c0_2 = arith.constant 0 : index
    %2 = vector.load %arg3[%c0_1, %c0_2] : memref<1x128xf32, #tpu.memory_space<vmem>>, vector<1x128xf32>
    %3 = vector.broadcast %2 : vector<1x128xf32> to vector<512x128xf32>
    %4 = arith.mulf %1, %3 : vector<512x128xf32>
    %c0_3 = arith.constant 0 : index
    %c0_4 = arith.constant 0 : index
    %5 = vector.load %arg4[%c0_3, %c0_4] : memref<1x128xf32, #tpu.memory_space<vmem>>, vector<1x128xf32>
    %6 = vector.broadcast %5 : vector<1x128xf32> to vector<512x128xf32>
    %7 = arith.addf %4, %6 : vector<512x128xf32>
    %cst = arith.constant 0.000000e+00 : f32
    %8 = vector.broadcast %cst : f32 to vector<512x128xf32>
    %9 = arith.maximumf %7, %8 : vector<512x128xf32>
    %10 = arith.truncf %9 : vector<512x128xf32> to vector<512x128xbf16>
    %c0_5 = arith.constant 0 : index
    %c0_6 = arith.constant 0 : index
    %11 = vector.load %arg5[%c0_5, %c0_6] : memref<512x128xbf16, #tpu.memory_space<vmem>>, vector<512x128xbf16>
    tpu.vector_store %arg5[%c0_5, %c0_6], %10 {strides = array<i32>} : memref<512x128xbf16, #tpu.memory_space<vmem>>, vector<512x128xbf16>,
    return
  }
  func.func @transform_0(%arg0: i32, %arg1: i32) -> (i32, i32) {
    %c0_i32 = arith.constant 0 : i32
    return %arg0, %arg1 : i32, i32
  }
  func.func @transform_1(%arg0: i32, %arg1: i32) -> (i32, i32) {
    %c0_i32 = arith.constant 0 : i32
    %c0_i32_0 = arith.constant 0 : i32
    return %c0_i32, %arg1 : i32, i32
  }
  func.func @transform_2(%arg0: i32, %arg1: i32) -> (i32, i32) {
    %c0_i32 = arith.constant 0 : i32
    %c0_i32_0 = arith.constant 0 : i32
    return %c0_i32, %arg1 : i32, i32
  }
  func.func @transform_3(%arg0: i32, %arg1: i32) -> (i32, i32) {
    %c0_i32 = arith.constant 0 : i32
    return %arg0, %arg1 : i32, i32
  }
}

module attributes {stable_mosaic.version = 11 : i64} {
  func.func @kernel(%arg0: i32, %arg1: i32, %arg2: memref<128x128xbf16, #tpu.memory_space<vmem>>, %arg3: memref<1x128xf32, #tpu.memory_space<vmem>>, %arg4: memref<1x128xf32, #tpu.memory_space<vmem>>, %arg5: memref<128x128xbf16, #tpu.memory_space<vmem>>) attributes {dimension_semantics = [#tpu.dimension_semantics<parallel>, #tpu.dimension_semantics<parallel>], iteration_bounds = array<i64: 1, 1>, scalar_prefetch = 0 : i64, scratch_operands = 0 : i64, tpu.core_type = #tpu.core_type<tc>, window_params = [{transform_indices = @transform_0, window_bounds = array<i64: 128, 128>}, {transform_indices = @transform_1, window_bounds = array<i64: 1, 128>}, {transform_indices = @transform_2, window_bounds = array<i64: 1, 128>}, {transform_indices = @transform_3, window_bounds = array<i64: 128, 128>}]} {
    %c0 = arith.constant 0 : index
    %c0_0 = arith.constant 0 : index
    %0 = vector.load %arg2[%c0, %c0_0] : memref<128x128xbf16, #tpu.memory_space<vmem>>, vector<128x128xbf16>
    %1 = arith.extf %0 : vector<128x128xbf16> to vector<128x128xf32>
    %c0_1 = arith.constant 0 : index
    %c0_2 = arith.constant 0 : index
    %2 = vector.load %arg3[%c0_1, %c0_2] : memref<1x128xf32, #tpu.memory_space<vmem>>, vector<1x128xf32>
    %3 = vector.broadcast %2 : vector<1x128xf32> to vector<128x128xf32>
    %4 = arith.mulf %1, %3 : vector<128x128xf32>
    %c0_3 = arith.constant 0 : index
    %c0_4 = arith.constant 0 : index
    %5 = vector.load %arg4[%c0_3, %c0_4] : memref<1x128xf32, #tpu.memory_space<vmem>>, vector<1x128xf32>
    %6 = vector.broadcast %5 : vector<1x128xf32> to vector<128x128xf32>
    %7 = arith.addf %4, %6 : vector<128x128xf32>
    %cst = arith.constant 0.000000e+00 : f32
    %8 = vector.broadcast %cst : f32 to vector<128x128xf32>
    %9 = arith.maximumf %7, %8 : vector<128x128xf32>
    %10 = arith.truncf %9 : vector<128x128xf32> to vector<128x128xbf16>
    %c0_5 = arith.constant 0 : index
    %c0_6 = arith.constant 0 : index
    %11 = vector.load %arg5[%c0_5, %c0_6] : memref<128x128xbf16, #tpu.memory_space<vmem>>, vector<128x128xbf16>
    tpu.vector_store %arg5[%c0_5, %c0_6], %10 {strides = array<i32>} : memref<128x128xbf16, #tpu.memory_space<vmem>>, vector<128x128xbf16>,
    return
  }
  func.func @transform_0(%arg0: i32, %arg1: i32) -> (i32, i32) {
    %c0_i32 = arith.constant 0 : i32
    return %arg0, %arg1 : i32, i32
  }
  func.func @transform_1(%arg0: i32, %arg1: i32) -> (i32, i32) {
    %c0_i32 = arith.constant 0 : i32
    %c0_i32_0 = arith.constant 0 : i32
    return %c0_i32, %arg1 : i32, i32
  }
  func.func @transform_2(%arg0: i32, %arg1: i32) -> (i32, i32) {
    %c0_i32 = arith.constant 0 : i32
    %c0_i32_0 = arith.constant 0 : i32
    return %c0_i32, %arg1 : i32, i32
  }
  func.func @transform_3(%arg0: i32, %arg1: i32) -> (i32, i32) {
    %c0_i32 = arith.constant 0 : i32
    return %arg0, %arg1 : i32, i32
  }
}

module attributes {stable_mosaic.version = 11 : i64} {
  func.func @_matmul_stats_kernel(%arg0: i32, %arg1: i32, %arg2: memref<128x128xbf16, #tpu.memory_space<vmem>>, %arg3: memref<128x128xbf16, #tpu.memory_space<vmem>>, %arg4: memref<128x128xbf16, #tpu.memory_space<vmem>>, %arg5: memref<8x128xf32, #tpu.memory_space<vmem>>, %arg6: memref<8x128xf32, #tpu.memory_space<vmem>>) attributes {dimension_semantics = [#tpu.dimension_semantics<parallel>, #tpu.dimension_semantics<parallel>], iteration_bounds = array<i64: 1, 1>, scalar_prefetch = 0 : i64, scratch_operands = 0 : i64, tpu.core_type = #tpu.core_type<tc>, window_params = [{transform_indices = @transform_0, window_bounds = array<i64: 128, 128>}, {transform_indices = @transform_1, window_bounds = array<i64: 128, 128>}, {transform_indices = @transform_2, window_bounds = array<i64: 128, 128>}, {transform_indices = @transform_3, window_bounds = array<i64: 8, 128>}, {transform_indices = @transform_4, window_bounds = array<i64: 8, 128>}]} {
    %c0 = arith.constant 0 : index
    %c0_0 = arith.constant 0 : index
    %0 = vector.load %arg2[%c0, %c0_0] : memref<128x128xbf16, #tpu.memory_space<vmem>>, vector<128x128xbf16>
    %c0_1 = arith.constant 0 : index
    %c0_2 = arith.constant 0 : index
    %1 = vector.load %arg3[%c0_1, %c0_2] : memref<128x128xbf16, #tpu.memory_space<vmem>>, vector<128x128xbf16>
    %cst = arith.constant dense<0.000000e+00> : vector<128x128xf32>
    %2 = tpu.matmul %0, %1, %cst {dimension_numbers = #tpu.dot_dimension_numbers<[1], [0], [0], [1], [0, 0, 1, 1], [], []>} : vector<128x128xbf16>, vector<128x128xbf16>, vector<128x128xf32> -> vector<128x128xf32>
    %3 = arith.truncf %2 : vector<128x128xf32> to vector<128x128xbf16>
    %c0_3 = arith.constant 0 : index
    %c0_4 = arith.constant 0 : index
    %4 = vector.load %arg4[%c0_3, %c0_4] : memref<128x128xbf16, #tpu.memory_space<vmem>>, vector<128x128xbf16>
    tpu.vector_store %arg4[%c0_3, %c0_4], %3 {strides = array<i32>} : memref<128x128xbf16, #tpu.memory_space<vmem>>, vector<128x128xbf16>,
    %cst_5 = arith.constant dense<0.000000e+00> : vector<128xf32>
    %5 = vector.multi_reduction <add>, %2, %cst_5 [0] : vector<128x128xf32> to vector<128xf32>
    %6 = vector.shape_cast %5 : vector<128xf32> to vector<1x128xf32>
    %7 = arith.mulf %2, %2 : vector<128x128xf32>
    %cst_6 = arith.constant dense<0.000000e+00> : vector<128xf32>
    %8 = vector.multi_reduction <add>, %7, %cst_6 [0] : vector<128x128xf32> to vector<128xf32>
    %9 = vector.shape_cast %8 : vector<128xf32> to vector<1x128xf32>
    %10 = vector.shape_cast %6 : vector<1x128xf32> to vector<1x128xf32>
    %11 = vector.broadcast %10 : vector<1x128xf32> to vector<8x128xf32>
    %c0_7 = arith.constant 0 : index
    %c0_8 = arith.constant 0 : index
    %12 = vector.load %arg5[%c0_7, %c0_8] : memref<8x128xf32, #tpu.memory_space<vmem>>, vector<8x128xf32>
    tpu.vector_store %arg5[%c0_7, %c0_8], %11 {strides = array<i32>} : memref<8x128xf32, #tpu.memory_space<vmem>>, vector<8x128xf32>,
    %13 = vector.shape_cast %9 : vector<1x128xf32> to vector<1x128xf32>
    %14 = vector.broadcast %13 : vector<1x128xf32> to vector<8x128xf32>
    %c0_9 = arith.constant 0 : index
    %c0_10 = arith.constant 0 : index
    %15 = vector.load %arg6[%c0_9, %c0_10] : memref<8x128xf32, #tpu.memory_space<vmem>>, vector<8x128xf32>
    tpu.vector_store %arg6[%c0_9, %c0_10], %14 {strides = array<i32>} : memref<8x128xf32, #tpu.memory_space<vmem>>, vector<8x128xf32>,
    return
  }
  func.func @transform_0(%arg0: i32, %arg1: i32) -> (i32, i32) {
    %c0_i32 = arith.constant 0 : i32
    %c0_i32_0 = arith.constant 0 : i32
    return %arg0, %c0_i32 : i32, i32
  }
  func.func @transform_1(%arg0: i32, %arg1: i32) -> (i32, i32) {
    %c0_i32 = arith.constant 0 : i32
    %c0_i32_0 = arith.constant 0 : i32
    return %c0_i32, %arg1 : i32, i32
  }
  func.func @transform_2(%arg0: i32, %arg1: i32) -> (i32, i32) {
    %c0_i32 = arith.constant 0 : i32
    return %arg0, %arg1 : i32, i32
  }
  func.func @transform_3(%arg0: i32, %arg1: i32) -> (i32, i32) {
    %c0_i32 = arith.constant 0 : i32
    return %arg0, %arg1 : i32, i32
  }
  func.func @transform_4(%arg0: i32, %arg1: i32) -> (i32, i32) {
    %c0_i32 = arith.constant 0 : i32
    return %arg0, %arg1 : i32, i32
  }
}

module attributes {stable_mosaic.version = 11 : i64} {
  func.func @kernel(%arg0: i32, %arg1: i32, %arg2: memref<128x128xbf16, #tpu.memory_space<vmem>>, %arg3: memref<1x128xf32, #tpu.memory_space<vmem>>, %arg4: memref<1x128xf32, #tpu.memory_space<vmem>>, %arg5: memref<128x128xbf16, #tpu.memory_space<vmem>>) attributes {dimension_semantics = [#tpu.dimension_semantics<parallel>, #tpu.dimension_semantics<parallel>], iteration_bounds = array<i64: 1, 1>, scalar_prefetch = 0 : i64, scratch_operands = 0 : i64, tpu.core_type = #tpu.core_type<tc>, window_params = [{transform_indices = @transform_0, window_bounds = array<i64: 128, 128>}, {transform_indices = @transform_1, window_bounds = array<i64: 1, 128>}, {transform_indices = @transform_2, window_bounds = array<i64: 1, 128>}, {transform_indices = @transform_3, window_bounds = array<i64: 128, 128>}]} {
    %c0 = arith.constant 0 : index
    %c0_0 = arith.constant 0 : index
    %0 = vector.load %arg2[%c0, %c0_0] : memref<128x128xbf16, #tpu.memory_space<vmem>>, vector<128x128xbf16>
    %1 = arith.extf %0 : vector<128x128xbf16> to vector<128x128xf32>
    %c0_1 = arith.constant 0 : index
    %c0_2 = arith.constant 0 : index
    %2 = vector.load %arg3[%c0_1, %c0_2] : memref<1x128xf32, #tpu.memory_space<vmem>>, vector<1x128xf32>
    %3 = vector.broadcast %2 : vector<1x128xf32> to vector<128x128xf32>
    %4 = arith.mulf %1, %3 : vector<128x128xf32>
    %c0_3 = arith.constant 0 : index
    %c0_4 = arith.constant 0 : index
    %5 = vector.load %arg4[%c0_3, %c0_4] : memref<1x128xf32, #tpu.memory_space<vmem>>, vector<1x128xf32>
    %6 = vector.broadcast %5 : vector<1x128xf32> to vector<128x128xf32>
    %7 = arith.addf %4, %6 : vector<128x128xf32>
    %8 = arith.truncf %7 : vector<128x128xf32> to vector<128x128xbf16>
    %c0_5 = arith.constant 0 : index
    %c0_6 = arith.constant 0 : index
    %9 = vector.load %arg5[%c0_5, %c0_6] : memref<128x128xbf16, #tpu.memory_space<vmem>>, vector<128x128xbf16>
    tpu.vector_store %arg5[%c0_5, %c0_6], %8 {strides = array<i32>} : memref<128x128xbf16, #tpu.memory_space<vmem>>, vector<128x128xbf16>,
    return
  }
  func.func @transform_0(%arg0: i32, %arg1: i32) -> (i32, i32) {
    %c0_i32 = arith.constant 0 : i32
    return %arg0, %arg1 : i32, i32
  }
  func.func @transform_1(%arg0: i32, %arg1: i32) -> (i32, i32) {
    %c0_i32 = arith.constant 0 : i32
    %c0_i32_0 = arith.constant 0 : i32
    return %c0_i32, %arg1 : i32, i32
  }
  func.func @transform_2(%arg0: i32, %arg1: i32) -> (i32, i32) {
    %c0_i32 = arith.constant 0 : i32
    %c0_i32_0 = arith.constant 0 : i32
    return %c0_i32, %arg1 : i32, i32
  }
  func.func @transform_3(%arg0: i32, %arg1: i32) -> (i32, i32) {
    %c0_i32 = arith.constant 0 : i32
    return %arg0, %arg1 : i32, i32
  }
}

module attributes {stable_mosaic.version = 11 : i64} {
  func.func @kernel(%arg0: i32, %arg1: i32, %arg2: memref<128x128xbf16, #tpu.memory_space<vmem>>, %arg3: memref<1x128xf32, #tpu.memory_space<vmem>>, %arg4: memref<1x128xf32, #tpu.memory_space<vmem>>, %arg5: memref<128x128xbf16, #tpu.memory_space<vmem>>, %arg6: memref<128x128xbf16, #tpu.memory_space<vmem>>) attributes {dimension_semantics = [#tpu.dimension_semantics<parallel>, #tpu.dimension_semantics<parallel>], iteration_bounds = array<i64: 1, 1>, scalar_prefetch = 0 : i64, scratch_operands = 0 : i64, tpu.core_type = #tpu.core_type<tc>, window_params = [{transform_indices = @transform_0, window_bounds = array<i64: 128, 128>}, {transform_indices = @transform_1, window_bounds = array<i64: 1, 128>}, {transform_indices = @transform_2, window_bounds = array<i64: 1, 128>}, {transform_indices = @transform_3, window_bounds = array<i64: 128, 128>}, {transform_indices = @transform_4, window_bounds = array<i64: 128, 128>}]} {
    %c0 = arith.constant 0 : index
    %c0_0 = arith.constant 0 : index
    %0 = vector.load %arg2[%c0, %c0_0] : memref<128x128xbf16, #tpu.memory_space<vmem>>, vector<128x128xbf16>
    %1 = arith.extf %0 : vector<128x128xbf16> to vector<128x128xf32>
    %c0_1 = arith.constant 0 : index
    %c0_2 = arith.constant 0 : index
    %2 = vector.load %arg3[%c0_1, %c0_2] : memref<1x128xf32, #tpu.memory_space<vmem>>, vector<1x128xf32>
    %3 = vector.broadcast %2 : vector<1x128xf32> to vector<128x128xf32>
    %4 = arith.mulf %1, %3 : vector<128x128xf32>
    %c0_3 = arith.constant 0 : index
    %c0_4 = arith.constant 0 : index
    %5 = vector.load %arg4[%c0_3, %c0_4] : memref<1x128xf32, #tpu.memory_space<vmem>>, vector<1x128xf32>
    %6 = vector.broadcast %5 : vector<1x128xf32> to vector<128x128xf32>
    %7 = arith.addf %4, %6 : vector<128x128xf32>
    %c0_5 = arith.constant 0 : index
    %c0_6 = arith.constant 0 : index
    %8 = vector.load %arg5[%c0_5, %c0_6] : memref<128x128xbf16, #tpu.memory_space<vmem>>, vector<128x128xbf16>
    %9 = arith.extf %8 : vector<128x128xbf16> to vector<128x128xf32>
    %10 = arith.addf %7, %9 : vector<128x128xf32>
    %cst = arith.constant 0.000000e+00 : f32
    %11 = vector.broadcast %cst : f32 to vector<128x128xf32>
    %12 = arith.maximumf %10, %11 : vector<128x128xf32>
    %13 = arith.truncf %12 : vector<128x128xf32> to vector<128x128xbf16>
    %c0_7 = arith.constant 0 : index
    %c0_8 = arith.constant 0 : index
    %14 = vector.load %arg6[%c0_7, %c0_8] : memref<128x128xbf16, #tpu.memory_space<vmem>>, vector<128x128xbf16>
    tpu.vector_store %arg6[%c0_7, %c0_8], %13 {strides = array<i32>} : memref<128x128xbf16, #tpu.memory_space<vmem>>, vector<128x128xbf16>,
    return
  }
  func.func @transform_0(%arg0: i32, %arg1: i32) -> (i32, i32) {
    %c0_i32 = arith.constant 0 : i32
    return %arg0, %arg1 : i32, i32
  }
  func.func @transform_1(%arg0: i32, %arg1: i32) -> (i32, i32) {
    %c0_i32 = arith.constant 0 : i32
    %c0_i32_0 = arith.constant 0 : i32
    return %c0_i32, %arg1 : i32, i32
  }
  func.func @transform_2(%arg0: i32, %arg1: i32) -> (i32, i32) {
    %c0_i32 = arith.constant 0 : i32
    %c0_i32_0 = arith.constant 0 : i32
    return %c0_i32, %arg1 : i32, i32
  }
  func.func @transform_3(%arg0: i32, %arg1: i32) -> (i32, i32) {
    %c0_i32 = arith.constant 0 : i32
    return %arg0, %arg1 : i32, i32
  }
  func.func @transform_4(%arg0: i32, %arg1: i32) -> (i32, i32) {
    %c0_i32 = arith.constant 0 : i32
    return %arg0, %arg1 : i32, i32
  }
}

module attributes {stable_mosaic.version = 11 : i64} {
  func.func @_matmul_stats_kernel(%arg0: i32, %arg1: i32, %arg2: memref<128x256xbf16, #tpu.memory_space<vmem>>, %arg3: memref<256x128xbf16, #tpu.memory_space<vmem>>, %arg4: memref<128x128xbf16, #tpu.memory_space<vmem>>, %arg5: memref<8x128xf32, #tpu.memory_space<vmem>>, %arg6: memref<8x128xf32, #tpu.memory_space<vmem>>) attributes {dimension_semantics = [#tpu.dimension_semantics<parallel>, #tpu.dimension_semantics<parallel>], iteration_bounds = array<i64: 1, 1>, scalar_prefetch = 0 : i64, scratch_operands = 0 : i64, tpu.core_type = #tpu.core_type<tc>, window_params = [{transform_indices = @transform_0, window_bounds = array<i64: 128, 256>}, {transform_indices = @transform_1, window_bounds = array<i64: 256, 128>}, {transform_indices = @transform_2, window_bounds = array<i64: 128, 128>}, {transform_indices = @transform_3, window_bounds = array<i64: 8, 128>}, {transform_indices = @transform_4, window_bounds = array<i64: 8, 128>}]} {
    %c0 = arith.constant 0 : index
    %c0_0 = arith.constant 0 : index
    %0 = vector.load %arg2[%c0, %c0_0] : memref<128x256xbf16, #tpu.memory_space<vmem>>, vector<128x256xbf16>
    %c0_1 = arith.constant 0 : index
    %c0_2 = arith.constant 0 : index
    %1 = vector.load %arg3[%c0_1, %c0_2] : memref<256x128xbf16, #tpu.memory_space<vmem>>, vector<256x128xbf16>
    %cst = arith.constant dense<0.000000e+00> : vector<128x128xf32>
    %2 = tpu.matmul %0, %1, %cst {dimension_numbers = #tpu.dot_dimension_numbers<[1], [0], [0], [1], [0, 0, 1, 1], [], []>} : vector<128x256xbf16>, vector<256x128xbf16>, vector<128x128xf32> -> vector<128x128xf32>
    %3 = arith.truncf %2 : vector<128x128xf32> to vector<128x128xbf16>
    %c0_3 = arith.constant 0 : index
    %c0_4 = arith.constant 0 : index
    %4 = vector.load %arg4[%c0_3, %c0_4] : memref<128x128xbf16, #tpu.memory_space<vmem>>, vector<128x128xbf16>
    tpu.vector_store %arg4[%c0_3, %c0_4], %3 {strides = array<i32>} : memref<128x128xbf16, #tpu.memory_space<vmem>>, vector<128x128xbf16>,
    %cst_5 = arith.constant dense<0.000000e+00> : vector<128xf32>
    %5 = vector.multi_reduction <add>, %2, %cst_5 [0] : vector<128x128xf32> to vector<128xf32>
    %6 = vector.shape_cast %5 : vector<128xf32> to vector<1x128xf32>
    %7 = arith.mulf %2, %2 : vector<128x128xf32>
    %cst_6 = arith.constant dense<0.000000e+00> : vector<128xf32>
    %8 = vector.multi_reduction <add>, %7, %cst_6 [0] : vector<128x128xf32> to vector<128xf32>
    %9 = vector.shape_cast %8 : vector<128xf32> to vector<1x128xf32>
    %10 = vector.shape_cast %6 : vector<1x128xf32> to vector<1x128xf32>
    %11 = vector.broadcast %10 : vector<1x128xf32> to vector<8x128xf32>
    %c0_7 = arith.constant 0 : index
    %c0_8 = arith.constant 0 : index
    %12 = vector.load %arg5[%c0_7, %c0_8] : memref<8x128xf32, #tpu.memory_space<vmem>>, vector<8x128xf32>
    tpu.vector_store %arg5[%c0_7, %c0_8], %11 {strides = array<i32>} : memref<8x128xf32, #tpu.memory_space<vmem>>, vector<8x128xf32>,
    %13 = vector.shape_cast %9 : vector<1x128xf32> to vector<1x128xf32>
    %14 = vector.broadcast %13 : vector<1x128xf32> to vector<8x128xf32>
    %c0_9 = arith.constant 0 : index
    %c0_10 = arith.constant 0 : index
    %15 = vector.load %arg6[%c0_9, %c0_10] : memref<8x128xf32, #tpu.memory_space<vmem>>, vector<8x128xf32>
    tpu.vector_store %arg6[%c0_9, %c0_10], %14 {strides = array<i32>} : memref<8x128xf32, #tpu.memory_space<vmem>>, vector<8x128xf32>,
    return
  }
  func.func @transform_0(%arg0: i32, %arg1: i32) -> (i32, i32) {
    %c0_i32 = arith.constant 0 : i32
    %c0_i32_0 = arith.constant 0 : i32
    return %arg0, %c0_i32 : i32, i32
  }
  func.func @transform_1(%arg0: i32, %arg1: i32) -> (i32, i32) {
    %c0_i32 = arith.constant 0 : i32
    %c0_i32_0 = arith.constant 0 : i32
    return %c0_i32, %arg1 : i32, i32
  }
  func.func @transform_2(%arg0: i32, %arg1: i32) -> (i32, i32) {
    %c0_i32 = arith.constant 0 : i32
    return %arg0, %arg1 : i32, i32
  }
  func.func @transform_3(%arg0: i32, %arg1: i32) -> (i32, i32) {
    %c0_i32 = arith.constant 0 : i32
    return %arg0, %arg1 : i32, i32
  }
  func.func @transform_4(%arg0: i32, %arg1: i32) -> (i32, i32) {
    %c0_i32 = arith.constant 0 : i32
    return %arg0, %arg1 : i32, i32
  }
}

module attributes {stable_mosaic.version = 11 : i64} {
  func.func @_matmul_stats_kernel(%arg0: i32, %arg1: i32, %arg2: memref<32x256xbf16, #tpu.memory_space<vmem>>, %arg3: memref<256x128xbf16, #tpu.memory_space<vmem>>, %arg4: memref<32x128xbf16, #tpu.memory_space<vmem>>, %arg5: memref<8x128xf32, #tpu.memory_space<vmem>>, %arg6: memref<8x128xf32, #tpu.memory_space<vmem>>) attributes {dimension_semantics = [#tpu.dimension_semantics<parallel>, #tpu.dimension_semantics<parallel>], iteration_bounds = array<i64: 1, 1>, scalar_prefetch = 0 : i64, scratch_operands = 0 : i64, tpu.core_type = #tpu.core_type<tc>, window_params = [{transform_indices = @transform_0, window_bounds = array<i64: 32, 256>}, {transform_indices = @transform_1, window_bounds = array<i64: 256, 128>}, {transform_indices = @transform_2, window_bounds = array<i64: 32, 128>}, {transform_indices = @transform_3, window_bounds = array<i64: 8, 128>}, {transform_indices = @transform_4, window_bounds = array<i64: 8, 128>}]} {
    %c0 = arith.constant 0 : index
    %c0_0 = arith.constant 0 : index
    %0 = vector.load %arg2[%c0, %c0_0] : memref<32x256xbf16, #tpu.memory_space<vmem>>, vector<32x256xbf16>
    %c0_1 = arith.constant 0 : index
    %c0_2 = arith.constant 0 : index
    %1 = vector.load %arg3[%c0_1, %c0_2] : memref<256x128xbf16, #tpu.memory_space<vmem>>, vector<256x128xbf16>
    %cst = arith.constant dense<0.000000e+00> : vector<32x128xf32>
    %2 = tpu.matmul %0, %1, %cst {dimension_numbers = #tpu.dot_dimension_numbers<[1], [0], [0], [1], [0, 0, 1, 1], [], []>} : vector<32x256xbf16>, vector<256x128xbf16>, vector<32x128xf32> -> vector<32x128xf32>
    %3 = arith.truncf %2 : vector<32x128xf32> to vector<32x128xbf16>
    %c0_3 = arith.constant 0 : index
    %c0_4 = arith.constant 0 : index
    %4 = vector.load %arg4[%c0_3, %c0_4] : memref<32x128xbf16, #tpu.memory_space<vmem>>, vector<32x128xbf16>
    tpu.vector_store %arg4[%c0_3, %c0_4], %3 {strides = array<i32>} : memref<32x128xbf16, #tpu.memory_space<vmem>>, vector<32x128xbf16>,
    %cst_5 = arith.constant dense<0.000000e+00> : vector<128xf32>
    %5 = vector.multi_reduction <add>, %2, %cst_5 [0] : vector<32x128xf32> to vector<128xf32>
    %6 = vector.shape_cast %5 : vector<128xf32> to vector<1x128xf32>
    %7 = arith.mulf %2, %2 : vector<32x128xf32>
    %cst_6 = arith.constant dense<0.000000e+00> : vector<128xf32>
    %8 = vector.multi_reduction <add>, %7, %cst_6 [0] : vector<32x128xf32> to vector<128xf32>
    %9 = vector.shape_cast %8 : vector<128xf32> to vector<1x128xf32>
    %10 = vector.shape_cast %6 : vector<1x128xf32> to vector<1x128xf32>
    %11 = vector.broadcast %10 : vector<1x128xf32> to vector<8x128xf32>
    %c0_7 = arith.constant 0 : index
    %c0_8 = arith.constant 0 : index
    %12 = vector.load %arg5[%c0_7, %c0_8] : memref<8x128xf32, #tpu.memory_space<vmem>>, vector<8x128xf32>
    tpu.vector_store %arg5[%c0_7, %c0_8], %11 {strides = array<i32>} : memref<8x128xf32, #tpu.memory_space<vmem>>, vector<8x128xf32>,
    %13 = vector.shape_cast %9 : vector<1x128xf32> to vector<1x128xf32>
    %14 = vector.broadcast %13 : vector<1x128xf32> to vector<8x128xf32>
    %c0_9 = arith.constant 0 : index
    %c0_10 = arith.constant 0 : index
    %15 = vector.load %arg6[%c0_9, %c0_10] : memref<8x128xf32, #tpu.memory_space<vmem>>, vector<8x128xf32>
    tpu.vector_store %arg6[%c0_9, %c0_10], %14 {strides = array<i32>} : memref<8x128xf32, #tpu.memory_space<vmem>>, vector<8x128xf32>,
    return
  }
  func.func @transform_0(%arg0: i32, %arg1: i32) -> (i32, i32) {
    %c0_i32 = arith.constant 0 : i32
    %c0_i32_0 = arith.constant 0 : i32
    return %arg0, %c0_i32 : i32, i32
  }
  func.func @transform_1(%arg0: i32, %arg1: i32) -> (i32, i32) {
    %c0_i32 = arith.constant 0 : i32
    %c0_i32_0 = arith.constant 0 : i32
    return %c0_i32, %arg1 : i32, i32
  }
  func.func @transform_2(%arg0: i32, %arg1: i32) -> (i32, i32) {
    %c0_i32 = arith.constant 0 : i32
    return %arg0, %arg1 : i32, i32
  }
  func.func @transform_3(%arg0: i32, %arg1: i32) -> (i32, i32) {
    %c0_i32 = arith.constant 0 : i32
    return %arg0, %arg1 : i32, i32
  }
  func.func @transform_4(%arg0: i32, %arg1: i32) -> (i32, i32) {
    %c0_i32 = arith.constant 0 : i32
    return %arg0, %arg1 : i32, i32
  }
}

module attributes {stable_mosaic.version = 11 : i64} {
  func.func @kernel(%arg0: i32, %arg1: i32, %arg2: memref<32x128xbf16, #tpu.memory_space<vmem>>, %arg3: memref<1x128xf32, #tpu.memory_space<vmem>>, %arg4: memref<1x128xf32, #tpu.memory_space<vmem>>, %arg5: memref<32x128xbf16, #tpu.memory_space<vmem>>) attributes {dimension_semantics = [#tpu.dimension_semantics<parallel>, #tpu.dimension_semantics<parallel>], iteration_bounds = array<i64: 1, 1>, scalar_prefetch = 0 : i64, scratch_operands = 0 : i64, tpu.core_type = #tpu.core_type<tc>, window_params = [{transform_indices = @transform_0, window_bounds = array<i64: 32, 128>}, {transform_indices = @transform_1, window_bounds = array<i64: 1, 128>}, {transform_indices = @transform_2, window_bounds = array<i64: 1, 128>}, {transform_indices = @transform_3, window_bounds = array<i64: 32, 128>}]} {
    %c0 = arith.constant 0 : index
    %c0_0 = arith.constant 0 : index
    %0 = vector.load %arg2[%c0, %c0_0] : memref<32x128xbf16, #tpu.memory_space<vmem>>, vector<32x128xbf16>
    %1 = arith.extf %0 : vector<32x128xbf16> to vector<32x128xf32>
    %c0_1 = arith.constant 0 : index
    %c0_2 = arith.constant 0 : index
    %2 = vector.load %arg3[%c0_1, %c0_2] : memref<1x128xf32, #tpu.memory_space<vmem>>, vector<1x128xf32>
    %3 = vector.broadcast %2 : vector<1x128xf32> to vector<32x128xf32>
    %4 = arith.mulf %1, %3 : vector<32x128xf32>
    %c0_3 = arith.constant 0 : index
    %c0_4 = arith.constant 0 : index
    %5 = vector.load %arg4[%c0_3, %c0_4] : memref<1x128xf32, #tpu.memory_space<vmem>>, vector<1x128xf32>
    %6 = vector.broadcast %5 : vector<1x128xf32> to vector<32x128xf32>
    %7 = arith.addf %4, %6 : vector<32x128xf32>
    %cst = arith.constant 0.000000e+00 : f32
    %8 = vector.broadcast %cst : f32 to vector<32x128xf32>
    %9 = arith.maximumf %7, %8 : vector<32x128xf32>
    %10 = arith.truncf %9 : vector<32x128xf32> to vector<32x128xbf16>
    %c0_5 = arith.constant 0 : index
    %c0_6 = arith.constant 0 : index
    %11 = vector.load %arg5[%c0_5, %c0_6] : memref<32x128xbf16, #tpu.memory_space<vmem>>, vector<32x128xbf16>
    tpu.vector_store %arg5[%c0_5, %c0_6], %10 {strides = array<i32>} : memref<32x128xbf16, #tpu.memory_space<vmem>>, vector<32x128xbf16>,
    return
  }
  func.func @transform_0(%arg0: i32, %arg1: i32) -> (i32, i32) {
    %c0_i32 = arith.constant 0 : i32
    return %arg0, %arg1 : i32, i32
  }
  func.func @transform_1(%arg0: i32, %arg1: i32) -> (i32, i32) {
    %c0_i32 = arith.constant 0 : i32
    %c0_i32_0 = arith.constant 0 : i32
    return %c0_i32, %arg1 : i32, i32
  }
  func.func @transform_2(%arg0: i32, %arg1: i32) -> (i32, i32) {
    %c0_i32 = arith.constant 0 : i32
    %c0_i32_0 = arith.constant 0 : i32
    return %c0_i32, %arg1 : i32, i32
  }
  func.func @transform_3(%arg0: i32, %arg1: i32) -> (i32, i32) {
    %c0_i32 = arith.constant 0 : i32
    return %arg0, %arg1 : i32, i32
  }
}

module attributes {stable_mosaic.version = 11 : i64} {
  func.func @_matmul_stats_kernel(%arg0: i32, %arg1: i32, %arg2: memref<32x384xbf16, #tpu.memory_space<vmem>>, %arg3: memref<384x128xbf16, #tpu.memory_space<vmem>>, %arg4: memref<32x128xbf16, #tpu.memory_space<vmem>>, %arg5: memref<8x128xf32, #tpu.memory_space<vmem>>, %arg6: memref<8x128xf32, #tpu.memory_space<vmem>>) attributes {dimension_semantics = [#tpu.dimension_semantics<parallel>, #tpu.dimension_semantics<parallel>], iteration_bounds = array<i64: 1, 1>, scalar_prefetch = 0 : i64, scratch_operands = 0 : i64, tpu.core_type = #tpu.core_type<tc>, window_params = [{transform_indices = @transform_0, window_bounds = array<i64: 32, 384>}, {transform_indices = @transform_1, window_bounds = array<i64: 384, 128>}, {transform_indices = @transform_2, window_bounds = array<i64: 32, 128>}, {transform_indices = @transform_3, window_bounds = array<i64: 8, 128>}, {transform_indices = @transform_4, window_bounds = array<i64: 8, 128>}]} {
    %c0 = arith.constant 0 : index
    %c0_0 = arith.constant 0 : index
    %0 = vector.load %arg2[%c0, %c0_0] : memref<32x384xbf16, #tpu.memory_space<vmem>>, vector<32x384xbf16>
    %c0_1 = arith.constant 0 : index
    %c0_2 = arith.constant 0 : index
    %1 = vector.load %arg3[%c0_1, %c0_2] : memref<384x128xbf16, #tpu.memory_space<vmem>>, vector<384x128xbf16>
    %cst = arith.constant dense<0.000000e+00> : vector<32x128xf32>
    %2 = tpu.matmul %0, %1, %cst {dimension_numbers = #tpu.dot_dimension_numbers<[1], [0], [0], [1], [0, 0, 1, 1], [], []>} : vector<32x384xbf16>, vector<384x128xbf16>, vector<32x128xf32> -> vector<32x128xf32>
    %3 = arith.truncf %2 : vector<32x128xf32> to vector<32x128xbf16>
    %c0_3 = arith.constant 0 : index
    %c0_4 = arith.constant 0 : index
    %4 = vector.load %arg4[%c0_3, %c0_4] : memref<32x128xbf16, #tpu.memory_space<vmem>>, vector<32x128xbf16>
    tpu.vector_store %arg4[%c0_3, %c0_4], %3 {strides = array<i32>} : memref<32x128xbf16, #tpu.memory_space<vmem>>, vector<32x128xbf16>,
    %cst_5 = arith.constant dense<0.000000e+00> : vector<128xf32>
    %5 = vector.multi_reduction <add>, %2, %cst_5 [0] : vector<32x128xf32> to vector<128xf32>
    %6 = vector.shape_cast %5 : vector<128xf32> to vector<1x128xf32>
    %7 = arith.mulf %2, %2 : vector<32x128xf32>
    %cst_6 = arith.constant dense<0.000000e+00> : vector<128xf32>
    %8 = vector.multi_reduction <add>, %7, %cst_6 [0] : vector<32x128xf32> to vector<128xf32>
    %9 = vector.shape_cast %8 : vector<128xf32> to vector<1x128xf32>
    %10 = vector.shape_cast %6 : vector<1x128xf32> to vector<1x128xf32>
    %11 = vector.broadcast %10 : vector<1x128xf32> to vector<8x128xf32>
    %c0_7 = arith.constant 0 : index
    %c0_8 = arith.constant 0 : index
    %12 = vector.load %arg5[%c0_7, %c0_8] : memref<8x128xf32, #tpu.memory_space<vmem>>, vector<8x128xf32>
    tpu.vector_store %arg5[%c0_7, %c0_8], %11 {strides = array<i32>} : memref<8x128xf32, #tpu.memory_space<vmem>>, vector<8x128xf32>,
    %13 = vector.shape_cast %9 : vector<1x128xf32> to vector<1x128xf32>
    %14 = vector.broadcast %13 : vector<1x128xf32> to vector<8x128xf32>
    %c0_9 = arith.constant 0 : index
    %c0_10 = arith.constant 0 : index
    %15 = vector.load %arg6[%c0_9, %c0_10] : memref<8x128xf32, #tpu.memory_space<vmem>>, vector<8x128xf32>
    tpu.vector_store %arg6[%c0_9, %c0_10], %14 {strides = array<i32>} : memref<8x128xf32, #tpu.memory_space<vmem>>, vector<8x128xf32>,
    return
  }
  func.func @transform_0(%arg0: i32, %arg1: i32) -> (i32, i32) {
    %c0_i32 = arith.constant 0 : i32
    %c0_i32_0 = arith.constant 0 : i32
    return %arg0, %c0_i32 : i32, i32
  }
  func.func @transform_1(%arg0: i32, %arg1: i32) -> (i32, i32) {
    %c0_i32 = arith.constant 0 : i32
    %c0_i32_0 = arith.constant 0 : i32
    return %c0_i32, %arg1 : i32, i32
  }
  func.func @transform_2(%arg0: i32, %arg1: i32) -> (i32, i32) {
    %c0_i32 = arith.constant 0 : i32
    return %arg0, %arg1 : i32, i32
  }
  func.func @transform_3(%arg0: i32, %arg1: i32) -> (i32, i32) {
    %c0_i32 = arith.constant 0 : i32
    return %arg0, %arg1 : i32, i32
  }
  func.func @transform_4(%arg0: i32, %arg1: i32) -> (i32, i32) {
    %c0_i32 = arith.constant 0 : i32
    return %arg0, %arg1 : i32, i32
  }
}

module attributes {stable_mosaic.version = 11 : i64} {
  func.func @kernel(%arg0: i32, %arg1: i32, %arg2: memref<32x128xbf16, #tpu.memory_space<vmem>>, %arg3: memref<1x128xf32, #tpu.memory_space<vmem>>, %arg4: memref<1x128xf32, #tpu.memory_space<vmem>>, %arg5: memref<32x128xbf16, #tpu.memory_space<vmem>>) attributes {dimension_semantics = [#tpu.dimension_semantics<parallel>, #tpu.dimension_semantics<parallel>], iteration_bounds = array<i64: 1, 1>, scalar_prefetch = 0 : i64, scratch_operands = 0 : i64, tpu.core_type = #tpu.core_type<tc>, window_params = [{transform_indices = @transform_0, window_bounds = array<i64: 32, 128>}, {transform_indices = @transform_1, window_bounds = array<i64: 1, 128>}, {transform_indices = @transform_2, window_bounds = array<i64: 1, 128>}, {transform_indices = @transform_3, window_bounds = array<i64: 32, 128>}]} {
    %c0 = arith.constant 0 : index
    %c0_0 = arith.constant 0 : index
    %0 = vector.load %arg2[%c0, %c0_0] : memref<32x128xbf16, #tpu.memory_space<vmem>>, vector<32x128xbf16>
    %1 = arith.extf %0 : vector<32x128xbf16> to vector<32x128xf32>
    %c0_1 = arith.constant 0 : index
    %c0_2 = arith.constant 0 : index
    %2 = vector.load %arg3[%c0_1, %c0_2] : memref<1x128xf32, #tpu.memory_space<vmem>>, vector<1x128xf32>
    %3 = vector.broadcast %2 : vector<1x128xf32> to vector<32x128xf32>
    %4 = arith.mulf %1, %3 : vector<32x128xf32>
    %c0_3 = arith.constant 0 : index
    %c0_4 = arith.constant 0 : index
    %5 = vector.load %arg4[%c0_3, %c0_4] : memref<1x128xf32, #tpu.memory_space<vmem>>, vector<1x128xf32>
    %6 = vector.broadcast %5 : vector<1x128xf32> to vector<32x128xf32>
    %7 = arith.addf %4, %6 : vector<32x128xf32>
    %8 = arith.truncf %7 : vector<32x128xf32> to vector<32x128xbf16>
    %c0_5 = arith.constant 0 : index
    %c0_6 = arith.constant 0 : index
    %9 = vector.load %arg5[%c0_5, %c0_6] : memref<32x128xbf16, #tpu.memory_space<vmem>>, vector<32x128xbf16>
    tpu.vector_store %arg5[%c0_5, %c0_6], %8 {strides = array<i32>} : memref<32x128xbf16, #tpu.memory_space<vmem>>, vector<32x128xbf16>,
    return
  }
  func.func @transform_0(%arg0: i32, %arg1: i32) -> (i32, i32) {
    %c0_i32 = arith.constant 0 : i32
    return %arg0, %arg1 : i32, i32
  }
  func.func @transform_1(%arg0: i32, %arg1: i32) -> (i32, i32) {
    %c0_i32 = arith.constant 0 : i32
    %c0_i32_0 = arith.constant 0 : i32
    return %c0_i32, %arg1 : i32, i32
  }
  func.func @transform_2(%arg0: i32, %arg1: i32) -> (i32, i32) {
    %c0_i32 = arith.constant 0 : i32
    %c0_i32_0 = arith.constant 0 : i32
    return %c0_i32, %arg1 : i32, i32
  }
  func.func @transform_3(%arg0: i32, %arg1: i32) -> (i32, i32) {
    %c0_i32 = arith.constant 0 : i32
    return %arg0, %arg1 : i32, i32
  }
}

module attributes {stable_mosaic.version = 11 : i64} {
  func.func @_matmul_stats_kernel(%arg0: i32, %arg1: i32, %arg2: memref<32x128xbf16, #tpu.memory_space<vmem>>, %arg3: memref<128x128xbf16, #tpu.memory_space<vmem>>, %arg4: memref<32x128xbf16, #tpu.memory_space<vmem>>, %arg5: memref<8x128xf32, #tpu.memory_space<vmem>>, %arg6: memref<8x128xf32, #tpu.memory_space<vmem>>) attributes {dimension_semantics = [#tpu.dimension_semantics<parallel>, #tpu.dimension_semantics<parallel>], iteration_bounds = array<i64: 1, 1>, scalar_prefetch = 0 : i64, scratch_operands = 0 : i64, tpu.core_type = #tpu.core_type<tc>, window_params = [{transform_indices = @transform_0, window_bounds = array<i64: 32, 128>}, {transform_indices = @transform_1, window_bounds = array<i64: 128, 128>}, {transform_indices = @transform_2, window_bounds = array<i64: 32, 128>}, {transform_indices = @transform_3, window_bounds = array<i64: 8, 128>}, {transform_indices = @transform_4, window_bounds = array<i64: 8, 128>}]} {
    %c0 = arith.constant 0 : index
    %c0_0 = arith.constant 0 : index
    %0 = vector.load %arg2[%c0, %c0_0] : memref<32x128xbf16, #tpu.memory_space<vmem>>, vector<32x128xbf16>
    %c0_1 = arith.constant 0 : index
    %c0_2 = arith.constant 0 : index
    %1 = vector.load %arg3[%c0_1, %c0_2] : memref<128x128xbf16, #tpu.memory_space<vmem>>, vector<128x128xbf16>
    %cst = arith.constant dense<0.000000e+00> : vector<32x128xf32>
    %2 = tpu.matmul %0, %1, %cst {dimension_numbers = #tpu.dot_dimension_numbers<[1], [0], [0], [1], [0, 0, 1, 1], [], []>} : vector<32x128xbf16>, vector<128x128xbf16>, vector<32x128xf32> -> vector<32x128xf32>
    %3 = arith.truncf %2 : vector<32x128xf32> to vector<32x128xbf16>
    %c0_3 = arith.constant 0 : index
    %c0_4 = arith.constant 0 : index
    %4 = vector.load %arg4[%c0_3, %c0_4] : memref<32x128xbf16, #tpu.memory_space<vmem>>, vector<32x128xbf16>
    tpu.vector_store %arg4[%c0_3, %c0_4], %3 {strides = array<i32>} : memref<32x128xbf16, #tpu.memory_space<vmem>>, vector<32x128xbf16>,
    %cst_5 = arith.constant dense<0.000000e+00> : vector<128xf32>
    %5 = vector.multi_reduction <add>, %2, %cst_5 [0] : vector<32x128xf32> to vector<128xf32>
    %6 = vector.shape_cast %5 : vector<128xf32> to vector<1x128xf32>
    %7 = arith.mulf %2, %2 : vector<32x128xf32>
    %cst_6 = arith.constant dense<0.000000e+00> : vector<128xf32>
    %8 = vector.multi_reduction <add>, %7, %cst_6 [0] : vector<32x128xf32> to vector<128xf32>
    %9 = vector.shape_cast %8 : vector<128xf32> to vector<1x128xf32>
    %10 = vector.shape_cast %6 : vector<1x128xf32> to vector<1x128xf32>
    %11 = vector.broadcast %10 : vector<1x128xf32> to vector<8x128xf32>
    %c0_7 = arith.constant 0 : index
    %c0_8 = arith.constant 0 : index
    %12 = vector.load %arg5[%c0_7, %c0_8] : memref<8x128xf32, #tpu.memory_space<vmem>>, vector<8x128xf32>
    tpu.vector_store %arg5[%c0_7, %c0_8], %11 {strides = array<i32>} : memref<8x128xf32, #tpu.memory_space<vmem>>, vector<8x128xf32>,
    %13 = vector.shape_cast %9 : vector<1x128xf32> to vector<1x128xf32>
    %14 = vector.broadcast %13 : vector<1x128xf32> to vector<8x128xf32>
    %c0_9 = arith.constant 0 : index
    %c0_10 = arith.constant 0 : index
    %15 = vector.load %arg6[%c0_9, %c0_10] : memref<8x128xf32, #tpu.memory_space<vmem>>, vector<8x128xf32>
    tpu.vector_store %arg6[%c0_9, %c0_10], %14 {strides = array<i32>} : memref<8x128xf32, #tpu.memory_space<vmem>>, vector<8x128xf32>,
    return
  }
  func.func @transform_0(%arg0: i32, %arg1: i32) -> (i32, i32) {
    %c0_i32 = arith.constant 0 : i32
    %c0_i32_0 = arith.constant 0 : i32
    return %arg0, %c0_i32 : i32, i32
  }
  func.func @transform_1(%arg0: i32, %arg1: i32) -> (i32, i32) {
    %c0_i32 = arith.constant 0 : i32
    %c0_i32_0 = arith.constant 0 : i32
    return %c0_i32, %arg1 : i32, i32
  }
  func.func @transform_2(%arg0: i32, %arg1: i32) -> (i32, i32) {
    %c0_i32 = arith.constant 0 : i32
    return %arg0, %arg1 : i32, i32
  }
  func.func @transform_3(%arg0: i32, %arg1: i32) -> (i32, i32) {
    %c0_i32 = arith.constant 0 : i32
    return %arg0, %arg1 : i32, i32
  }
  func.func @transform_4(%arg0: i32, %arg1: i32) -> (i32, i32) {
    %c0_i32 = arith.constant 0 : i32
    return %arg0, %arg1 : i32, i32
  }
}

module attributes {stable_mosaic.version = 11 : i64} {
  func.func @kernel(%arg0: i32, %arg1: i32, %arg2: memref<32x128xbf16, #tpu.memory_space<vmem>>, %arg3: memref<1x128xf32, #tpu.memory_space<vmem>>, %arg4: memref<1x128xf32, #tpu.memory_space<vmem>>, %arg5: memref<32x128xbf16, #tpu.memory_space<vmem>>, %arg6: memref<32x128xbf16, #tpu.memory_space<vmem>>) attributes {dimension_semantics = [#tpu.dimension_semantics<parallel>, #tpu.dimension_semantics<parallel>], iteration_bounds = array<i64: 1, 1>, scalar_prefetch = 0 : i64, scratch_operands = 0 : i64, tpu.core_type = #tpu.core_type<tc>, window_params = [{transform_indices = @transform_0, window_bounds = array<i64: 32, 128>}, {transform_indices = @transform_1, window_bounds = array<i64: 1, 128>}, {transform_indices = @transform_2, window_bounds = array<i64: 1, 128>}, {transform_indices = @transform_3, window_bounds = array<i64: 32, 128>}, {transform_indices = @transform_4, window_bounds = array<i64: 32, 128>}]} {
    %c0 = arith.constant 0 : index
    %c0_0 = arith.constant 0 : index
    %0 = vector.load %arg2[%c0, %c0_0] : memref<32x128xbf16, #tpu.memory_space<vmem>>, vector<32x128xbf16>
    %1 = arith.extf %0 : vector<32x128xbf16> to vector<32x128xf32>
    %c0_1 = arith.constant 0 : index
    %c0_2 = arith.constant 0 : index
    %2 = vector.load %arg3[%c0_1, %c0_2] : memref<1x128xf32, #tpu.memory_space<vmem>>, vector<1x128xf32>
    %3 = vector.broadcast %2 : vector<1x128xf32> to vector<32x128xf32>
    %4 = arith.mulf %1, %3 : vector<32x128xf32>
    %c0_3 = arith.constant 0 : index
    %c0_4 = arith.constant 0 : index
    %5 = vector.load %arg4[%c0_3, %c0_4] : memref<1x128xf32, #tpu.memory_space<vmem>>, vector<1x128xf32>
    %6 = vector.broadcast %5 : vector<1x128xf32> to vector<32x128xf32>
    %7 = arith.addf %4, %6 : vector<32x128xf32>
    %c0_5 = arith.constant 0 : index
    %c0_6 = arith.constant 0 : index
    %8 = vector.load %arg5[%c0_5, %c0_6] : memref<32x128xbf16, #tpu.memory_space<vmem>>, vector<32x128xbf16>
    %9 = arith.extf %8 : vector<32x128xbf16> to vector<32x128xf32>
    %10 = arith.addf %7, %9 : vector<32x128xf32>
    %cst = arith.constant 0.000000e+00 : f32
    %11 = vector.broadcast %cst : f32 to vector<32x128xf32>
    %12 = arith.maximumf %10, %11 : vector<32x128xf32>
    %13 = arith.truncf %12 : vector<32x128xf32> to vector<32x128xbf16>
    %c0_7 = arith.constant 0 : index
    %c0_8 = arith.constant 0 : index
    %14 = vector.load %arg6[%c0_7, %c0_8] : memref<32x128xbf16, #tpu.memory_space<vmem>>, vector<32x128xbf16>
    tpu.vector_store %arg6[%c0_7, %c0_8], %13 {strides = array<i32>} : memref<32x128xbf16, #tpu.memory_space<vmem>>, vector<32x128xbf16>,
    return
  }
  func.func @transform_0(%arg0: i32, %arg1: i32) -> (i32, i32) {
    %c0_i32 = arith.constant 0 : i32
    return %arg0, %arg1 : i32, i32
  }
  func.func @transform_1(%arg0: i32, %arg1: i32) -> (i32, i32) {
    %c0_i32 = arith.constant 0 : i32
    %c0_i32_0 = arith.constant 0 : i32
    return %c0_i32, %arg1 : i32, i32
  }
  func.func @transform_2(%arg0: i32, %arg1: i32) -> (i32, i32) {
    %c0_i32 = arith.constant 0 : i32
    %c0_i32_0 = arith.constant 0 : i32
    return %c0_i32, %arg1 : i32, i32
  }
  func.func @transform_3(%arg0: i32, %arg1: i32) -> (i32, i32) {
    %c0_i32 = arith.constant 0 : i32
    return %arg0, %arg1 : i32, i32
  }
  func.func @transform_4(%arg0: i32, %arg1: i32) -> (i32, i32) {
    %c0_i32 = arith.constant 0 : i32
    return %arg0, %arg1 : i32, i32
  }
}

module attributes {stable_mosaic.version = 11 : i64} {
  func.func @_matmul_stats_kernel(%arg0: i32, %arg1: i32, %arg2: memref<32x640xbf16, #tpu.memory_space<vmem>>, %arg3: memref<640x128xbf16, #tpu.memory_space<vmem>>, %arg4: memref<32x128xbf16, #tpu.memory_space<vmem>>, %arg5: memref<8x128xf32, #tpu.memory_space<vmem>>, %arg6: memref<8x128xf32, #tpu.memory_space<vmem>>) attributes {dimension_semantics = [#tpu.dimension_semantics<parallel>, #tpu.dimension_semantics<parallel>], iteration_bounds = array<i64: 1, 1>, scalar_prefetch = 0 : i64, scratch_operands = 0 : i64, tpu.core_type = #tpu.core_type<tc>, window_params = [{transform_indices = @transform_0, window_bounds = array<i64: 32, 640>}, {transform_indices = @transform_1, window_bounds = array<i64: 640, 128>}, {transform_indices = @transform_2, window_bounds = array<i64: 32, 128>}, {transform_indices = @transform_3, window_bounds = array<i64: 8, 128>}, {transform_indices = @transform_4, window_bounds = array<i64: 8, 128>}]} {
    %c0 = arith.constant 0 : index
    %c0_0 = arith.constant 0 : index
    %0 = vector.load %arg2[%c0, %c0_0] : memref<32x640xbf16, #tpu.memory_space<vmem>>, vector<32x640xbf16>
    %c0_1 = arith.constant 0 : index
    %c0_2 = arith.constant 0 : index
    %1 = vector.load %arg3[%c0_1, %c0_2] : memref<640x128xbf16, #tpu.memory_space<vmem>>, vector<640x128xbf16>
    %cst = arith.constant dense<0.000000e+00> : vector<32x128xf32>
    %2 = tpu.matmul %0, %1, %cst {dimension_numbers = #tpu.dot_dimension_numbers<[1], [0], [0], [1], [0, 0, 1, 1], [], []>} : vector<32x640xbf16>, vector<640x128xbf16>, vector<32x128xf32> -> vector<32x128xf32>
    %3 = arith.truncf %2 : vector<32x128xf32> to vector<32x128xbf16>
    %c0_3 = arith.constant 0 : index
    %c0_4 = arith.constant 0 : index
    %4 = vector.load %arg4[%c0_3, %c0_4] : memref<32x128xbf16, #tpu.memory_space<vmem>>, vector<32x128xbf16>
    tpu.vector_store %arg4[%c0_3, %c0_4], %3 {strides = array<i32>} : memref<32x128xbf16, #tpu.memory_space<vmem>>, vector<32x128xbf16>,
    %cst_5 = arith.constant dense<0.000000e+00> : vector<128xf32>
    %5 = vector.multi_reduction <add>, %2, %cst_5 [0] : vector<32x128xf32> to vector<128xf32>
    %6 = vector.shape_cast %5 : vector<128xf32> to vector<1x128xf32>
    %7 = arith.mulf %2, %2 : vector<32x128xf32>
    %cst_6 = arith.constant dense<0.000000e+00> : vector<128xf32>
    %8 = vector.multi_reduction <add>, %7, %cst_6 [0] : vector<32x128xf32> to vector<128xf32>
    %9 = vector.shape_cast %8 : vector<128xf32> to vector<1x128xf32>
    %10 = vector.shape_cast %6 : vector<1x128xf32> to vector<1x128xf32>
    %11 = vector.broadcast %10 : vector<1x128xf32> to vector<8x128xf32>
    %c0_7 = arith.constant 0 : index
    %c0_8 = arith.constant 0 : index
    %12 = vector.load %arg5[%c0_7, %c0_8] : memref<8x128xf32, #tpu.memory_space<vmem>>, vector<8x128xf32>
    tpu.vector_store %arg5[%c0_7, %c0_8], %11 {strides = array<i32>} : memref<8x128xf32, #tpu.memory_space<vmem>>, vector<8x128xf32>,
    %13 = vector.shape_cast %9 : vector<1x128xf32> to vector<1x128xf32>
    %14 = vector.broadcast %13 : vector<1x128xf32> to vector<8x128xf32>
    %c0_9 = arith.constant 0 : index
    %c0_10 = arith.constant 0 : index
    %15 = vector.load %arg6[%c0_9, %c0_10] : memref<8x128xf32, #tpu.memory_space<vmem>>, vector<8x128xf32>
    tpu.vector_store %arg6[%c0_9, %c0_10], %14 {strides = array<i32>} : memref<8x128xf32, #tpu.memory_space<vmem>>, vector<8x128xf32>,
    return
  }
  func.func @transform_0(%arg0: i32, %arg1: i32) -> (i32, i32) {
    %c0_i32 = arith.constant 0 : i32
    %c0_i32_0 = arith.constant 0 : i32
    return %arg0, %c0_i32 : i32, i32
  }
  func.func @transform_1(%arg0: i32, %arg1: i32) -> (i32, i32) {
    %c0_i32 = arith.constant 0 : i32
    %c0_i32_0 = arith.constant 0 : i32
    return %c0_i32, %arg1 : i32, i32
  }
  func.func @transform_2(%arg0: i32, %arg1: i32) -> (i32, i32) {
    %c0_i32 = arith.constant 0 : i32
    return %arg0, %arg1 : i32, i32
  }
  func.func @transform_3(%arg0: i32, %arg1: i32) -> (i32, i32) {
    %c0_i32 = arith.constant 0 : i32
    return %arg0, %arg1 : i32, i32
  }
  func.func @transform_4(%arg0: i32, %arg1: i32) -> (i32, i32) {
    %c0_i32 = arith.constant 0 : i32
    return %arg0, %arg1 : i32, i32
  }
}

module attributes {stable_mosaic.version = 11 : i64} {
  func.func @_matmul_stats_kernel(%arg0: i32, %arg1: i32, %arg2: memref<16x256xbf16, #tpu.memory_space<vmem>>, %arg3: memref<256x512xbf16, #tpu.memory_space<vmem>>, %arg4: memref<16x512xbf16, #tpu.memory_space<vmem>>, %arg5: memref<8x512xf32, #tpu.memory_space<vmem>>, %arg6: memref<8x512xf32, #tpu.memory_space<vmem>>) attributes {dimension_semantics = [#tpu.dimension_semantics<parallel>, #tpu.dimension_semantics<parallel>], iteration_bounds = array<i64: 1, 1>, scalar_prefetch = 0 : i64, scratch_operands = 0 : i64, tpu.core_type = #tpu.core_type<tc>, window_params = [{transform_indices = @transform_0, window_bounds = array<i64: 16, 256>}, {transform_indices = @transform_1, window_bounds = array<i64: 256, 512>}, {transform_indices = @transform_2, window_bounds = array<i64: 16, 512>}, {transform_indices = @transform_3, window_bounds = array<i64: 8, 512>}, {transform_indices = @transform_4, window_bounds = array<i64: 8, 512>}]} {
    %c0 = arith.constant 0 : index
    %c0_0 = arith.constant 0 : index
    %0 = vector.load %arg2[%c0, %c0_0] : memref<16x256xbf16, #tpu.memory_space<vmem>>, vector<16x256xbf16>
    %c0_1 = arith.constant 0 : index
    %c0_2 = arith.constant 0 : index
    %1 = vector.load %arg3[%c0_1, %c0_2] : memref<256x512xbf16, #tpu.memory_space<vmem>>, vector<256x512xbf16>
    %cst = arith.constant dense<0.000000e+00> : vector<16x512xf32>
    %2 = tpu.matmul %0, %1, %cst {dimension_numbers = #tpu.dot_dimension_numbers<[1], [0], [0], [1], [0, 0, 1, 1], [], []>} : vector<16x256xbf16>, vector<256x512xbf16>, vector<16x512xf32> -> vector<16x512xf32>
    %3 = arith.truncf %2 : vector<16x512xf32> to vector<16x512xbf16>
    %c0_3 = arith.constant 0 : index
    %c0_4 = arith.constant 0 : index
    %4 = vector.load %arg4[%c0_3, %c0_4] : memref<16x512xbf16, #tpu.memory_space<vmem>>, vector<16x512xbf16>
    tpu.vector_store %arg4[%c0_3, %c0_4], %3 {strides = array<i32>} : memref<16x512xbf16, #tpu.memory_space<vmem>>, vector<16x512xbf16>,
    %cst_5 = arith.constant dense<0.000000e+00> : vector<512xf32>
    %5 = vector.multi_reduction <add>, %2, %cst_5 [0] : vector<16x512xf32> to vector<512xf32>
    %6 = vector.shape_cast %5 : vector<512xf32> to vector<1x512xf32>
    %7 = arith.mulf %2, %2 : vector<16x512xf32>
    %cst_6 = arith.constant dense<0.000000e+00> : vector<512xf32>
    %8 = vector.multi_reduction <add>, %7, %cst_6 [0] : vector<16x512xf32> to vector<512xf32>
    %9 = vector.shape_cast %8 : vector<512xf32> to vector<1x512xf32>
    %10 = vector.shape_cast %6 : vector<1x512xf32> to vector<1x512xf32>
    %11 = vector.broadcast %10 : vector<1x512xf32> to vector<8x512xf32>
    %c0_7 = arith.constant 0 : index
    %c0_8 = arith.constant 0 : index
    %12 = vector.load %arg5[%c0_7, %c0_8] : memref<8x512xf32, #tpu.memory_space<vmem>>, vector<8x512xf32>
    tpu.vector_store %arg5[%c0_7, %c0_8], %11 {strides = array<i32>} : memref<8x512xf32, #tpu.memory_space<vmem>>, vector<8x512xf32>,
    %13 = vector.shape_cast %9 : vector<1x512xf32> to vector<1x512xf32>
    %14 = vector.broadcast %13 : vector<1x512xf32> to vector<8x512xf32>
    %c0_9 = arith.constant 0 : index
    %c0_10 = arith.constant 0 : index
    %15 = vector.load %arg6[%c0_9, %c0_10] : memref<8x512xf32, #tpu.memory_space<vmem>>, vector<8x512xf32>
    tpu.vector_store %arg6[%c0_9, %c0_10], %14 {strides = array<i32>} : memref<8x512xf32, #tpu.memory_space<vmem>>, vector<8x512xf32>,
    return
  }
  func.func @transform_0(%arg0: i32, %arg1: i32) -> (i32, i32) {
    %c0_i32 = arith.constant 0 : i32
    %c0_i32_0 = arith.constant 0 : i32
    return %arg0, %c0_i32 : i32, i32
  }
  func.func @transform_1(%arg0: i32, %arg1: i32) -> (i32, i32) {
    %c0_i32 = arith.constant 0 : i32
    %c0_i32_0 = arith.constant 0 : i32
    return %c0_i32, %arg1 : i32, i32
  }
  func.func @transform_2(%arg0: i32, %arg1: i32) -> (i32, i32) {
    %c0_i32 = arith.constant 0 : i32
    return %arg0, %arg1 : i32, i32
  }
  func.func @transform_3(%arg0: i32, %arg1: i32) -> (i32, i32) {
    %c0_i32 = arith.constant 0 : i32
    return %arg0, %arg1 : i32, i32
  }
  func.func @transform_4(%arg0: i32, %arg1: i32) -> (i32, i32) {
    %c0_i32 = arith.constant 0 : i32
    return %arg0, %arg1 : i32, i32
  }
}

module attributes {stable_mosaic.version = 11 : i64} {
  func.func @kernel(%arg0: i32, %arg1: i32, %arg2: memref<16x512xbf16, #tpu.memory_space<vmem>>, %arg3: memref<1x512xf32, #tpu.memory_space<vmem>>, %arg4: memref<1x512xf32, #tpu.memory_space<vmem>>, %arg5: memref<16x512xbf16, #tpu.memory_space<vmem>>) attributes {dimension_semantics = [#tpu.dimension_semantics<parallel>, #tpu.dimension_semantics<parallel>], iteration_bounds = array<i64: 1, 1>, scalar_prefetch = 0 : i64, scratch_operands = 0 : i64, tpu.core_type = #tpu.core_type<tc>, window_params = [{transform_indices = @transform_0, window_bounds = array<i64: 16, 512>}, {transform_indices = @transform_1, window_bounds = array<i64: 1, 512>}, {transform_indices = @transform_2, window_bounds = array<i64: 1, 512>}, {transform_indices = @transform_3, window_bounds = array<i64: 16, 512>}]} {
    %c0 = arith.constant 0 : index
    %c0_0 = arith.constant 0 : index
    %0 = vector.load %arg2[%c0, %c0_0] : memref<16x512xbf16, #tpu.memory_space<vmem>>, vector<16x512xbf16>
    %1 = arith.extf %0 : vector<16x512xbf16> to vector<16x512xf32>
    %c0_1 = arith.constant 0 : index
    %c0_2 = arith.constant 0 : index
    %2 = vector.load %arg3[%c0_1, %c0_2] : memref<1x512xf32, #tpu.memory_space<vmem>>, vector<1x512xf32>
    %3 = vector.broadcast %2 : vector<1x512xf32> to vector<16x512xf32>
    %4 = arith.mulf %1, %3 : vector<16x512xf32>
    %c0_3 = arith.constant 0 : index
    %c0_4 = arith.constant 0 : index
    %5 = vector.load %arg4[%c0_3, %c0_4] : memref<1x512xf32, #tpu.memory_space<vmem>>, vector<1x512xf32>
    %6 = vector.broadcast %5 : vector<1x512xf32> to vector<16x512xf32>
    %7 = arith.addf %4, %6 : vector<16x512xf32>
    %cst = arith.constant 0.000000e+00 : f32
    %8 = vector.broadcast %cst : f32 to vector<16x512xf32>
    %9 = arith.maximumf %7, %8 : vector<16x512xf32>
    %10 = arith.truncf %9 : vector<16x512xf32> to vector<16x512xbf16>
    %c0_5 = arith.constant 0 : index
    %c0_6 = arith.constant 0 : index
    %11 = vector.load %arg5[%c0_5, %c0_6] : memref<16x512xbf16, #tpu.memory_space<vmem>>, vector<16x512xbf16>
    tpu.vector_store %arg5[%c0_5, %c0_6], %10 {strides = array<i32>} : memref<16x512xbf16, #tpu.memory_space<vmem>>, vector<16x512xbf16>,
    return
  }
  func.func @transform_0(%arg0: i32, %arg1: i32) -> (i32, i32) {
    %c0_i32 = arith.constant 0 : i32
    return %arg0, %arg1 : i32, i32
  }
  func.func @transform_1(%arg0: i32, %arg1: i32) -> (i32, i32) {
    %c0_i32 = arith.constant 0 : i32
    %c0_i32_0 = arith.constant 0 : i32
    return %c0_i32, %arg1 : i32, i32
  }
  func.func @transform_2(%arg0: i32, %arg1: i32) -> (i32, i32) {
    %c0_i32 = arith.constant 0 : i32
    %c0_i32_0 = arith.constant 0 : i32
    return %c0_i32, %arg1 : i32, i32
  }
  func.func @transform_3(%arg0: i32, %arg1: i32) -> (i32, i32) {
    %c0_i32 = arith.constant 0 : i32
    return %arg0, %arg1 : i32, i32
  }
}

</mosaic_0001>

<bundles_post_ra>
// kernel: run.33
= control target key start
LH: loop header
LB: loop body
LE: loop exit
PB: predicated region body
PF: predicated region fallthrough
CT: control target
= control target key end

     0   :  { %s1502_s0 = inlined_call_operand.vmem [shape: bf16[512,128], index: 0, kind: input, shape index: {}, may-alias: {0,3}]   ;;  %s1503_s1 = inlined_call_operand.vmem [shape: f32[1,128], index: 1, kind: input, shape index: {}]   ;;  %s1504_s2 = inlined_call_operand.vmem [shape: f32[1,128], index: 2, kind: input, shape index: {}]   ;;  %s1505_s3 = inlined_call_operand.vmem [shape: bf16[512,128], index: 3, kind: output, shape index: {}, may-alias: {0,3}]  }
   0x1   :  { %v803_v0 = vld [vmem:[%s1502_s0] sm:$0xff]   ;;  %v1090_v4 = vld [vmem:[%s1502_s0 + $0x8] sm:$0xff]   ;;  %v1091_v5 = vld [vmem:[%s1502_s0 + $0x10] sm:$0xff]  }
   0x2   :  { %v1178_v1 = vld [vmem:[%s1503_s1] ss:$0 sm:$0xff]  ;;  %v804_v2 = vunpack.c.l.bf16 %v803_v0  ;;  %v805_v3 = vunpack.c.h.bf16 %v803_v0  ;;  %v1092_v6 = vld [vmem:[%s1502_s0 + $0x18] sm:$0xff]   ;;  %v808_v8 = vunpack.c.l.bf16 %v1090_v4  ;;  %v809_v9 = vunpack.c.h.bf16 %v1090_v4  ;;  %v1094_v33 = vld [vmem:[%s1502_s0 + $0x28] sm:$0xff]  }
   0x3   :  { %v1192_v7 = vld [vmem:[%s1504_s2] ss:$0 sm:$0xff]  ;;  %v812_v10 = vunpack.c.l.bf16 %v1091_v5  ;;  %v813_v11 = vunpack.c.h.bf16 %v1091_v5  ;;  %v816_v14 = vunpack.c.l.bf16 %v1092_v6  ;;  %v817_v15 = vunpack.c.h.bf16 %v1092_v6  ;;  %v1095_v38 = vld [vmem:[%s1502_s0 + $0x30] sm:$0xff]   ;;  %v1096_v43 = vld [vmem:[%s1502_s0 + $0x38] sm:$0xff]  }
   0x4   :  { %v149_v12 = vmul.f32 %v804_v2, %v1178_v1  ;;  %v150_v13 = vmul.f32 %v805_v3, %v1178_v1  ;;  %v151_v16 = vmul.f32 %v808_v8, %v1178_v1  ;;  %v152_v17 = vmul.f32 %v809_v9, %v1178_v1  ;;  %v1093_v28 = vld [vmem:[%s1502_s0 + $0x20] sm:$0xff]  }
   0x5   :  { %v153_v18 = vmul.f32 %v812_v10, %v1178_v1  ;;  %v154_v19 = vmul.f32 %v813_v11, %v1178_v1  ;;  %v155_v22 = vmul.f32 %v816_v14, %v1178_v1  ;;  %v156_v23 = vmul.f32 %v817_v15, %v1178_v1 }
   0x6   :  { %v220_v20 = vadd.f32 %v1192_v7, %v149_v12  ;;  %v221_v21 = vadd.f32 %v1192_v7, %v150_v13  ;;  %v222_v24 = vadd.f32 %v1192_v7, %v151_v16  ;;  %v223_v25 = vadd.f32 %v1192_v7, %v152_v17 }
   0x7   :  { %v224_v26 = vadd.f32 %v1192_v7, %v153_v18  ;;  %v225_v27 = vadd.f32 %v1192_v7, %v154_v19  ;;  %v226_v31 = vadd.f32 %v1192_v7, %v155_v22  ;;  %v227_v32 = vadd.f32 %v1192_v7, %v156_v23 }
   0x8   :  { %v284_v29 = vmax.f32 %v220_v20, 0.0  ;;  %v285_v30 = vmax.f32 %v221_v21, 0.0  ;;  %v286_v34 = vmax.f32 %v222_v24, 0.0  ;;  %v287_v35 = vmax.f32 %v223_v25, 0.0 }
   0x9   :  { %v288_v36 = vmax.f32 %v224_v26, 0.0  ;;  %v289_v37 = vmax.f32 %v225_v27, 0.0  ;;  %v290_v40 = vmax.f32 %v226_v31, 0.0  ;;  %v291_v41 = vmax.f32 %v227_v32, 0.0 }
   0xa   :  { %v933_v39 = vpack.c.bf16 %v285_v30, %v284_v29  ;;  %v820_v42 = vunpack.c.l.bf16 %v1093_v28  ;;  %v938_v44 = vpack.c.bf16 %v287_v35, %v286_v34  ;;  %v821_v46 = vunpack.c.h.bf16 %v1093_v28 }
   0xb   :  { %v943_v45 = vpack.c.bf16 %v289_v37, %v288_v36  ;;  %v824_v47 = vunpack.c.l.bf16 %v1094_v33  ;;  %v948_v48 = vpack.c.bf16 %v291_v41, %v290_v40  ;;  %v825_v50 = vunpack.c.h.bf16 %v1094_v33 }
   0xc   :  { %934 = vst [vmem:[%s1505_s3] sm:$0xff] %v933_v39   ;;  %v157_v49 = vmul.f32 %v820_v42, %v1178_v1  ;;  %v828_v51 = vunpack.c.l.bf16 %v1095_v38  ;;  %1121 = vst [vmem:[%s1505_s3 + $0x8] sm:$0xff] %v938_v44   ;;  %v158_v52 = vmul.f32 %v821_v46, %v1178_v1  ;;  %v829_v54 = vunpack.c.h.bf16 %v1095_v38 }
   0xd   :  { %1122 = vst [vmem:[%s1505_s3 + $0x10] sm:$0xff] %v943_v45   ;;  %v159_v53 = vmul.f32 %v824_v47, %v1178_v1  ;;  %v832_v55 = vunpack.c.l.bf16 %v1096_v43  ;;  %1123 = vst [vmem:[%s1505_s3 + $0x18] sm:$0xff] %v948_v48   ;;  %v160_v57 = vmul.f32 %v825_v50, %v1178_v1  ;;  %v833_v59 = vunpack.c.h.bf16 %v1096_v43 }
   0xe   :  { %v228_v56 = vadd.f32 %v1192_v7, %v157_v49  ;;  %v161_v58 = vmul.f32 %v828_v51, %v1178_v1  ;;  %v229_v60 = vadd.f32 %v1192_v7, %v158_v52  ;;  %v162_v62 = vmul.f32 %v829_v54, %v1178_v1 }
   0xf   :  { %v230_v61 = vadd.f32 %v1192_v7, %v159_v53  ;;  %v163_v63 = vmul.f32 %v832_v55, %v1178_v1  ;;  %v231_v3 = vadd.f32 %v1192_v7, %v160_v57  ;;  %v164_v5 = vmul.f32 %v833_v59, %v1178_v1 }
  0x10   :  { %v292_v2 = vmax.f32 %v228_v56, 0.0  ;;  %v232_v4 = vadd.f32 %v1192_v7, %v161_v58  ;;  %v293_v6 = vmax.f32 %v229_v60, 0.0  ;;  %v233_v9 = vadd.f32 %v1192_v7, %v162_v62 }
  0x11   :  { %v294_v8 = vmax.f32 %v230_v61, 0.0  ;;  %v234_v10 = vadd.f32 %v1192_v7, %v163_v63  ;;  %v295_v12 = vmax.f32 %v231_v3, 0.0  ;;  %v235_v14 = vadd.f32 %v1192_v7, %v164_v5 }
  0x12   :  { %v296_v13 = vmax.f32 %v232_v4, 0.0  ;;  %v953_v17 = vpack.c.bf16 %v293_v6, %v292_v2  ;;  %v297_v18 = vmax.f32 %v233_v9, 0.0 }
  0x13   :  { %v298_v19 = vmax.f32 %v234_v10, 0.0  ;;  %v958_v21 = vpack.c.bf16 %v295_v12, %v294_v8  ;;  %v299_v22 = vmax.f32 %v235_v14, 0.0 }
  0x14   :  { %v1097_v0 = vld [vmem:[%s1502_s0 + $0x40] sm:$0xff]   ;;  %v1098_v11 = vld [vmem:[%s1502_s0 + $0x48] sm:$0xff]   ;;  %v1099_v16 = vld [vmem:[%s1502_s0 + $0x50] sm:$0xff]   ;;  %v963_v26 = vpack.c.bf16 %v297_v18, %v296_v13 }
  0x15   :  { %v836_v15 = vunpack.c.l.bf16 %v1097_v0  ;;  %v837_v20 = vunpack.c.h.bf16 %v1097_v0  ;;  %v840_v24 = vunpack.c.l.bf16 %v1098_v11  ;;  %v1100_v25 = vld [vmem:[%s1502_s0 + $0x58] sm:$0xff]   ;;  %v841_v28 = vunpack.c.h.bf16 %v1098_v11 }
  0x16   :  { %1124 = vst [vmem:[%s1505_s3 + $0x20] sm:$0xff] %v953_v17   ;;  %v844_v29 = vunpack.c.l.bf16 %v1099_v16  ;;  %1125 = vst [vmem:[%s1505_s3 + $0x28] sm:$0xff] %v958_v21   ;;  %v968_v30 = vpack.c.bf16 %v299_v22, %v298_v19  ;;  %v845_v33 = vunpack.c.h.bf16 %v1099_v16  ;;  %v848_v37 = vunpack.c.l.bf16 %v1100_v25 }
  0x17   :  { %v165_v23 = vmul.f32 %v836_v15, %v1178_v1  ;;  %v166_v27 = vmul.f32 %v837_v20, %v1178_v1  ;;  %v167_v32 = vmul.f32 %v840_v24, %v1178_v1  ;;  %1126 = vst [vmem:[%s1505_s3 + $0x30] sm:$0xff] %v963_v26   ;;  %v168_v35 = vmul.f32 %v841_v28, %v1178_v1 }
  0x18   :  { %v169_v36 = vmul.f32 %v844_v29, %v1178_v1  ;;  %v170_v41 = vmul.f32 %v845_v33, %v1178_v1  ;;  %v849_v42 = vunpack.c.h.bf16 %v1100_v25  ;;  %v171_v46 = vmul.f32 %v848_v37, %v1178_v1 }
  0x19   :  { %v236_v31 = vadd.f32 %v1192_v7, %v165_v23  ;;  %v237_v34 = vadd.f32 %v1192_v7, %v166_v27  ;;  %v238_v40 = vadd.f32 %v1192_v7, %v167_v32  ;;  %v239_v44 = vadd.f32 %v1192_v7, %v168_v35 }
  0x1a   :  { %v240_v45 = vadd.f32 %v1192_v7, %v169_v36  ;;  %v241_v48 = vadd.f32 %v1192_v7, %v170_v41  ;;  %v172_v49 = vmul.f32 %v849_v42, %v1178_v1  ;;  %v242_v55 = vadd.f32 %v1192_v7, %v171_v46 }
  0x1b   :  { %v300_v39 = vmax.f32 %v236_v31, 0.0  ;;  %v301_v43 = vmax.f32 %v237_v34, 0.0  ;;  %v302_v47 = vmax.f32 %v238_v40, 0.0  ;;  %v303_v53 = vmax.f32 %v239_v44, 0.0 }
  0x1c   :  { %v304_v54 = vmax.f32 %v240_v45, 0.0  ;;  %v305_v56 = vmax.f32 %v241_v48, 0.0  ;;  %v243_v57 = vadd.f32 %v1192_v7, %v172_v49  ;;  %v306_v62 = vmax.f32 %v242_v55, 0.0 }
  0x1d   :  { %v973_v52 = vpack.c.bf16 %v301_v43, %v300_v39  ;;  %v978_v61 = vpack.c.bf16 %v303_v53, %v302_v47 }
  0x1e   :  { %v1101_v38 = vld [vmem:[%s1502_s0 + $0x60] sm:$0xff]   ;;  %v983_v3 = vpack.c.bf16 %v305_v56, %v304_v54  ;;  %v307_v4 = vmax.f32 %v243_v57, 0.0 }
  0x1f   :  { %1127 = vst [vmem:[%s1505_s3 + $0x38] sm:$0xff] %v968_v30   ;;  %v852_v50 = vunpack.c.l.bf16 %v1101_v38  ;;  %v853_v58 = vunpack.c.h.bf16 %v1101_v38 }
  0x20   :  { %v988_v13 = vpack.c.bf16 %v307_v4, %v306_v62 }
  0x21   :  { %v173_v59 = vmul.f32 %v852_v50, %v1178_v1  ;;  %v174_v5 = vmul.f32 %v853_v58, %v1178_v1 }
  0x23   :  { %v244_v6 = vadd.f32 %v1192_v7, %v173_v59  ;;  %v245_v14 = vadd.f32 %v1192_v7, %v174_v5 }
  0x25   :  { %v308_v15 = vmax.f32 %v244_v6, 0.0  ;;  %v309_v21 = vmax.f32 %v245_v14, 0.0 }
  0x26   :  { %v1102_v51 = vld [vmem:[%s1502_s0 + $0x68] sm:$0xff]   ;;  %v1103_v60 = vld [vmem:[%s1502_s0 + $0x70] sm:$0xff]  }
  0x27   :  { %1128 = vst [vmem:[%s1505_s3 + $0x40] sm:$0xff] %v973_v52   ;;  %v856_v63 = vunpack.c.l.bf16 %v1102_v51  ;;  %v857_v0 = vunpack.c.h.bf16 %v1102_v51  ;;  %v860_v10 = vunpack.c.l.bf16 %v1103_v60  ;;  %v861_v11 = vunpack.c.h.bf16 %v1103_v60 }
  0x28   :  { %v993_v30 = vpack.c.bf16 %v309_v21, %v308_v15 }
  0x29   :  { %v175_v8 = vmul.f32 %v856_v63, %v1178_v1  ;;  %v176_v9 = vmul.f32 %v857_v0, %v1178_v1  ;;  %v177_v19 = vmul.f32 %v860_v10, %v1178_v1  ;;  %v178_v20 = vmul.f32 %v861_v11, %v1178_v1 }
  0x2b   :  { %v246_v17 = vadd.f32 %v1192_v7, %v175_v8  ;;  %v247_v18 = vadd.f32 %v1192_v7, %v176_v9  ;;  %v248_v27 = vadd.f32 %v1192_v7, %v177_v19  ;;  %v249_v28 = vadd.f32 %v1192_v7, %v178_v20 }
  0x2d   :  { %v310_v25 = vmax.f32 %v246_v17, 0.0  ;;  %v311_v26 = vmax.f32 %v247_v18, 0.0  ;;  %v312_v36 = vmax.f32 %v248_v27, 0.0  ;;  %v313_v37 = vmax.f32 %v249_v28, 0.0 }
  0x2e   :  { %v1104_v2 = vld [vmem:[%s1502_s0 + $0x78] sm:$0xff]  }
  0x2f   :  { %1129 = vst [vmem:[%s1505_s3 + $0x48] sm:$0xff] %v978_v61   ;;  %v864_v16 = vunpack.c.l.bf16 %v1104_v2  ;;  %v865_v22 = vunpack.c.h.bf16 %v1104_v2  ;;  %v998_v35 = vpack.c.bf16 %v311_v26, %v310_v25  ;;  %v1003_v44 = vpack.c.bf16 %v313_v37, %v312_v36 }
  0x31   :  { %v179_v23 = vmul.f32 %v864_v16, %v1178_v1  ;;  %v180_v31 = vmul.f32 %v865_v22, %v1178_v1 }
  0x33   :  { %v250_v32 = vadd.f32 %v1192_v7, %v179_v23  ;;  %v251_v39 = vadd.f32 %v1192_v7, %v180_v31 }
  0x35   :  { %v314_v40 = vmax.f32 %v250_v32, 0.0  ;;  %v315_v48 = vmax.f32 %v251_v39, 0.0 }
  0x36   :  { %v1105_v12 = vld [vmem:[%s1502_s0 + $0x80] sm:$0xff]  }
  0x37   :  { %1130 = vst [vmem:[%s1505_s3 + $0x50] sm:$0xff] %v983_v3   ;;  %1131 = vst [vmem:[%s1505_s3 + $0x58] sm:$0xff] %v988_v13   ;;  %v868_v24 = vunpack.c.l.bf16 %v1105_v12  ;;  %v869_v33 = vunpack.c.h.bf16 %v1105_v12  ;;  %v1008_v57 = vpack.c.bf16 %v315_v48, %v314_v40 }
  0x39   :  { %v181_v38 = vmul.f32 %v868_v24, %v1178_v1  ;;  %v182_v41 = vmul.f32 %v869_v33, %v1178_v1 }
  0x3b   :  { %v252_v45 = vadd.f32 %v1192_v7, %v181_v38  ;;  %v253_v49 = vadd.f32 %v1192_v7, %v182_v41 }
  0x3d   :  { %v316_v52 = vmax.f32 %v252_v45, 0.0  ;;  %v317_v58 = vmax.f32 %v253_v49, 0.0 }
  0x3e   :  { %v1106_v29 = vld [vmem:[%s1502_s0 + $0x88] sm:$0xff]   ;;  %v1107_v34 = vld [vmem:[%s1502_s0 + $0x90] sm:$0xff]  }
  0x3f   :  { %1132 = vst [vmem:[%s1505_s3 + $0x60] sm:$0xff] %v993_v30   ;;  %v872_v42 = vunpack.c.l.bf16 %v1106_v29  ;;  %v873_v46 = vunpack.c.h.bf16 %v1106_v29  ;;  %v876_v47 = vunpack.c.l.bf16 %v1107_v34  ;;  %v877_v51 = vunpack.c.h.bf16 %v1107_v34 }
  0x40   :  { %v1013_v3 = vpack.c.bf16 %v317_v58, %v316_v52 }
  0x41   :  { %v183_v50 = vmul.f32 %v872_v42, %v1178_v1  ;;  %v184_v53 = vmul.f32 %v873_v46, %v1178_v1  ;;  %v185_v54 = vmul.f32 %v876_v47, %v1178_v1  ;;  %v186_v60 = vmul.f32 %v877_v51, %v1178_v1 }
  0x43   :  { %v254_v59 = vadd.f32 %v1192_v7, %v183_v50  ;;  %v255_v61 = vadd.f32 %v1192_v7, %v184_v53  ;;  %v256_v62 = vadd.f32 %v1192_v7, %v185_v54  ;;  %v257_v5 = vadd.f32 %v1192_v7, %v186_v60 }
  0x45   :  { %v318_v4 = vmax.f32 %v254_v59, 0.0  ;;  %v319_v8 = vmax.f32 %v255_v61, 0.0  ;;  %v320_v9 = vmax.f32 %v256_v62, 0.0  ;;  %v321_v12 = vmax.f32 %v257_v5, 0.0 }
  0x46   :  { %v1108_v43 = vld [vmem:[%s1502_s0 + $0x98] sm:$0xff]  }
  0x47   :  { %1133 = vst [vmem:[%s1505_s3 + $0x68] sm:$0xff] %v998_v35   ;;  %1134 = vst [vmem:[%s1505_s3 + $0x70] sm:$0xff] %v1003_v44   ;;  %v880_v55 = vunpack.c.l.bf16 %v1108_v43  ;;  %v881_v63 = vunpack.c.h.bf16 %v1108_v43  ;;  %v1018_v17 = vpack.c.bf16 %v319_v8, %v318_v4  ;;  %v1023_v22 = vpack.c.bf16 %v321_v12, %v320_v9 }
  0x49   :  { %v187_v0 = vmul.f32 %v880_v55, %v1178_v1  ;;  %v188_v10 = vmul.f32 %v881_v63, %v1178_v1 }
  0x4b   :  { %v258_v11 = vadd.f32 %v1192_v7, %v187_v0  ;;  %v259_v18 = vadd.f32 %v1192_v7, %v188_v10 }
  0x4d   :  { %v322_v19 = vmax.f32 %v258_v11, 0.0  ;;  %v323_v26 = vmax.f32 %v259_v18, 0.0 }
  0x4e   :  { %v1109_v56 = vld [vmem:[%s1502_s0 + $0xa0] sm:$0xff]   ;;  %v1110_v2 = vld [vmem:[%s1502_s0 + $0xa8] sm:$0xff]  }
  0x4f   :  { %1135 = vst [vmem:[%s1505_s3 + $0x78] sm:$0xff] %v1008_v57   ;;  %v884_v6 = vunpack.c.l.bf16 %v1109_v56  ;;  %1136 = vst [vmem:[%s1505_s3 + $0x80] sm:$0xff] %v1013_v3   ;;  %v885_v13 = vunpack.c.h.bf16 %v1109_v56  ;;  %v888_v15 = vunpack.c.l.bf16 %v1110_v2  ;;  %v889_v20 = vunpack.c.h.bf16 %v1110_v2 }
  0x50   :  { %v1028_v35 = vpack.c.bf16 %v323_v26, %v322_v19 }
  0x51   :  { %v189_v14 = vmul.f32 %v884_v6, %v1178_v1  ;;  %v190_v23 = vmul.f32 %v885_v13, %v1178_v1  ;;  %v191_v25 = vmul.f32 %v888_v15, %v1178_v1  ;;  %v192_v27 = vmul.f32 %v889_v20, %v1178_v1 }
  0x53   :  { %v260_v24 = vadd.f32 %v1192_v7, %v189_v14  ;;  %v261_v30 = vadd.f32 %v1192_v7, %v190_v23  ;;  %v262_v32 = vadd.f32 %v1192_v7, %v191_v25  ;;  %v263_v36 = vadd.f32 %v1192_v7, %v192_v27 }
  0x55   :  { %v324_v31 = vmax.f32 %v260_v24, 0.0  ;;  %v325_v39 = vmax.f32 %v261_v30, 0.0  ;;  %v326_v40 = vmax.f32 %v262_v32, 0.0  ;;  %v327_v43 = vmax.f32 %v263_v36, 0.0 }
  0x56   :  { %v1111_v16 = vld [vmem:[%s1502_s0 + $0xb0] sm:$0xff]   ;;  %v1112_v21 = vld [vmem:[%s1502_s0 + $0xb8] sm:$0xff]  }
  0x57   :  { %1137 = vst [vmem:[%s1505_s3 + $0x88] sm:$0xff] %v1018_v17   ;;  %v892_v28 = vunpack.c.l.bf16 %v1111_v16  ;;  %v893_v29 = vunpack.c.h.bf16 %v1111_v16  ;;  %1138 = vst [vmem:[%s1505_s3 + $0x90] sm:$0xff] %v1023_v22   ;;  %v896_v33 = vunpack.c.l.bf16 %v1112_v21  ;;  %v897_v41 = vunpack.c.h.bf16 %v1112_v21 }
  0x58   :  { %v1033_v48 = vpack.c.bf16 %v325_v39, %v324_v31  ;;  %v1038_v53 = vpack.c.bf16 %v327_v43, %v326_v40 }
  0x59   :  { %v193_v37 = vmul.f32 %v892_v28, %v1178_v1  ;;  %v194_v38 = vmul.f32 %v893_v29, %v1178_v1  ;;  %v195_v42 = vmul.f32 %v896_v33, %v1178_v1  ;;  %v196_v49 = vmul.f32 %v897_v41, %v1178_v1 }
  0x5b   :  { %v264_v44 = vadd.f32 %v1192_v7, %v193_v37  ;;  %v265_v45 = vadd.f32 %v1192_v7, %v194_v38  ;;  %v266_v50 = vadd.f32 %v1192_v7, %v195_v42  ;;  %v267_v57 = vadd.f32 %v1192_v7, %v196_v49 }
  0x5d   :  { %v328_v54 = vmax.f32 %v264_v44, 0.0  ;;  %v329_v55 = vmax.f32 %v265_v45, 0.0  ;;  %v330_v58 = vmax.f32 %v266_v50, 0.0  ;;  %v331_v3 = vmax.f32 %v267_v57, 0.0 }
  0x5e   :  { %v1113_v34 = vld [vmem:[%s1502_s0 + $0xc0] sm:$0xff]  }
  0x5f   :  { %1139 = vst [vmem:[%s1505_s3 + $0x98] sm:$0xff] %v1028_v35   ;;  %v900_v46 = vunpack.c.l.bf16 %v1113_v34  ;;  %v901_v51 = vunpack.c.h.bf16 %v1113_v34  ;;  %v1043_v62 = vpack.c.bf16 %v329_v55, %v328_v54  ;;  %v1048_v13 = vpack.c.bf16 %v331_v3, %v330_v58 }
  0x61   :  { %v197_v56 = vmul.f32 %v900_v46, %v1178_v1  ;;  %v198_v59 = vmul.f32 %v901_v51, %v1178_v1 }
  0x63   :  { %v268_v63 = vadd.f32 %v1192_v7, %v197_v56  ;;  %v269_v4 = vadd.f32 %v1192_v7, %v198_v59 }
  0x65   :  { %v332_v8 = vmax.f32 %v268_v63, 0.0  ;;  %v333_v14 = vmax.f32 %v269_v4, 0.0 }
  0x66   :  { %v1114_v47 = vld [vmem:[%s1502_s0 + $0xc8] sm:$0xff]   ;;  %v1115_v52 = vld [vmem:[%s1502_s0 + $0xd0] sm:$0xff]  }
  0x67   :  { %1140 = vst [vmem:[%s1505_s3 + $0xa0] sm:$0xff] %v1033_v48   ;;  %v904_v60 = vunpack.c.l.bf16 %v1114_v47  ;;  %v905_v0 = vunpack.c.h.bf16 %v1114_v47  ;;  %v908_v2 = vunpack.c.l.bf16 %v1115_v52  ;;  %v909_v6 = vunpack.c.h.bf16 %v1115_v52 }
  0x68   :  { %v1053_v22 = vpack.c.bf16 %v333_v14, %v332_v8 }
  0x69   :  { %v199_v5 = vmul.f32 %v904_v60, %v1178_v1  ;;  %v200_v9 = vmul.f32 %v905_v0, %v1178_v1  ;;  %v201_v10 = vmul.f32 %v908_v2, %v1178_v1  ;;  %v202_v16 = vmul.f32 %v909_v6, %v1178_v1 }
  0x6b   :  { %v270_v15 = vadd.f32 %v1192_v7, %v199_v5  ;;  %v271_v17 = vadd.f32 %v1192_v7, %v200_v9  ;;  %v272_v18 = vadd.f32 %v1192_v7, %v201_v10  ;;  %v273_v24 = vadd.f32 %v1192_v7, %v202_v16 }
  0x6d   :  { %v334_v23 = vmax.f32 %v270_v15, 0.0  ;;  %v335_v26 = vmax.f32 %v271_v17, 0.0  ;;  %v336_v27 = vmax.f32 %v272_v18, 0.0  ;;  %v337_v30 = vmax.f32 %v273_v24, 0.0 }
  0x6e   :  { %v1116_v61 = vld [vmem:[%s1502_s0 + $0xd8] sm:$0xff]  }
  0x6f   :  { %1141 = vst [vmem:[%s1505_s3 + $0xa8] sm:$0xff] %v1038_v53   ;;  %1142 = vst [vmem:[%s1505_s3 + $0xb0] sm:$0xff] %v1043_v62   ;;  %v912_v11 = vunpack.c.l.bf16 %v1116_v61  ;;  %v913_v19 = vunpack.c.h.bf16 %v1116_v61  ;;  %v1058_v35 = vpack.c.bf16 %v335_v26, %v334_v23  ;;  %v1063_v40 = vpack.c.bf16 %v337_v30, %v336_v27 }
  0x71   :  { %v203_v20 = vmul.f32 %v912_v11, %v1178_v1  ;;  %v204_v28 = vmul.f32 %v913_v19, %v1178_v1 }
  0x73   :  { %v274_v29 = vadd.f32 %v1192_v7, %v203_v20  ;;  %v275_v36 = vadd.f32 %v1192_v7, %v204_v28 }
  0x75   :  { %v338_v37 = vmax.f32 %v274_v29, 0.0  ;;  %v339_v44 = vmax.f32 %v275_v36, 0.0 }
  0x76   :  { %v1117_v12 = vld [vmem:[%s1502_s0 + $0xe0] sm:$0xff]   ;;  %v1118_v21 = vld [vmem:[%s1502_s0 + $0xe8] sm:$0xff]  }
  0x77   :  { %1143 = vst [vmem:[%s1505_s3 + $0xb8] sm:$0xff] %v1048_v13   ;;  %v916_v25 = vunpack.c.l.bf16 %v1117_v12  ;;  %1144 = vst [vmem:[%s1505_s3 + $0xc0] sm:$0xff] %v1053_v22   ;;  %v917_v31 = vunpack.c.h.bf16 %v1117_v12  ;;  %v920_v33 = vunpack.c.l.bf16 %v1118_v21  ;;  %v921_v38 = vunpack.c.h.bf16 %v1118_v21 }
  0x78   :  { %v1068_v52 = vpack.c.bf16 %v339_v44, %v338_v37 }
  0x79   :  { %v205_v32 = vmul.f32 %v916_v25, %v1178_v1  ;;  %v206_v41 = vmul.f32 %v917_v31, %v1178_v1  ;;  %v207_v43 = vmul.f32 %v920_v33, %v1178_v1  ;;  %v208_v45 = vmul.f32 %v921_v38, %v1178_v1 }
  0x7b   :  { %v276_v42 = vadd.f32 %v1192_v7, %v205_v32  ;;  %v277_v48 = vadd.f32 %v1192_v7, %v206_v41  ;;  %v278_v50 = vadd.f32 %v1192_v7, %v207_v43  ;;  %v279_v53 = vadd.f32 %v1192_v7, %v208_v45 }
  0x7d   :  { %v340_v49 = vmax.f32 %v276_v42, 0.0  ;;  %v341_v56 = vmax.f32 %v277_v48, 0.0  ;;  %v342_v57 = vmax.f32 %v278_v50, 0.0  ;;  %v343_v60 = vmax.f32 %v279_v53, 0.0 }
  0x7e   :  { %v1119_v34 = vld [vmem:[%s1502_s0 + $0xf0] sm:$0xff]   ;;  %v1120_v39 = vld [vmem:[%s1502_s0 + $0xf8] sm:$0xff]  }
  0x7f   :  { %1145 = vst [vmem:[%s1505_s3 + $0xc8] sm:$0xff] %v1058_v35   ;;  %v924_v46 = vunpack.c.l.bf16 %v1119_v34  ;;  %v925_v47 = vunpack.c.h.bf16 %v1119_v34  ;;  %1146 = vst [vmem:[%s1505_s3 + $0xd0] sm:$0xff] %v1063_v40   ;;  %v928_v51 = vunpack.c.l.bf16 %v1120_v39  ;;  %v929_v58 = vunpack.c.h.bf16 %v1120_v39 }
  0x80   :  { %1147 = vst [vmem:[%s1505_s3 + $0xd8] sm:$0xff] %v1068_v52   ;;  %v1073_v63 = vpack.c.bf16 %v341_v56, %v340_v49  ;;  %v1078_v3 = vpack.c.bf16 %v343_v60, %v342_v57 }
  0x81   :  { %v209_v54 = vmul.f32 %v924_v46, %v1178_v1  ;;  %v210_v55 = vmul.f32 %v925_v47, %v1178_v1  ;;  %v211_v59 = vmul.f32 %v928_v51, %v1178_v1  ;;  %v212_v0 = vmul.f32 %v929_v58, %v1178_v1 }
  0x82   :  { %1148 = vst [vmem:[%s1505_s3 + $0xe0] sm:$0xff] %v1073_v63   ;;  %1149 = vst [vmem:[%s1505_s3 + $0xe8] sm:$0xff] %v1078_v3  }
  0x83   :  { %v280_v61 = vadd.f32 %v1192_v7, %v209_v54  ;;  %v281_v62 = vadd.f32 %v1192_v7, %v210_v55  ;;  %v282_v2 = vadd.f32 %v1192_v7, %v211_v59  ;;  %v283_v6 = vadd.f32 %v1192_v7, %v212_v0 }
  0x85   :  { %v344_v4 = vmax.f32 %v280_v61, 0.0  ;;  %v345_v5 = vmax.f32 %v281_v62, 0.0  ;;  %v346_v8 = vmax.f32 %v282_v2, 0.0  ;;  %v347_v10 = vmax.f32 %v283_v6, 0.0 }
  0x87   :  { %v1083_v9 = vpack.c.bf16 %v345_v5, %v344_v4  ;;  %v1088_v1 = vpack.c.bf16 %v347_v10, %v346_v8 }
  0x89   :  { %1150 = vst [vmem:[%s1505_s3 + $0xf0] sm:$0xff] %v1083_v9   ;;  %1151 = vst [vmem:[%s1505_s3 + $0xf8] sm:$0xff] %v1088_v1  }

// kernel: run.32
= control target key start
LH: loop header
LB: loop body
LE: loop exit
PB: predicated region body
PF: predicated region fallthrough
CT: control target
= control target key end

     0   :  { %s2134_s1 = inlined_call_operand.vmem [shape: bf16[128,128], index: 1, kind: input, shape index: {}]   ;;  %s2135_s0 = inlined_call_operand.vmem [shape: bf16[512,128], index: 0, kind: input, shape index: {}]   ;;  %s2136_s2 = inlined_call_operand.vmem [shape: bf16[512,128], index: 2, kind: output, shape index: {0}]   ;;  %s2137_s3 = inlined_call_operand.vmem [shape: f32[8,128], index: 3, kind: output, shape index: {1}]   ;;  %s2138_s4 = inlined_call_operand.vmem [shape: f32[8,128], index: 4, kind: output, shape index: {2}]  }
   0x1   :  { %v1655_v0 = vld [vmem:[%s2134_s1] sm:$0xff]   ;;  %v1656_v1 = vld [vmem:[%s2134_s1 + $0x8] sm:$0xff]   ;;  %v1657_v2 = vld [vmem:[%s2134_s1 + $0x10] sm:$0xff]  }
   0x2   :  { %1559 = vmatprep.subr.bf16.mxu0 %v1655_v0  ;;  %1639 = vmatprep.subr.bf16.mxu1 %v1655_v0  ;;  %v1658_v3 = vld [vmem:[%s2134_s1 + $0x18] sm:$0xff]   ;;  %v1663_v4 = vld [vmem:[%s2135_s0] sm:$0xff]   ;;  %v1660_v6 = vld [vmem:[%s2134_s1 + $0x28] sm:$0xff]  }
   0x3   :  { %1560 = vmatpush3.bf16.msra.mxu0 %v1655_v0  ;;  %1647 = vmatpush3.bf16.msra.mxu1 %v1655_v0  ;;  %v1659_v5 = vld [vmem:[%s2134_s1 + $0x20] sm:$0xff]   ;;  %v1661_v7 = vld [vmem:[%s2134_s1 + $0x30] sm:$0xff]   ;;  %v1662_v8 = vld [vmem:[%s2134_s1 + $0x38] sm:$0xff]  }
   0x4   :  { %1561 = vmatprep.subr.bf16.mxu0 %v1656_v1  ;;  %1640 = vmatprep.subr.bf16.mxu1 %v1656_v1  ;;  %v1679_v9 = vld [vmem:[%s2135_s0 + $0x80] sm:$0xff]   ;;  %v1664_v10 = vld [vmem:[%s2135_s0 + $0x8] sm:$0xff]   ;;  %v1665_v11 = vld [vmem:[%s2135_s0 + $0x10] sm:$0xff]  }
   0x5   :  { %1575 = vmatprep.mubr.bf16.mxu0 %v1663_v4  ;;  %1607 = vmatprep.mubr.bf16.mxu1 %v1679_v9  ;;  %v1680_v12 = vld [vmem:[%s2135_s0 + $0x88] sm:$0xff]   ;;  %v1681_v13 = vld [vmem:[%s2135_s0 + $0x90] sm:$0xff]   ;;  %v1666_v14 = vld [vmem:[%s2135_s0 + $0x18] sm:$0xff]  }
   0x6   :  { %v1667_v15 = vld [vmem:[%s2135_s0 + $0x20] sm:$0xff]   ;;  %v1682_v16 = vld [vmem:[%s2135_s0 + $0x98] sm:$0xff]   ;;  %v1668_v18 = vld [vmem:[%s2135_s0 + $0x28] sm:$0xff]  }
   0x7   :  { %1562 = vmatpush3.bf16.msra.mxu0 %v1656_v1  ;;  %1648 = vmatpush3.bf16.msra.mxu1 %v1656_v1  ;;  %v1683_v17 = vld [vmem:[%s2135_s0 + $0xa0] sm:$0xff]   ;;  %v1684_v19 = vld [vmem:[%s2135_s0 + $0xa8] sm:$0xff]   ;;  %v1669_v20 = vld [vmem:[%s2135_s0 + $0x30] sm:$0xff]  }
   0x8   :  { %1563 = vmatprep.subr.bf16.mxu0 %v1657_v2  ;;  %1641 = vmatprep.subr.bf16.mxu1 %v1657_v2  ;;  %v1685_v21 = vld [vmem:[%s2135_s0 + $0xb0] sm:$0xff]   ;;  %v1670_v22 = vld [vmem:[%s2135_s0 + $0x38] sm:$0xff]   ;;  %v1671_v24 = vld [vmem:[%s2135_s0 + $0x40] sm:$0xff]  }
   0x9   :  { %v1686_v23 = vld [vmem:[%s2135_s0 + $0xb8] sm:$0xff]   ;;  %v1687_v25 = vld [vmem:[%s2135_s0 + $0xc0] sm:$0xff]   ;;  %v1672_v26 = vld [vmem:[%s2135_s0 + $0x48] sm:$0xff]  }
   0xa   :  { %v1688_v27 = vld [vmem:[%s2135_s0 + $0xc8] sm:$0xff]   ;;  %v1673_v28 = vld [vmem:[%s2135_s0 + $0x50] sm:$0xff]   ;;  %v1674_v30 = vld [vmem:[%s2135_s0 + $0x58] sm:$0xff]  }
   0xb   :  { %1564 = vmatpush3.bf16.msra.mxu0 %v1657_v2  ;;  %1649 = vmatpush3.bf16.msra.mxu1 %v1657_v2  ;;  %v1689_v29 = vld [vmem:[%s2135_s0 + $0xd0] sm:$0xff]   ;;  %v1690_v31 = vld [vmem:[%s2135_s0 + $0xd8] sm:$0xff]   ;;  %v1675_v32 = vld [vmem:[%s2135_s0 + $0x60] sm:$0xff]  }
   0xc   :  { %1565 = vmatprep.subr.bf16.mxu0 %v1658_v3  ;;  %1642 = vmatprep.subr.bf16.mxu1 %v1658_v3  ;;  %v1691_v33 = vld [vmem:[%s2135_s0 + $0xe0] sm:$0xff]   ;;  %v1676_v34 = vld [vmem:[%s2135_s0 + $0x68] sm:$0xff]   ;;  %v1677_v36 = vld [vmem:[%s2135_s0 + $0x70] sm:$0xff]  }
   0xd   :  { %v1692_v35 = vld [vmem:[%s2135_s0 + $0xe8] sm:$0xff]   ;;  %v1693_v37 = vld [vmem:[%s2135_s0 + $0xf0] sm:$0xff]   ;;  %v1678_v38 = vld [vmem:[%s2135_s0 + $0x78] sm:$0xff]  }
   0xe   :  { %v1694_v39 = vld [vmem:[%s2135_s0 + $0xf8] sm:$0xff]  }
   0xf   :  { %1566 = vmatpush3.bf16.msra.mxu0 %v1658_v3  ;;  %1650 = vmatpush3.bf16.msra.mxu1 %v1658_v3 }
  0x10   :  { %1567 = vmatprep.subr.bf16.mxu0 %v1659_v5  ;;  %1643 = vmatprep.subr.bf16.mxu1 %v1659_v5 }
  0x13   :  { %1568 = vmatpush3.bf16.msra.mxu0 %v1659_v5  ;;  %1651 = vmatpush3.bf16.msra.mxu1 %v1659_v5 }
  0x14   :  { %1569 = vmatprep.subr.bf16.mxu0 %v1660_v6  ;;  %1644 = vmatprep.subr.bf16.mxu1 %v1660_v6 }
  0x17   :  { %1570 = vmatpush3.bf16.msra.mxu0 %v1660_v6  ;;  %1652 = vmatpush3.bf16.msra.mxu1 %v1660_v6 }
  0x18   :  { %1571 = vmatprep.subr.bf16.mxu0 %v1661_v7  ;;  %1645 = vmatprep.subr.bf16.mxu1 %v1661_v7 }
  0x1b   :  { %1572 = vmatpush3.bf16.msra.mxu0 %v1661_v7  ;;  %1653 = vmatpush3.bf16.msra.mxu1 %v1661_v7 }
  0x1c   :  { %1573 = vmatprep.subr.bf16.mxu0 %v1662_v8  ;;  %1646 = vmatprep.subr.bf16.mxu1 %v1662_v8 }
  0x1f   :  { %1574 = vmatpush3.bf16.msra.mxu0 %v1662_v8  ;;  %1654 = vmatpush3.bf16.msra.mxu1 %v1662_v8 }
  0x22   :  { %1576 = vmatmul.mubr.bf16.vlgmr.msra.gmra.mrb[0].mxu0 %v1664_v10  ;;  %1608 = vmatmul.mubr.bf16.vlgmr.msra.gmra.mrb[0].mxu1 %v1680_v12 }
  0x23   :  { %1579 = vmatprep.mubr.bf16.mxu0 %v1665_v11  ;;  %1611 = vmatprep.mubr.bf16.mxu1 %v1681_v13 }
  0x2a   :  { %1580 = vmatmul.mubr.bf16.gmra.mrb[4].mxu0 %v1666_v14  ;;  %1612 = vmatmul.mubr.bf16.gmra.mrb[4].mxu1 %v1682_v16 }
  0x2b   :  { %1583 = vmatprep.mubr.bf16.mxu0 %v1667_v15  ;;  %1615 = vmatprep.mubr.bf16.mxu1 %v1683_v17 }
  0x32   :  { %1584 = vmatmul.mubr.bf16.gmra.mrb[8].mxu0 %v1668_v18  ;;  %1616 = vmatmul.mubr.bf16.gmra.mrb[8].mxu1 %v1684_v19 }
  0x33   :  { %1587 = vmatprep.mubr.bf16.mxu0 %v1669_v20  ;;  %1619 = vmatprep.mubr.bf16.mxu1 %v1685_v21 }
  0x3a   :  { %1588 = vmatmul.mubr.bf16.gmra.mrb[12].mxu0 %v1670_v22  ;;  %1620 = vmatmul.mubr.bf16.gmra.mrb[12].mxu1 %v1686_v23 }
  0x3b   :  { %1591 = vmatprep.mubr.bf16.mxu0 %v1671_v24  ;;  %1623 = vmatprep.mubr.bf16.mxu1 %v1687_v25 }
  0x42   :  { %1592 = vmatmul.mubr.bf16.gmra.mrb[16].mxu0 %v1672_v26  ;;  %1624 = vmatmul.mubr.bf16.gmra.mrb[16].mxu1 %v1688_v27 }
  0x43   :  { %1595 = vmatprep.mubr.bf16.mxu0 %v1673_v28  ;;  %1627 = vmatprep.mubr.bf16.mxu1 %v1689_v29 }
  0x4a   :  { %1596 = vmatmul.mubr.bf16.gmra.mrb[20].mxu0 %v1674_v30  ;;  %1628 = vmatmul.mubr.bf16.gmra.mrb[20].mxu1 %v1690_v31 }
  0x4b   :  { %1599 = vmatprep.mubr.bf16.mxu0 %v1675_v32  ;;  %1631 = vmatprep.mubr.bf16.mxu1 %v1691_v33 }
  0x52   :  { %1600 = vmatmul.mubr.bf16.gmra.mrb[24].mxu0 %v1676_v34  ;;  %1632 = vmatmul.mubr.bf16.gmra.mrb[24].mxu1 %v1692_v35 }
  0x53   :  { %1603 = vmatprep.mubr.bf16.mxu0 %v1677_v36  ;;  %1635 = vmatprep.mubr.bf16.mxu1 %v1693_v37 }
  0x5a   :  { %1604 = vmatmul.mubr.bf16.gmra.mrb[28].mxu0 %v1678_v38  ;;  %1636 = vmatmul.mubr.bf16.gmra.mrb[28].mxu1 %v1694_v39 }
  0xf5   :  { %v1577_v40 = vpop.f32.mrb[0].mxu0  ;;  %v1840_v41 = vpop.f32.mrb[0].mxu1 }
  0xf6   :  { %v369_v42 = vpop.f32.mrb[1].mxu0  ;;  %v1842_v43 = vpop.f32.mrb[1].mxu1  ;;  %v1015_v55 = vmul.f32 %v1577_v40, %v1577_v40 }
  0xf7   :  { %v1578_v44 = vpop.f32.mrb[2].mxu0  ;;  %v1844_v45 = vpop.f32.mrb[2].mxu1  ;;  %v1013_v46 = vmul.f32 %v369_v42, %v369_v42 }
  0xf8   :  { %v1336_v47 = vpack.c.bf16 %v1578_v44, %v1577_v40  ;;  %v372_v48 = vpop.f32.mrb[3].mxu0  ;;  %v1416_v49 = vpack.c.bf16 %v1844_v45, %v1840_v41  ;;  %v1848_v50 = vpop.f32.mrb[3].mxu1  ;;  %v1016_v58 = vmul.f32 %v1578_v44, %v1578_v44 }
  0xf9   :  { %v1331_v51 = vpack.c.bf16 %v372_v48, %v369_v42  ;;  %v944_v52 = vadd.f32 %v372_v48, %v369_v42  ;;  %v1014_v53 = vmul.f32 %v372_v48, %v372_v48  ;;  %v1411_v54 = vpack.c.bf16 %v1848_v50, %v1842_v43 }
  0xfa   :  { %1488 = vst [vmem:[%s2136_s2 + $0x8] sm:$0xff] %v1336_v47   ;;  %1504 = vst [vmem:[%s2136_s2 + $0x88] sm:$0xff] %v1416_v49  }
  0xfb   :  { %1332 = vst [vmem:[%s2136_s2] sm:$0xff] %v1331_v51   ;;  %v945_v56 = vadd.f32 %v1577_v40, %v944_v52  ;;  %v1077_v57 = vadd.f32 %v1014_v53, %v1013_v46  ;;  %1503 = vst [vmem:[%s2136_s2 + $0x80] sm:$0xff] %v1411_v54  }
  0xfd   :  { %v1078_v59 = vadd.f32 %v1077_v57, %v1015_v55  ;;  %v1581_v60 = vpop.f32.mrb[4].mxu0  ;;  %v946_v61 = vadd.f32 %v1578_v44, %v945_v56  ;;  %v1864_v62 = vpop.f32.mrb[4].mxu1 }
  0xfe   :  { %v385_v63 = vpop.f32.mrb[5].mxu0  ;;  %v1866_v0 = vpop.f32.mrb[5].mxu1  ;;  %v1019_v15 = vmul.f32 %v1581_v60, %v1581_v60 }
  0xff   :  { %v947_v1 = vadd.f32 %v946_v61, %v385_v63  ;;  %v1017_v2 = vmul.f32 %v385_v63, %v385_v63  ;;  %v1079_v3 = vadd.f32 %v1078_v59, %v1016_v58  ;;  %v1582_v4 = vpop.f32.mrb[6].mxu0  ;;  %v1868_v5 = vpop.f32.mrb[6].mxu1 }
 0x100   :  { %v1346_v6 = vpack.c.bf16 %v1582_v4, %v1581_v60  ;;  %v388_v7 = vpop.f32.mrb[7].mxu0  ;;  %v1426_v8 = vpack.c.bf16 %v1868_v5, %v1864_v62  ;;  %v1872_v9 = vpop.f32.mrb[7].mxu1  ;;  %v1020_v18 = vmul.f32 %v1582_v4, %v1582_v4 }
 0x101   :  { %v1080_v10 = vadd.f32 %v1079_v3, %v1017_v2  ;;  %v1341_v11 = vpack.c.bf16 %v388_v7, %v385_v63  ;;  %v948_v12 = vadd.f32 %v947_v1, %v388_v7  ;;  %v1018_v13 = vmul.f32 %v388_v7, %v388_v7 }
 0x102   :  { %1490 = vst [vmem:[%s2136_s2 + $0x18] sm:$0xff] %v1346_v6   ;;  %1506 = vst [vmem:[%s2136_s2 + $0x98] sm:$0xff] %v1426_v8   ;;  %v1421_v14 = vpack.c.bf16 %v1872_v9, %v1866_v0 }
 0x103   :  { %1489 = vst [vmem:[%s2136_s2 + $0x10] sm:$0xff] %v1341_v11   ;;  %v949_v16 = vadd.f32 %v1581_v60, %v948_v12  ;;  %v1081_v17 = vadd.f32 %v1080_v10, %v1018_v13 }
 0x104   :  { %1505 = vst [vmem:[%s2136_s2 + $0x90] sm:$0xff] %v1421_v14  }
 0x105   :  { %v1082_v19 = vadd.f32 %v1081_v17, %v1019_v15  ;;  %v1585_v20 = vpop.f32.mrb[8].mxu0  ;;  %v950_v21 = vadd.f32 %v1582_v4, %v949_v16  ;;  %v1888_v22 = vpop.f32.mrb[8].mxu1 }
 0x106   :  { %v401_v23 = vpop.f32.mrb[9].mxu0  ;;  %v1890_v24 = vpop.f32.mrb[9].mxu1  ;;  %v1023_v39 = vmul.f32 %v1585_v20, %v1585_v20 }
 0x107   :  { %v951_v25 = vadd.f32 %v950_v21, %v401_v23  ;;  %v1021_v26 = vmul.f32 %v401_v23, %v401_v23  ;;  %v1083_v27 = vadd.f32 %v1082_v19, %v1020_v18  ;;  %v1586_v28 = vpop.f32.mrb[10].mxu0  ;;  %v1892_v29 = vpop.f32.mrb[10].mxu1 }
 0x108   :  { %v1356_v30 = vpack.c.bf16 %v1586_v28, %v1585_v20  ;;  %v404_v31 = vpop.f32.mrb[11].mxu0  ;;  %v1436_v32 = vpack.c.bf16 %v1892_v29, %v1888_v22  ;;  %v1896_v33 = vpop.f32.mrb[11].mxu1  ;;  %v1024_v44 = vmul.f32 %v1586_v28, %v1586_v28 }
 0x109   :  { %v1084_v34 = vadd.f32 %v1083_v27, %v1021_v26  ;;  %v1351_v35 = vpack.c.bf16 %v404_v31, %v401_v23  ;;  %v952_v36 = vadd.f32 %v951_v25, %v404_v31  ;;  %v1022_v37 = vmul.f32 %v404_v31, %v404_v31 }
 0x10a   :  { %1492 = vst [vmem:[%s2136_s2 + $0x28] sm:$0xff] %v1356_v30   ;;  %1508 = vst [vmem:[%s2136_s2 + $0xa8] sm:$0xff] %v1436_v32   ;;  %v1431_v38 = vpack.c.bf16 %v1896_v33, %v1890_v24 }
 0x10b   :  { %1491 = vst [vmem:[%s2136_s2 + $0x20] sm:$0xff] %v1351_v35   ;;  %v953_v40 = vadd.f32 %v1585_v20, %v952_v36  ;;  %v1085_v42 = vadd.f32 %v1084_v34, %v1022_v37 }
 0x10c   :  { %1507 = vst [vmem:[%s2136_s2 + $0xa0] sm:$0xff] %v1431_v38  }
 0x10d   :  { %v1086_v46 = vadd.f32 %v1085_v42, %v1023_v39  ;;  %v1589_v47 = vpop.f32.mrb[12].mxu0  ;;  %v954_v48 = vadd.f32 %v1586_v28, %v953_v40  ;;  %v1912_v49 = vpop.f32.mrb[12].mxu1 }
 0x10e   :  { %v417_v51 = vpop.f32.mrb[13].mxu0  ;;  %v1914_v52 = vpop.f32.mrb[13].mxu1  ;;  %v1027_v6 = vmul.f32 %v1589_v47, %v1589_v47 }
 0x10f   :  { %v955_v53 = vadd.f32 %v954_v48, %v417_v51  ;;  %v1025_v54 = vmul.f32 %v417_v51, %v417_v51  ;;  %v1087_v55 = vadd.f32 %v1086_v46, %v1024_v44  ;;  %v1590_v56 = vpop.f32.mrb[14].mxu0  ;;  %v1916_v57 = vpop.f32.mrb[14].mxu1 }
 0x110   :  { %v1366_v58 = vpack.c.bf16 %v1590_v56, %v1589_v47  ;;  %v420_v59 = vpop.f32.mrb[15].mxu0  ;;  %v1446_v60 = vpack.c.bf16 %v1916_v57, %v1912_v49  ;;  %v1920_v61 = vpop.f32.mrb[15].mxu1  ;;  %v1028_v10 = vmul.f32 %v1590_v56, %v1590_v56 }
 0x111   :  { %v1088_v63 = vadd.f32 %v1087_v55, %v1025_v54  ;;  %v1361_v1 = vpack.c.bf16 %v420_v59, %v417_v51  ;;  %v956_v2 = vadd.f32 %v955_v53, %v420_v59  ;;  %v1026_v3 = vmul.f32 %v420_v59, %v420_v59 }
 0x112   :  { %1494 = vst [vmem:[%s2136_s2 + $0x38] sm:$0xff] %v1366_v58   ;;  %1510 = vst [vmem:[%s2136_s2 + $0xb8] sm:$0xff] %v1446_v60   ;;  %v1441_v4 = vpack.c.bf16 %v1920_v61, %v1914_v52 }
 0x113   :  { %1493 = vst [vmem:[%s2136_s2 + $0x30] sm:$0xff] %v1361_v1   ;;  %v957_v7 = vadd.f32 %v1589_v47, %v956_v2  ;;  %v1089_v8 = vadd.f32 %v1088_v63, %v1026_v3 }
 0x114   :  { %1509 = vst [vmem:[%s2136_s2 + $0xb0] sm:$0xff] %v1441_v4  }
 0x115   :  { %v1090_v11 = vadd.f32 %v1089_v8, %v1027_v6  ;;  %v1593_v12 = vpop.f32.mrb[16].mxu0  ;;  %v958_v13 = vadd.f32 %v1590_v56, %v957_v7  ;;  %v1936_v14 = vpop.f32.mrb[16].mxu1 }
 0x116   :  { %v433_v15 = vpop.f32.mrb[17].mxu0  ;;  %v1938_v16 = vpop.f32.mrb[17].mxu1  ;;  %v1031_v35 = vmul.f32 %v1593_v12, %v1593_v12 }
 0x117   :  { %v959_v17 = vadd.f32 %v958_v13, %v433_v15  ;;  %v1029_v18 = vmul.f32 %v433_v15, %v433_v15  ;;  %v1091_v19 = vadd.f32 %v1090_v11, %v1028_v10  ;;  %v1594_v20 = vpop.f32.mrb[18].mxu0  ;;  %v1940_v21 = vpop.f32.mrb[18].mxu1 }
 0x118   :  { %v1376_v23 = vpack.c.bf16 %v1594_v20, %v1593_v12  ;;  %v436_v25 = vpop.f32.mrb[19].mxu0  ;;  %v1456_v26 = vpack.c.bf16 %v1940_v21, %v1936_v14  ;;  %v1944_v27 = vpop.f32.mrb[19].mxu1  ;;  %v1032_v38 = vmul.f32 %v1594_v20, %v1594_v20 }
 0x119   :  { %v1092_v28 = vadd.f32 %v1091_v19, %v1029_v18  ;;  %v1371_v30 = vpack.c.bf16 %v436_v25, %v433_v15  ;;  %v960_v31 = vadd.f32 %v959_v17, %v436_v25  ;;  %v1030_v32 = vmul.f32 %v436_v25, %v436_v25 }
 0x11a   :  { %1496 = vst [vmem:[%s2136_s2 + $0x48] sm:$0xff] %v1376_v23   ;;  %1512 = vst [vmem:[%s2136_s2 + $0xc8] sm:$0xff] %v1456_v26   ;;  %v1451_v34 = vpack.c.bf16 %v1944_v27, %v1938_v16 }
 0x11b   :  { %1495 = vst [vmem:[%s2136_s2 + $0x40] sm:$0xff] %v1371_v30   ;;  %v961_v36 = vadd.f32 %v1593_v12, %v960_v31  ;;  %v1093_v37 = vadd.f32 %v1092_v28, %v1030_v32 }
 0x11c   :  { %1511 = vst [vmem:[%s2136_s2 + $0xc0] sm:$0xff] %v1451_v34  }
 0x11d   :  { %v1094_v39 = vadd.f32 %v1093_v37, %v1031_v35  ;;  %v1597_v40 = vpop.f32.mrb[20].mxu0  ;;  %v962_v42 = vadd.f32 %v1594_v20, %v961_v36  ;;  %v1960_v44 = vpop.f32.mrb[20].mxu1 }
 0x11e   :  { %v449_v46 = vpop.f32.mrb[21].mxu0  ;;  %v1962_v47 = vpop.f32.mrb[21].mxu1  ;;  %v1035_v6 = vmul.f32 %v1597_v40, %v1597_v40 }
 0x11f   :  { %v963_v48 = vadd.f32 %v962_v42, %v449_v46  ;;  %v1033_v51 = vmul.f32 %v449_v46, %v449_v46  ;;  %v1095_v53 = vadd.f32 %v1094_v39, %v1032_v38  ;;  %v1598_v54 = vpop.f32.mrb[22].mxu0  ;;  %v1964_v55 = vpop.f32.mrb[22].mxu1 }
 0x120   :  { %v1386_v56 = vpack.c.bf16 %v1598_v54, %v1597_v40  ;;  %v452_v58 = vpop.f32.mrb[23].mxu0  ;;  %v1466_v59 = vpack.c.bf16 %v1964_v55, %v1960_v44  ;;  %v1968_v60 = vpop.f32.mrb[23].mxu1  ;;  %v1036_v10 = vmul.f32 %v1598_v54, %v1598_v54 }
 0x121   :  { %v1096_v63 = vadd.f32 %v1095_v53, %v1033_v51  ;;  %v1381_v1 = vpack.c.bf16 %v452_v58, %v449_v46  ;;  %v964_v2 = vadd.f32 %v963_v48, %v452_v58  ;;  %v1034_v3 = vmul.f32 %v452_v58, %v452_v58 }
 0x122   :  { %1498 = vst [vmem:[%s2136_s2 + $0x58] sm:$0xff] %v1386_v56   ;;  %1514 = vst [vmem:[%s2136_s2 + $0xd8] sm:$0xff] %v1466_v59   ;;  %v1461_v4 = vpack.c.bf16 %v1968_v60, %v1962_v47 }
 0x123   :  { %1497 = vst [vmem:[%s2136_s2 + $0x50] sm:$0xff] %v1381_v1   ;;  %v965_v7 = vadd.f32 %v1597_v40, %v964_v2  ;;  %v1097_v8 = vadd.f32 %v1096_v63, %v1034_v3 }
 0x124   :  { %1513 = vst [vmem:[%s2136_s2 + $0xd0] sm:$0xff] %v1461_v4  }
 0x125   :  { %v1098_v11 = vadd.f32 %v1097_v8, %v1035_v6  ;;  %v1601_v12 = vpop.f32.mrb[24].mxu0  ;;  %v966_v13 = vadd.f32 %v1598_v54, %v965_v7  ;;  %v1984_v15 = vpop.f32.mrb[24].mxu1 }
 0x126   :  { %v465_v17 = vpop.f32.mrb[25].mxu0  ;;  %v1986_v18 = vpop.f32.mrb[25].mxu1  ;;  %v1039_v39 = vmul.f32 %v1601_v12, %v1601_v12 }
 0x127   :  { %v967_v19 = vadd.f32 %v966_v13, %v465_v17  ;;  %v1037_v20 = vmul.f32 %v465_v17, %v465_v17  ;;  %v1099_v23 = vadd.f32 %v1098_v11, %v1036_v10  ;;  %v1602_v25 = vpop.f32.mrb[26].mxu0  ;;  %v1988_v26 = vpop.f32.mrb[26].mxu1 }
 0x128   :  { %v1396_v28 = vpack.c.bf16 %v1602_v25, %v1601_v12  ;;  %v468_v30 = vpop.f32.mrb[27].mxu0  ;;  %v1476_v31 = vpack.c.bf16 %v1988_v26, %v1984_v15  ;;  %v1992_v32 = vpop.f32.mrb[27].mxu1  ;;  %v1040_v46 = vmul.f32 %v1602_v25, %v1602_v25 }
 0x129   :  { %v1100_v34 = vadd.f32 %v1099_v23, %v1037_v20  ;;  %v1391_v35 = vpack.c.bf16 %v468_v30, %v465_v17  ;;  %v968_v36 = vadd.f32 %v967_v19, %v468_v30  ;;  %v1038_v37 = vmul.f32 %v468_v30, %v468_v30 }
 0x12a   :  { %1500 = vst [vmem:[%s2136_s2 + $0x68] sm:$0xff] %v1396_v28   ;;  %1516 = vst [vmem:[%s2136_s2 + $0xe8] sm:$0xff] %v1476_v31   ;;  %v1471_v38 = vpack.c.bf16 %v1992_v32, %v1986_v18  ;;  %v1045_v31 = vmul.f32 %v1842_v43, %v1842_v43 }
 0x12b   :  { %1499 = vst [vmem:[%s2136_s2 + $0x60] sm:$0xff] %v1391_v35   ;;  %v969_v40 = vadd.f32 %v1601_v12, %v968_v36  ;;  %v1101_v42 = vadd.f32 %v1100_v34, %v1038_v37 }
 0x12c   :  { %1515 = vst [vmem:[%s2136_s2 + $0xe0] sm:$0xff] %v1471_v38   ;;  %v1046_v38 = vmul.f32 %v1848_v50, %v1848_v50 }
 0x12d   :  { %v1102_v48 = vadd.f32 %v1101_v42, %v1039_v39  ;;  %v1605_v51 = vpop.f32.mrb[28].mxu0  ;;  %v970_v53 = vadd.f32 %v1602_v25, %v969_v40  ;;  %v2008_v54 = vpop.f32.mrb[28].mxu1  ;;  %v1047_v39 = vmul.f32 %v1840_v41, %v1840_v41 }
 0x12e   :  { %v481_v56 = vpop.f32.mrb[29].mxu0  ;;  %v2010_v58 = vpop.f32.mrb[29].mxu1  ;;  %v1043_v19 = vmul.f32 %v1605_v51, %v1605_v51 }
 0x12f   :  { %v971_v59 = vadd.f32 %v970_v53, %v481_v56  ;;  %v1041_v63 = vmul.f32 %v481_v56, %v481_v56  ;;  %v1103_v1 = vadd.f32 %v1102_v48, %v1040_v46  ;;  %v1606_v2 = vpop.f32.mrb[30].mxu0  ;;  %v2012_v3 = vpop.f32.mrb[30].mxu1  ;;  %v1048_v46 = vmul.f32 %v1844_v45, %v1844_v45 }
 0x130   :  { %v1406_v4 = vpack.c.bf16 %v1606_v2, %v1605_v51  ;;  %v484_v6 = vpop.f32.mrb[31].mxu0  ;;  %v1486_v7 = vpack.c.bf16 %v2012_v3, %v2008_v54  ;;  %v2016_v8 = vpop.f32.mrb[31].mxu1  ;;  %v1044_v25 = vmul.f32 %v1606_v2, %v1606_v2 }
 0x131   :  { %v1104_v10 = vadd.f32 %v1103_v1, %v1041_v63  ;;  %v1401_v11 = vpack.c.bf16 %v484_v6, %v481_v56  ;;  %v972_v12 = vadd.f32 %v971_v59, %v484_v6  ;;  %v1042_v13 = vmul.f32 %v484_v6, %v484_v6 }
 0x132   :  { %1502 = vst [vmem:[%s2136_s2 + $0x78] sm:$0xff] %v1406_v4   ;;  %1518 = vst [vmem:[%s2136_s2 + $0xf8] sm:$0xff] %v1486_v7   ;;  %v1481_v17 = vpack.c.bf16 %v2016_v8, %v2010_v58  ;;  %v1050_v63 = vmul.f32 %v1872_v9, %v1872_v9 }
 0x133   :  { %1501 = vst [vmem:[%s2136_s2 + $0x70] sm:$0xff] %v1401_v11   ;;  %v973_v20 = vadd.f32 %v1605_v51, %v972_v12  ;;  %v1105_v23 = vadd.f32 %v1104_v10, %v1042_v13  ;;  %v1054_v12 = vmul.f32 %v1896_v33, %v1896_v33 }
 0x134   :  { %1517 = vst [vmem:[%s2136_s2 + $0xf0] sm:$0xff] %v1481_v17  }
 0x135   :  { %v1106_v28 = vadd.f32 %v1105_v23, %v1043_v19  ;;  %v974_v30 = vadd.f32 %v1606_v2, %v973_v20 }
 0x137   :  { %v975_v34 = vadd.f32 %v974_v30, %v1842_v43  ;;  %v1107_v35 = vadd.f32 %v1106_v28, %v1044_v25  ;;  %v1049_v43 = vmul.f32 %v1866_v0, %v1866_v0  ;;  %v1058_v30 = vmul.f32 %v1920_v61, %v1920_v61 }
 0x139   :  { %v1108_v36 = vadd.f32 %v1107_v35, %v1045_v31  ;;  %v976_v37 = vadd.f32 %v975_v34, %v1848_v50 }
 0x13b   :  { %v977_v40 = vadd.f32 %v1840_v41, %v976_v37  ;;  %v1109_v42 = vadd.f32 %v1108_v36, %v1046_v38  ;;  %v1051_v41 = vmul.f32 %v1864_v62, %v1864_v62 }
 0x13d   :  { %v1110_v48 = vadd.f32 %v1109_v42, %v1047_v39  ;;  %v978_v51 = vadd.f32 %v1844_v45, %v977_v40  ;;  %v1052_v45 = vmul.f32 %v1868_v5, %v1868_v5  ;;  %v1062_v40 = vmul.f32 %v1944_v27, %v1944_v27 }
 0x13f   :  { %v979_v53 = vadd.f32 %v978_v51, %v1866_v0  ;;  %v1111_v56 = vadd.f32 %v1110_v48, %v1048_v46  ;;  %v1053_v0 = vmul.f32 %v1890_v24, %v1890_v24 }
 0x141   :  { %v1112_v59 = vadd.f32 %v1111_v56, %v1049_v43  ;;  %v980_v50 = vadd.f32 %v979_v53, %v1872_v9 }
 0x143   :  { %v981_v1 = vadd.f32 %v1864_v62, %v980_v50  ;;  %v1113_v2 = vadd.f32 %v1112_v59, %v1050_v63  ;;  %v1055_v62 = vmul.f32 %v1888_v22, %v1888_v22  ;;  %v1066_v59 = vmul.f32 %v1968_v60, %v1968_v60 }
 0x145   :  { %v1114_v4 = vadd.f32 %v1113_v2, %v1051_v41  ;;  %v982_v6 = vadd.f32 %v1868_v5, %v981_v1  ;;  %v1056_v5 = vmul.f32 %v1892_v29, %v1892_v29 }
 0x147   :  { %v983_v7 = vadd.f32 %v982_v6, %v1890_v24  ;;  %v1115_v10 = vadd.f32 %v1114_v4, %v1052_v45  ;;  %v1057_v24 = vmul.f32 %v1914_v52, %v1914_v52  ;;  %v1070_v6 = vmul.f32 %v1992_v32, %v1992_v32 }
 0x149   :  { %v1116_v11 = vadd.f32 %v1115_v10, %v1053_v0  ;;  %v984_v9 = vadd.f32 %v983_v7, %v1896_v33 }
 0x14b   :  { %v985_v13 = vadd.f32 %v1888_v22, %v984_v9  ;;  %v1117_v17 = vadd.f32 %v1116_v11, %v1054_v12  ;;  %v1059_v22 = vmul.f32 %v1912_v49, %v1912_v49 }
 0x14d   :  { %v1118_v19 = vadd.f32 %v1117_v17, %v1055_v62  ;;  %v986_v20 = vadd.f32 %v1892_v29, %v985_v13  ;;  %v1060_v29 = vmul.f32 %v1916_v57, %v1916_v57  ;;  %v1074_v13 = vmul.f32 %v2016_v8, %v2016_v8 }
 0x14f   :  { %v987_v23 = vadd.f32 %v986_v20, %v1914_v52  ;;  %v1119_v25 = vadd.f32 %v1118_v19, %v1056_v5  ;;  %v1061_v52 = vmul.f32 %v1938_v16, %v1938_v16 }
 0x151   :  { %v1120_v28 = vadd.f32 %v1119_v25, %v1057_v24  ;;  %v988_v33 = vadd.f32 %v987_v23, %v1920_v61 }
 0x153   :  { %v989_v31 = vadd.f32 %v1912_v49, %v988_v33  ;;  %v1121_v34 = vadd.f32 %v1120_v28, %v1058_v30  ;;  %v1063_v49 = vmul.f32 %v1936_v14, %v1936_v14 }
 0x155   :  { %v1122_v35 = vadd.f32 %v1121_v34, %v1059_v22  ;;  %v990_v36 = vadd.f32 %v1916_v57, %v989_v31  ;;  %v1064_v57 = vmul.f32 %v1940_v21, %v1940_v21 }
 0x157   :  { %v991_v37 = vadd.f32 %v990_v36, %v1938_v16  ;;  %v1123_v38 = vadd.f32 %v1122_v35, %v1060_v29  ;;  %v1065_v16 = vmul.f32 %v1962_v47, %v1962_v47 }
 0x159   :  { %v1124_v39 = vadd.f32 %v1123_v38, %v1061_v52  ;;  %v992_v61 = vadd.f32 %v991_v37, %v1944_v27 }
 0x15b   :  { %v993_v42 = vadd.f32 %v1936_v14, %v992_v61  ;;  %v1125_v46 = vadd.f32 %v1124_v39, %v1062_v40  ;;  %v1067_v14 = vmul.f32 %v1960_v44, %v1960_v44 }
 0x15d   :  { %v1126_v48 = vadd.f32 %v1125_v46, %v1063_v49  ;;  %v994_v51 = vadd.f32 %v1940_v21, %v993_v42  ;;  %v1068_v21 = vmul.f32 %v1964_v55, %v1964_v55 }
 0x15f   :  { %v995_v43 = vadd.f32 %v994_v51, %v1962_v47  ;;  %v1127_v53 = vadd.f32 %v1126_v48, %v1064_v57  ;;  %v1069_v47 = vmul.f32 %v1986_v18, %v1986_v18 }
 0x161   :  { %v1128_v56 = vadd.f32 %v1127_v53, %v1065_v16  ;;  %v996_v27 = vadd.f32 %v995_v43, %v1968_v60 }
 0x163   :  { %v997_v50 = vadd.f32 %v1960_v44, %v996_v27  ;;  %v1129_v63 = vadd.f32 %v1128_v56, %v1066_v59  ;;  %v1071_v44 = vmul.f32 %v1984_v15, %v1984_v15 }
 0x165   :  { %v1130_v41 = vadd.f32 %v1129_v63, %v1067_v14  ;;  %v998_v1 = vadd.f32 %v1964_v55, %v997_v50  ;;  %v1072_v55 = vmul.f32 %v1988_v26, %v1988_v26 }
 0x167   :  { %v999_v2 = vadd.f32 %v998_v1, %v1986_v18  ;;  %v1131_v45 = vadd.f32 %v1130_v41, %v1068_v21  ;;  %v1073_v18 = vmul.f32 %v2010_v58, %v2010_v58 }
 0x169   :  { %v1132_v4 = vadd.f32 %v1131_v45, %v1069_v47  ;;  %v1000_v60 = vadd.f32 %v999_v2, %v1992_v32 }
 0x16b   :  { %v1001_v0 = vadd.f32 %v1984_v15, %v1000_v60  ;;  %v1133_v7 = vadd.f32 %v1132_v4, %v1070_v6  ;;  %v1075_v15 = vmul.f32 %v2008_v54, %v2008_v54 }
 0x16d   :  { %v1134_v10 = vadd.f32 %v1133_v7, %v1071_v44  ;;  %v1002_v11 = vadd.f32 %v1988_v26, %v1001_v0  ;;  %v1076_v26 = vmul.f32 %v2012_v3, %v2012_v3 }
 0x16f   :  { %v1003_v9 = vadd.f32 %v1002_v11, %v2010_v58  ;;  %v1135_v12 = vadd.f32 %v1134_v10, %v1072_v55 }
 0x171   :  { %v1136_v62 = vadd.f32 %v1135_v12, %v1073_v18  ;;  %v1004_v32 = vadd.f32 %v1003_v9, %v2016_v8 }
 0x173   :  { %v1005_v17 = vadd.f32 %v2008_v54, %v1004_v32  ;;  %v1137_v5 = vadd.f32 %v1136_v62, %v1074_v13 }
 0x175   :  { %v1006_v19 = vadd.f32 %v2012_v3, %v1005_v17  ;;  %v1138_v20 = vadd.f32 %v1137_v5, %v1075_v15 }
 0x177   :  { %v1007_v58 = vrot.slane %v1006_v19, 4  ;;  %v1139_v24 = vadd.f32 %v1138_v20, %v1076_v26 }
 0x179   :  { %v1008_v23 = vadd.f32 %v1007_v58, %v1006_v19  ;;  %v1140_v25 = vrot.slane %v1139_v24, 4 }
 0x17b   :  { %v1009_v28 = vrot.slane %v1008_v23, 2  ;;  %v1141_v33 = vadd.f32 %v1140_v25, %v1139_v24 }
 0x17d   :  { %v1010_v30 = vadd.f32 %v1009_v28, %v1008_v23  ;;  %v1142_v8 = vrot.slane %v1141_v33, 2 }
 0x17f   :  { %v1011_v22 = vrot.slane %v1010_v30, 1  ;;  %v1143_v31 = vadd.f32 %v1142_v8, %v1141_v33 }
 0x181   :  { %v1012_v34 = vadd.f32 %v1011_v22, %v1010_v30  ;;  %v1144_v29 = vrot.slane %v1143_v31, 1 }
 0x183   :  { %v1145_v54 = vadd.f32 %v1144_v29, %v1143_v31  ;;  %1146 = vst [vmem:[%s2137_s3] sm:$0xff] %v1012_v34 }
 0x185   :  { %1147 = vst [vmem:[%s2138_s4] sm:$0xff] %v1145_v54 }

// kernel: run.35
= control target key start
LH: loop header
LB: loop body
LE: loop exit
PB: predicated region body
PF: predicated region fallthrough
CT: control target
= control target key end

     0   :  { %s422_s0 = inlined_call_operand.vmem [shape: bf16[128,128], index: 0, kind: input, shape index: {}, may-alias: {0,3}]   ;;  %s423_s1 = inlined_call_operand.vmem [shape: f32[1,128], index: 1, kind: input, shape index: {}]   ;;  %s424_s2 = inlined_call_operand.vmem [shape: f32[1,128], index: 2, kind: input, shape index: {}]   ;;  %s425_s3 = inlined_call_operand.vmem [shape: bf16[128,128], index: 3, kind: output, shape index: {}, may-alias: {0,3}]  }
   0x1   :  { %v227_v0 = vld [vmem:[%s422_s0] sm:$0xff]   ;;  %v298_v4 = vld [vmem:[%s422_s0 + $0x8] sm:$0xff]   ;;  %v299_v5 = vld [vmem:[%s422_s0 + $0x10] sm:$0xff]  }
   0x2   :  { %v338_v1 = vld [vmem:[%s423_s1] ss:$0 sm:$0xff]  ;;  %v228_v2 = vunpack.c.l.bf16 %v227_v0  ;;  %v229_v3 = vunpack.c.h.bf16 %v227_v0  ;;  %v300_v6 = vld [vmem:[%s422_s0 + $0x18] sm:$0xff]   ;;  %v232_v8 = vunpack.c.l.bf16 %v298_v4  ;;  %v233_v9 = vunpack.c.h.bf16 %v298_v4  ;;  %v302_v33 = vld [vmem:[%s422_s0 + $0x28] sm:$0xff]  }
   0x3   :  { %v352_v7 = vld [vmem:[%s424_s2] ss:$0 sm:$0xff]  ;;  %v236_v10 = vunpack.c.l.bf16 %v299_v5  ;;  %v237_v11 = vunpack.c.h.bf16 %v299_v5  ;;  %v240_v14 = vunpack.c.l.bf16 %v300_v6  ;;  %v241_v15 = vunpack.c.h.bf16 %v300_v6  ;;  %v303_v38 = vld [vmem:[%s422_s0 + $0x30] sm:$0xff]   ;;  %v304_v43 = vld [vmem:[%s422_s0 + $0x38] sm:$0xff]  }
   0x4   :  { %v53_v12 = vmul.f32 %v228_v2, %v338_v1  ;;  %v54_v13 = vmul.f32 %v229_v3, %v338_v1  ;;  %v55_v16 = vmul.f32 %v232_v8, %v338_v1  ;;  %v56_v17 = vmul.f32 %v233_v9, %v338_v1  ;;  %v301_v28 = vld [vmem:[%s422_s0 + $0x20] sm:$0xff]  }
   0x5   :  { %v57_v18 = vmul.f32 %v236_v10, %v338_v1  ;;  %v58_v19 = vmul.f32 %v237_v11, %v338_v1  ;;  %v59_v22 = vmul.f32 %v240_v14, %v338_v1  ;;  %v60_v23 = vmul.f32 %v241_v15, %v338_v1 }
   0x6   :  { %v76_v20 = vadd.f32 %v352_v7, %v53_v12  ;;  %v77_v21 = vadd.f32 %v352_v7, %v54_v13  ;;  %v78_v24 = vadd.f32 %v352_v7, %v55_v16  ;;  %v79_v25 = vadd.f32 %v352_v7, %v56_v17 }
   0x7   :  { %v80_v26 = vadd.f32 %v352_v7, %v57_v18  ;;  %v81_v27 = vadd.f32 %v352_v7, %v58_v19  ;;  %v82_v31 = vadd.f32 %v352_v7, %v59_v22  ;;  %v83_v32 = vadd.f32 %v352_v7, %v60_v23 }
   0x8   :  { %v92_v29 = vmax.f32 %v76_v20, 0.0  ;;  %v93_v30 = vmax.f32 %v77_v21, 0.0  ;;  %v94_v34 = vmax.f32 %v78_v24, 0.0  ;;  %v95_v35 = vmax.f32 %v79_v25, 0.0 }
   0x9   :  { %v96_v36 = vmax.f32 %v80_v26, 0.0  ;;  %v97_v37 = vmax.f32 %v81_v27, 0.0  ;;  %v98_v40 = vmax.f32 %v82_v31, 0.0  ;;  %v99_v41 = vmax.f32 %v83_v32, 0.0 }
   0xa   :  { %v261_v39 = vpack.c.bf16 %v93_v30, %v92_v29  ;;  %v244_v42 = vunpack.c.l.bf16 %v301_v28  ;;  %v266_v44 = vpack.c.bf16 %v95_v35, %v94_v34  ;;  %v245_v46 = vunpack.c.h.bf16 %v301_v28 }
   0xb   :  { %v271_v45 = vpack.c.bf16 %v97_v37, %v96_v36  ;;  %v248_v47 = vunpack.c.l.bf16 %v302_v33  ;;  %v276_v48 = vpack.c.bf16 %v99_v41, %v98_v40  ;;  %v249_v50 = vunpack.c.h.bf16 %v302_v33 }
   0xc   :  { %262 = vst [vmem:[%s425_s3] sm:$0xff] %v261_v39   ;;  %v61_v49 = vmul.f32 %v244_v42, %v338_v1  ;;  %v252_v51 = vunpack.c.l.bf16 %v303_v38  ;;  %305 = vst [vmem:[%s425_s3 + $0x8] sm:$0xff] %v266_v44   ;;  %v62_v52 = vmul.f32 %v245_v46, %v338_v1  ;;  %v253_v54 = vunpack.c.h.bf16 %v303_v38 }
   0xd   :  { %306 = vst [vmem:[%s425_s3 + $0x10] sm:$0xff] %v271_v45   ;;  %v63_v53 = vmul.f32 %v248_v47, %v338_v1  ;;  %v256_v55 = vunpack.c.l.bf16 %v304_v43  ;;  %307 = vst [vmem:[%s425_s3 + $0x18] sm:$0xff] %v276_v48   ;;  %v64_v57 = vmul.f32 %v249_v50, %v338_v1  ;;  %v257_v59 = vunpack.c.h.bf16 %v304_v43 }
   0xe   :  { %v84_v56 = vadd.f32 %v352_v7, %v61_v49  ;;  %v65_v58 = vmul.f32 %v252_v51, %v338_v1  ;;  %v85_v60 = vadd.f32 %v352_v7, %v62_v52  ;;  %v66_v62 = vmul.f32 %v253_v54, %v338_v1 }
   0xf   :  { %v86_v61 = vadd.f32 %v352_v7, %v63_v53  ;;  %v67_v63 = vmul.f32 %v256_v55, %v338_v1  ;;  %v87_v2 = vadd.f32 %v352_v7, %v64_v57  ;;  %v68_v4 = vmul.f32 %v257_v59, %v338_v1 }
  0x10   :  { %v100_v0 = vmax.f32 %v84_v56, 0.0  ;;  %v88_v3 = vadd.f32 %v352_v7, %v65_v58  ;;  %v101_v5 = vmax.f32 %v85_v60, 0.0  ;;  %v89_v8 = vadd.f32 %v352_v7, %v66_v62 }
  0x11   :  { %v102_v6 = vmax.f32 %v86_v61, 0.0  ;;  %v90_v9 = vadd.f32 %v352_v7, %v67_v63  ;;  %v103_v10 = vmax.f32 %v87_v2, 0.0  ;;  %v91_v12 = vadd.f32 %v352_v7, %v68_v4 }
  0x12   :  { %v104_v11 = vmax.f32 %v88_v3, 0.0  ;;  %v281_v13 = vpack.c.bf16 %v101_v5, %v100_v0  ;;  %v105_v14 = vmax.f32 %v89_v8, 0.0 }
  0x13   :  { %v106_v15 = vmax.f32 %v90_v9, 0.0  ;;  %v286_v16 = vpack.c.bf16 %v103_v10, %v102_v6  ;;  %v107_v17 = vmax.f32 %v91_v12, 0.0 }
  0x14   :  { %308 = vst [vmem:[%s425_s3 + $0x20] sm:$0xff] %v281_v13   ;;  %v291_v1 = vpack.c.bf16 %v105_v14, %v104_v11 }
  0x15   :  { %309 = vst [vmem:[%s425_s3 + $0x28] sm:$0xff] %v286_v16   ;;  %v296_v18 = vpack.c.bf16 %v107_v17, %v106_v15 }
  0x16   :  { %310 = vst [vmem:[%s425_s3 + $0x30] sm:$0xff] %v291_v1  }
  0x17   :  { %311 = vst [vmem:[%s425_s3 + $0x38] sm:$0xff] %v296_v18  }

// kernel: run.34
= control target key start
LH: loop header
LB: loop body
LE: loop exit
PB: predicated region body
PF: predicated region fallthrough
CT: control target
= control target key end

     0   :  { %s670_s1 = inlined_call_operand.vmem [shape: bf16[128,128], index: 1, kind: input, shape index: {}]   ;;  %s671_s0 = inlined_call_operand.vmem [shape: bf16[128,128], index: 0, kind: input, shape index: {}]   ;;  %s672_s2 = inlined_call_operand.vmem [shape: bf16[128,128], index: 2, kind: output, shape index: {0}]   ;;  %s673_s3 = inlined_call_operand.vmem [shape: f32[8,128], index: 3, kind: output, shape index: {1}]   ;;  %s674_s4 = inlined_call_operand.vmem [shape: f32[8,128], index: 4, kind: output, shape index: {2}]  }
   0x1   :  { %v551_v0 = vld [vmem:[%s670_s1] sm:$0xff]   ;;  %v552_v1 = vld [vmem:[%s670_s1 + $0x8] sm:$0xff]   ;;  %v553_v2 = vld [vmem:[%s670_s1 + $0x10] sm:$0xff]  }
   0x2   :  { %503 = vmatprep.subr.bf16.mxu0 %v551_v0  ;;  %535 = vmatprep.subr.bf16.mxu1 %v551_v0  ;;  %v554_v3 = vld [vmem:[%s670_s1 + $0x18] sm:$0xff]   ;;  %v559_v4 = vld [vmem:[%s671_s0] sm:$0xff]   ;;  %v556_v7 = vld [vmem:[%s670_s1 + $0x28] sm:$0xff]  }
   0x3   :  { %504 = vmatpush3.bf16.msra.mxu0 %v551_v0  ;;  %543 = vmatpush3.bf16.msra.mxu1 %v551_v0  ;;  %v555_v5 = vld [vmem:[%s670_s1 + $0x20] sm:$0xff]   ;;  %v557_v8 = vld [vmem:[%s670_s1 + $0x30] sm:$0xff]   ;;  %v558_v9 = vld [vmem:[%s670_s1 + $0x38] sm:$0xff]  }
   0x4   :  { %505 = vmatprep.subr.bf16.mxu0 %v552_v1  ;;  %536 = vmatprep.subr.bf16.mxu1 %v552_v1  ;;  %v563_v6 = vld [vmem:[%s671_s0 + $0x20] sm:$0xff]   ;;  %v560_v10 = vld [vmem:[%s671_s0 + $0x8] sm:$0xff]   ;;  %v561_v12 = vld [vmem:[%s671_s0 + $0x10] sm:$0xff]  }
   0x5   :  { %519 = vmatprep.mubr.bf16.mxu0 %v559_v4  ;;  %527 = vmatprep.mubr.bf16.mxu1 %v563_v6  ;;  %v564_v11 = vld [vmem:[%s671_s0 + $0x28] sm:$0xff]   ;;  %v565_v13 = vld [vmem:[%s671_s0 + $0x30] sm:$0xff]   ;;  %v562_v14 = vld [vmem:[%s671_s0 + $0x18] sm:$0xff]  }
   0x6   :  { %v566_v15 = vld [vmem:[%s671_s0 + $0x38] sm:$0xff]  }
   0x7   :  { %506 = vmatpush3.bf16.msra.mxu0 %v552_v1  ;;  %544 = vmatpush3.bf16.msra.mxu1 %v552_v1 }
   0x8   :  { %507 = vmatprep.subr.bf16.mxu0 %v553_v2  ;;  %537 = vmatprep.subr.bf16.mxu1 %v553_v2 }
   0xb   :  { %508 = vmatpush3.bf16.msra.mxu0 %v553_v2  ;;  %545 = vmatpush3.bf16.msra.mxu1 %v553_v2 }
   0xc   :  { %509 = vmatprep.subr.bf16.mxu0 %v554_v3  ;;  %538 = vmatprep.subr.bf16.mxu1 %v554_v3 }
   0xf   :  { %510 = vmatpush3.bf16.msra.mxu0 %v554_v3  ;;  %546 = vmatpush3.bf16.msra.mxu1 %v554_v3 }
  0x10   :  { %511 = vmatprep.subr.bf16.mxu0 %v555_v5  ;;  %539 = vmatprep.subr.bf16.mxu1 %v555_v5 }
  0x13   :  { %512 = vmatpush3.bf16.msra.mxu0 %v555_v5  ;;  %547 = vmatpush3.bf16.msra.mxu1 %v555_v5 }
  0x14   :  { %513 = vmatprep.subr.bf16.mxu0 %v556_v7  ;;  %540 = vmatprep.subr.bf16.mxu1 %v556_v7 }
  0x17   :  { %514 = vmatpush3.bf16.msra.mxu0 %v556_v7  ;;  %548 = vmatpush3.bf16.msra.mxu1 %v556_v7 }
  0x18   :  { %515 = vmatprep.subr.bf16.mxu0 %v557_v8  ;;  %541 = vmatprep.subr.bf16.mxu1 %v557_v8 }
  0x1b   :  { %516 = vmatpush3.bf16.msra.mxu0 %v557_v8  ;;  %549 = vmatpush3.bf16.msra.mxu1 %v557_v8 }
  0x1c   :  { %517 = vmatprep.subr.bf16.mxu0 %v558_v9  ;;  %542 = vmatprep.subr.bf16.mxu1 %v558_v9 }
  0x1f   :  { %518 = vmatpush3.bf16.msra.mxu0 %v558_v9  ;;  %550 = vmatpush3.bf16.msra.mxu1 %v558_v9 }
  0x22   :  { %520 = vmatmul.mubr.bf16.vlgmr.msra.gmra.mrb[0].mxu0 %v560_v10  ;;  %528 = vmatmul.mubr.bf16.vlgmr.msra.gmra.mrb[0].mxu1 %v564_v11 }
  0x23   :  { %523 = vmatprep.mubr.bf16.mxu0 %v561_v12  ;;  %531 = vmatprep.mubr.bf16.mxu1 %v565_v13 }
  0x2a   :  { %524 = vmatmul.mubr.bf16.gmra.mrb[4].mxu0 %v562_v14  ;;  %532 = vmatmul.mubr.bf16.gmra.mrb[4].mxu1 %v566_v15 }
  0xf5   :  { %v521_v16 = vpop.f32.mrb[0].mxu0  ;;  %v529_v17 = vpop.f32.mrb[0].mxu1 }
  0xf6   :  { %v177_v18 = vpop.f32.mrb[1].mxu0  ;;  %v209_v19 = vpop.f32.mrb[1].mxu1  ;;  %v343_v31 = vmul.f32 %v521_v16, %v521_v16  ;;  %v351_v3 = vmul.f32 %v529_v17, %v529_v17 }
  0xf7   :  { %v522_v20 = vpop.f32.mrb[2].mxu0  ;;  %v530_v21 = vpop.f32.mrb[2].mxu1  ;;  %v341_v22 = vmul.f32 %v177_v18, %v177_v18  ;;  %v349_v61 = vmul.f32 %v209_v19, %v209_v19 }
  0xf8   :  { %v448_v23 = vpack.c.bf16 %v522_v20, %v521_v16  ;;  %v180_v24 = vpop.f32.mrb[3].mxu0  ;;  %v468_v25 = vpack.c.bf16 %v530_v21, %v529_v17  ;;  %v212_v26 = vpop.f32.mrb[3].mxu1  ;;  %v344_v34 = vmul.f32 %v522_v20, %v522_v20  ;;  %v352_v6 = vmul.f32 %v530_v21, %v530_v21 }
  0xf9   :  { %v443_v27 = vpack.c.bf16 %v180_v24, %v177_v18  ;;  %v320_v28 = vadd.f32 %v180_v24, %v177_v18  ;;  %v342_v29 = vmul.f32 %v180_v24, %v180_v24  ;;  %v463_v30 = vpack.c.bf16 %v212_v26, %v209_v19 }
  0xfa   :  { %480 = vst [vmem:[%s672_s2 + $0x8] sm:$0xff] %v448_v23   ;;  %484 = vst [vmem:[%s672_s2 + $0x28] sm:$0xff] %v468_v25   ;;  %v350_v2 = vmul.f32 %v212_v26, %v212_v26 }
  0xfb   :  { %444 = vst [vmem:[%s672_s2] sm:$0xff] %v443_v27   ;;  %v321_v32 = vadd.f32 %v521_v16, %v320_v28  ;;  %v357_v33 = vadd.f32 %v342_v29, %v341_v22  ;;  %483 = vst [vmem:[%s672_s2 + $0x20] sm:$0xff] %v463_v30  }
  0xfd   :  { %v358_v35 = vadd.f32 %v357_v33, %v343_v31  ;;  %v525_v36 = vpop.f32.mrb[4].mxu0  ;;  %v322_v37 = vadd.f32 %v522_v20, %v321_v32  ;;  %v533_v38 = vpop.f32.mrb[4].mxu1 }
  0xfe   :  { %v193_v39 = vpop.f32.mrb[5].mxu0  ;;  %v225_v40 = vpop.f32.mrb[5].mxu1  ;;  %v347_v55 = vmul.f32 %v525_v36, %v525_v36  ;;  %v355_v15 = vmul.f32 %v533_v38, %v533_v38 }
  0xff   :  { %v323_v41 = vadd.f32 %v322_v37, %v193_v39  ;;  %v345_v42 = vmul.f32 %v193_v39, %v193_v39  ;;  %v359_v43 = vadd.f32 %v358_v35, %v344_v34  ;;  %v526_v44 = vpop.f32.mrb[6].mxu0  ;;  %v534_v45 = vpop.f32.mrb[6].mxu1  ;;  %v353_v9 = vmul.f32 %v225_v40, %v225_v40 }
 0x100   :  { %v458_v46 = vpack.c.bf16 %v526_v44, %v525_v36  ;;  %v196_v47 = vpop.f32.mrb[7].mxu0  ;;  %v478_v48 = vpack.c.bf16 %v534_v45, %v533_v38  ;;  %v228_v49 = vpop.f32.mrb[7].mxu1  ;;  %v348_v58 = vmul.f32 %v526_v44, %v526_v44 }
 0x101   :  { %v360_v50 = vadd.f32 %v359_v43, %v345_v42  ;;  %v453_v51 = vpack.c.bf16 %v196_v47, %v193_v39  ;;  %v324_v52 = vadd.f32 %v323_v41, %v196_v47  ;;  %v346_v53 = vmul.f32 %v196_v47, %v196_v47 }
 0x102   :  { %482 = vst [vmem:[%s672_s2 + $0x18] sm:$0xff] %v458_v46   ;;  %486 = vst [vmem:[%s672_s2 + $0x38] sm:$0xff] %v478_v48   ;;  %v473_v54 = vpack.c.bf16 %v228_v49, %v225_v40  ;;  %v354_v14 = vmul.f32 %v228_v49, %v228_v49 }
 0x103   :  { %481 = vst [vmem:[%s672_s2 + $0x10] sm:$0xff] %v453_v51   ;;  %v325_v56 = vadd.f32 %v525_v36, %v324_v52  ;;  %v361_v57 = vadd.f32 %v360_v50, %v346_v53 }
 0x104   :  { %485 = vst [vmem:[%s672_s2 + $0x30] sm:$0xff] %v473_v54  }
 0x105   :  { %v362_v59 = vadd.f32 %v361_v57, %v347_v55  ;;  %v326_v60 = vadd.f32 %v526_v44, %v325_v56 }
 0x107   :  { %v327_v62 = vadd.f32 %v326_v60, %v209_v19  ;;  %v363_v63 = vadd.f32 %v362_v59, %v348_v58  ;;  %v356_v19 = vmul.f32 %v534_v45, %v534_v45 }
 0x109   :  { %v364_v0 = vadd.f32 %v363_v63, %v349_v61  ;;  %v328_v1 = vadd.f32 %v327_v62, %v212_v26 }
 0x10b   :  { %v329_v4 = vadd.f32 %v529_v17, %v328_v1  ;;  %v365_v5 = vadd.f32 %v364_v0, %v350_v2 }
 0x10d   :  { %v366_v7 = vadd.f32 %v365_v5, %v351_v3  ;;  %v330_v8 = vadd.f32 %v530_v21, %v329_v4 }
 0x10f   :  { %v331_v10 = vadd.f32 %v330_v8, %v225_v40  ;;  %v367_v11 = vadd.f32 %v366_v7, %v352_v6 }
 0x111   :  { %v368_v12 = vadd.f32 %v367_v11, %v353_v9  ;;  %v332_v13 = vadd.f32 %v331_v10, %v228_v49 }
 0x113   :  { %v333_v16 = vadd.f32 %v533_v38, %v332_v13  ;;  %v369_v18 = vadd.f32 %v368_v12, %v354_v14 }
 0x115   :  { %v334_v20 = vadd.f32 %v534_v45, %v333_v16  ;;  %v370_v22 = vadd.f32 %v369_v18, %v355_v15 }
 0x117   :  { %v335_v23 = vrot.slane %v334_v20, 4  ;;  %v371_v24 = vadd.f32 %v370_v22, %v356_v19 }
 0x119   :  { %v336_v25 = vadd.f32 %v335_v23, %v334_v20  ;;  %v372_v17 = vrot.slane %v371_v24, 4 }
 0x11b   :  { %v337_v26 = vrot.slane %v336_v25, 2  ;;  %v373_v27 = vadd.f32 %v372_v17, %v371_v24 }
 0x11d   :  { %v338_v28 = vadd.f32 %v337_v26, %v336_v25  ;;  %v374_v21 = vrot.slane %v373_v27, 2 }
 0x11f   :  { %v339_v29 = vrot.slane %v338_v28, 1  ;;  %v375_v30 = vadd.f32 %v374_v21, %v373_v27 }
 0x121   :  { %v340_v31 = vadd.f32 %v339_v29, %v338_v28  ;;  %v376_v32 = vrot.slane %v375_v30, 1 }
 0x123   :  { %v377_v33 = vadd.f32 %v376_v32, %v375_v30  ;;  %378 = vst [vmem:[%s673_s3] sm:$0xff] %v340_v31 }
 0x125   :  { %379 = vst [vmem:[%s674_s4] sm:$0xff] %v377_v33 }

// kernel: run.37
= control target key start
LH: loop header
LB: loop body
LE: loop exit
PB: predicated region body
PF: predicated region fallthrough
CT: control target
= control target key end

     0   :  { %s370_s0 = inlined_call_operand.vmem [shape: bf16[128,128], index: 0, kind: input, shape index: {}, may-alias: {0,3}]   ;;  %s371_s1 = inlined_call_operand.vmem [shape: f32[1,128], index: 1, kind: input, shape index: {}]   ;;  %s372_s2 = inlined_call_operand.vmem [shape: f32[1,128], index: 2, kind: input, shape index: {}]   ;;  %s373_s3 = inlined_call_operand.vmem [shape: bf16[128,128], index: 3, kind: output, shape index: {}, may-alias: {0,3}]  }
   0x1   :  { %v211_v0 = vld [vmem:[%s370_s0] sm:$0xff]   ;;  %v282_v4 = vld [vmem:[%s370_s0 + $0x8] sm:$0xff]   ;;  %v283_v5 = vld [vmem:[%s370_s0 + $0x10] sm:$0xff]  }
   0x2   :  { %v176_v1 = vld [vmem:[%s371_s1] ss:$0 sm:$0xff]  ;;  %v212_v2 = vunpack.c.l.bf16 %v211_v0  ;;  %v213_v3 = vunpack.c.h.bf16 %v211_v0  ;;  %v284_v6 = vld [vmem:[%s370_s0 + $0x18] sm:$0xff]   ;;  %v216_v8 = vunpack.c.l.bf16 %v282_v4  ;;  %v217_v9 = vunpack.c.h.bf16 %v282_v4  ;;  %v286_v25 = vld [vmem:[%s370_s0 + $0x28] sm:$0xff]  }
   0x3   :  { %v177_v7 = vld [vmem:[%s372_s2] ss:$0 sm:$0xff]  ;;  %v220_v10 = vunpack.c.l.bf16 %v283_v5  ;;  %v221_v11 = vunpack.c.h.bf16 %v283_v5  ;;  %v224_v14 = vunpack.c.l.bf16 %v284_v6  ;;  %v225_v15 = vunpack.c.h.bf16 %v284_v6  ;;  %v287_v30 = vld [vmem:[%s370_s0 + $0x30] sm:$0xff]   ;;  %v288_v35 = vld [vmem:[%s370_s0 + $0x38] sm:$0xff]  }
   0x4   :  { %v53_v12 = vmul.f32 %v212_v2, %v176_v1  ;;  %v54_v13 = vmul.f32 %v213_v3, %v176_v1  ;;  %v55_v16 = vmul.f32 %v216_v8, %v176_v1  ;;  %v56_v17 = vmul.f32 %v217_v9, %v176_v1  ;;  %v285_v20 = vld [vmem:[%s370_s0 + $0x20] sm:$0xff]  }
   0x5   :  { %v57_v18 = vmul.f32 %v220_v10, %v176_v1  ;;  %v58_v19 = vmul.f32 %v221_v11, %v176_v1  ;;  %v59_v23 = vmul.f32 %v224_v14, %v176_v1  ;;  %v60_v24 = vmul.f32 %v225_v15, %v176_v1 }
   0x6   :  { %v76_v21 = vadd.f32 %v177_v7, %v53_v12  ;;  %v77_v22 = vadd.f32 %v177_v7, %v54_v13  ;;  %v78_v26 = vadd.f32 %v177_v7, %v55_v16  ;;  %v79_v27 = vadd.f32 %v177_v7, %v56_v17 }
   0x7   :  { %v80_v28 = vadd.f32 %v177_v7, %v57_v18  ;;  %v81_v29 = vadd.f32 %v177_v7, %v58_v19  ;;  %v82_v32 = vadd.f32 %v177_v7, %v59_v23  ;;  %v83_v33 = vadd.f32 %v177_v7, %v60_v24 }
   0x8   :  { %v245_v31 = vpack.c.bf16 %v77_v22, %v76_v21  ;;  %v228_v34 = vunpack.c.l.bf16 %v285_v20  ;;  %v250_v36 = vpack.c.bf16 %v79_v27, %v78_v26  ;;  %v229_v38 = vunpack.c.h.bf16 %v285_v20 }
   0x9   :  { %v255_v37 = vpack.c.bf16 %v81_v29, %v80_v28  ;;  %v232_v39 = vunpack.c.l.bf16 %v286_v25  ;;  %v260_v40 = vpack.c.bf16 %v83_v33, %v82_v32  ;;  %v233_v42 = vunpack.c.h.bf16 %v286_v25 }
   0xa   :  { %246 = vst [vmem:[%s373_s3] sm:$0xff] %v245_v31   ;;  %v61_v41 = vmul.f32 %v228_v34, %v176_v1  ;;  %v236_v43 = vunpack.c.l.bf16 %v287_v30  ;;  %289 = vst [vmem:[%s373_s3 + $0x8] sm:$0xff] %v250_v36   ;;  %v62_v44 = vmul.f32 %v229_v38, %v176_v1  ;;  %v237_v46 = vunpack.c.h.bf16 %v287_v30 }
   0xb   :  { %290 = vst [vmem:[%s373_s3 + $0x10] sm:$0xff] %v255_v37   ;;  %v63_v45 = vmul.f32 %v232_v39, %v176_v1  ;;  %v240_v47 = vunpack.c.l.bf16 %v288_v35  ;;  %291 = vst [vmem:[%s373_s3 + $0x18] sm:$0xff] %v260_v40   ;;  %v64_v49 = vmul.f32 %v233_v42, %v176_v1  ;;  %v241_v51 = vunpack.c.h.bf16 %v288_v35 }
   0xc   :  { %v84_v48 = vadd.f32 %v177_v7, %v61_v41  ;;  %v65_v50 = vmul.f32 %v236_v43, %v176_v1  ;;  %v85_v52 = vadd.f32 %v177_v7, %v62_v44  ;;  %v66_v54 = vmul.f32 %v237_v46, %v176_v1 }
   0xd   :  { %v86_v53 = vadd.f32 %v177_v7, %v63_v45  ;;  %v67_v55 = vmul.f32 %v240_v47, %v176_v1  ;;  %v87_v56 = vadd.f32 %v177_v7, %v64_v49  ;;  %v68_v58 = vmul.f32 %v241_v51, %v176_v1 }
   0xe   :  { %v88_v57 = vadd.f32 %v177_v7, %v65_v50  ;;  %v265_v59 = vpack.c.bf16 %v85_v52, %v84_v48  ;;  %v89_v60 = vadd.f32 %v177_v7, %v66_v54 }
   0xf   :  { %v90_v61 = vadd.f32 %v177_v7, %v67_v55  ;;  %v270_v62 = vpack.c.bf16 %v87_v56, %v86_v53  ;;  %v91_v63 = vadd.f32 %v177_v7, %v68_v58 }
  0x10   :  { %292 = vst [vmem:[%s373_s3 + $0x20] sm:$0xff] %v265_v59   ;;  %v275_v0 = vpack.c.bf16 %v89_v60, %v88_v57 }
  0x11   :  { %293 = vst [vmem:[%s373_s3 + $0x28] sm:$0xff] %v270_v62   ;;  %v280_v2 = vpack.c.bf16 %v91_v63, %v90_v61 }
  0x12   :  { %294 = vst [vmem:[%s373_s3 + $0x30] sm:$0xff] %v275_v0  }
  0x13   :  { %295 = vst [vmem:[%s373_s3 + $0x38] sm:$0xff] %v280_v2  }

// kernel: run.39
= control target key start
LH: loop header
LB: loop body
LE: loop exit
PB: predicated region body
PF: predicated region fallthrough
CT: control target
= control target key end

     0   :  { %s541_s0 = inlined_call_operand.vmem [shape: bf16[128,128], index: 0, kind: input, shape index: {}, may-alias: {0,4}]   ;;  %s542_s1 = inlined_call_operand.vmem [shape: f32[1,128], index: 1, kind: input, shape index: {}]   ;;  %s543_s2 = inlined_call_operand.vmem [shape: f32[1,128], index: 2, kind: input, shape index: {}]   ;;  %s544_s3 = inlined_call_operand.vmem [shape: bf16[128,128], index: 3, kind: input, shape index: {}]   ;;  %s545_s4 = inlined_call_operand.vmem [shape: bf16[128,128], index: 4, kind: output, shape index: {}, may-alias: {0,4}]  }
   0x1   :  { %v278_v0 = vld [vmem:[%s541_s0] sm:$0xff]   ;;  %v381_v5 = vld [vmem:[%s541_s0 + $0x8] sm:$0xff]   ;;  %v382_v12 = vld [vmem:[%s541_s0 + $0x10] sm:$0xff]  }
   0x2   :  { %v433_v1 = vld [vmem:[%s542_s1] ss:$0 sm:$0xff]  ;;  %v279_v2 = vunpack.c.l.bf16 %v278_v0  ;;  %v280_v3 = vunpack.c.h.bf16 %v278_v0  ;;  %v388_v6 = vld [vmem:[%s544_s3 + $0x8] sm:$0xff]   ;;  %v283_v10 = vunpack.c.l.bf16 %v381_v5  ;;  %v284_v11 = vunpack.c.h.bf16 %v381_v5  ;;  %v389_v13 = vld [vmem:[%s544_s3 + $0x10] sm:$0xff]  }
   0x3   :  { %v310_v4 = vld [vmem:[%s544_s3] sm:$0xff]   ;;  %v315_v16 = vunpack.c.l.bf16 %v388_v6  ;;  %v316_v17 = vunpack.c.h.bf16 %v388_v6  ;;  %v287_v20 = vunpack.c.l.bf16 %v382_v12  ;;  %v288_v21 = vunpack.c.h.bf16 %v382_v12  ;;  %v383_v22 = vld [vmem:[%s541_s0 + $0x18] sm:$0xff]   ;;  %v385_v54 = vld [vmem:[%s541_s0 + $0x28] sm:$0xff]  }
   0x4   :  { %v447_v7 = vld [vmem:[%s543_s2] ss:$0 sm:$0xff]  ;;  %v311_v8 = vunpack.c.l.bf16 %v310_v4  ;;  %v312_v9 = vunpack.c.h.bf16 %v310_v4  ;;  %v56_v14 = vmul.f32 %v279_v2, %v433_v1  ;;  %v57_v15 = vmul.f32 %v280_v3, %v433_v1  ;;  %v390_v39 = vld [vmem:[%s544_s3 + $0x18] sm:$0xff]   ;;  %v392_v63 = vld [vmem:[%s544_s3 + $0x28] sm:$0xff]  }
   0x5   :  { %v58_v18 = vmul.f32 %v283_v10, %v433_v1  ;;  %v59_v19 = vmul.f32 %v284_v11, %v433_v1  ;;  %v319_v25 = vunpack.c.l.bf16 %v389_v13  ;;  %v320_v26 = vunpack.c.h.bf16 %v389_v13  ;;  %v384_v48 = vld [vmem:[%s541_s0 + $0x20] sm:$0xff]   ;;  %v393_v11 = vld [vmem:[%s544_s3 + $0x30] sm:$0xff]  }
   0x6   :  { %v79_v23 = vadd.f32 %v447_v7, %v56_v14  ;;  %v80_v24 = vadd.f32 %v447_v7, %v57_v15  ;;  %v60_v29 = vmul.f32 %v287_v20, %v433_v1  ;;  %v61_v30 = vmul.f32 %v288_v21, %v433_v1  ;;  %v391_v49 = vld [vmem:[%s544_s3 + $0x20] sm:$0xff]  }
   0x7   :  { %v81_v27 = vadd.f32 %v447_v7, %v58_v18  ;;  %v82_v28 = vadd.f32 %v447_v7, %v59_v19  ;;  %v291_v33 = vunpack.c.l.bf16 %v383_v22  ;;  %v292_v34 = vunpack.c.h.bf16 %v383_v22 }
   0x8   :  { %v127_v31 = vadd.f32 %v311_v8, %v79_v23  ;;  %v128_v32 = vadd.f32 %v312_v9, %v80_v24  ;;  %v83_v37 = vadd.f32 %v447_v7, %v60_v29  ;;  %v84_v38 = vadd.f32 %v447_v7, %v61_v30 }
   0x9   :  { %v129_v35 = vadd.f32 %v315_v16, %v81_v27  ;;  %v130_v36 = vadd.f32 %v316_v17, %v82_v28  ;;  %v62_v42 = vmul.f32 %v291_v33, %v433_v1  ;;  %v63_v43 = vmul.f32 %v292_v34, %v433_v1  ;;  %v394_v33 = vld [vmem:[%s544_s3 + $0x38] sm:$0xff]  }
   0xa   :  { %v143_v40 = vmax.f32 %v127_v31, 0.0  ;;  %v144_v41 = vmax.f32 %v128_v32, 0.0  ;;  %v131_v46 = vadd.f32 %v319_v25, %v83_v37  ;;  %v132_v47 = vadd.f32 %v320_v26, %v84_v38 }
   0xb   :  { %v145_v44 = vmax.f32 %v129_v35, 0.0  ;;  %v146_v45 = vmax.f32 %v130_v36, 0.0  ;;  %v85_v51 = vadd.f32 %v447_v7, %v62_v42  ;;  %v86_v52 = vadd.f32 %v447_v7, %v63_v43 }
   0xc   :  { %v344_v50 = vpack.c.bf16 %v144_v41, %v143_v40  ;;  %v323_v53 = vunpack.c.l.bf16 %v390_v39  ;;  %v147_v56 = vmax.f32 %v131_v46, 0.0  ;;  %v148_v57 = vmax.f32 %v132_v47, 0.0 }
   0xd   :  { %v349_v55 = vpack.c.bf16 %v146_v45, %v145_v44  ;;  %v324_v58 = vunpack.c.h.bf16 %v390_v39  ;;  %v295_v60 = vunpack.c.l.bf16 %v384_v48  ;;  %v296_v61 = vunpack.c.h.bf16 %v384_v48 }
   0xe   :  { %345 = vst [vmem:[%s545_s4] sm:$0xff] %v344_v50   ;;  %v133_v59 = vadd.f32 %v323_v53, %v85_v51  ;;  %v327_v62 = vunpack.c.l.bf16 %v391_v49  ;;  %v354_v0 = vpack.c.bf16 %v148_v57, %v147_v56  ;;  %v328_v3 = vunpack.c.h.bf16 %v391_v49 }
   0xf   :  { %395 = vst [vmem:[%s545_s4 + $0x8] sm:$0xff] %v349_v55   ;;  %v134_v2 = vadd.f32 %v324_v58, %v86_v52  ;;  %v299_v4 = vunpack.c.l.bf16 %v385_v54  ;;  %v64_v8 = vmul.f32 %v295_v60, %v433_v1  ;;  %v65_v9 = vmul.f32 %v296_v61, %v433_v1 }
  0x10   :  { %v149_v6 = vmax.f32 %v133_v59, 0.0  ;;  %v300_v10 = vunpack.c.h.bf16 %v385_v54  ;;  %v331_v14 = vunpack.c.l.bf16 %v392_v63  ;;  %v332_v15 = vunpack.c.h.bf16 %v392_v63 }
  0x11   :  { %v150_v12 = vmax.f32 %v134_v2, 0.0  ;;  %v66_v13 = vmul.f32 %v299_v4, %v433_v1  ;;  %v87_v16 = vadd.f32 %v447_v7, %v64_v8  ;;  %v88_v17 = vadd.f32 %v447_v7, %v65_v9 }
  0x12   :  { %v67_v18 = vmul.f32 %v300_v10, %v433_v1  ;;  %v335_v24 = vunpack.c.l.bf16 %v393_v11  ;;  %v336_v31 = vunpack.c.h.bf16 %v393_v11  ;;  %v339_v45 = vunpack.c.l.bf16 %v394_v33 }
  0x13   :  { %v359_v21 = vpack.c.bf16 %v150_v12, %v149_v6  ;;  %v89_v22 = vadd.f32 %v447_v7, %v66_v13  ;;  %v135_v25 = vadd.f32 %v327_v62, %v87_v16  ;;  %v136_v26 = vadd.f32 %v328_v3, %v88_v17 }
  0x14   :  { %v90_v27 = vadd.f32 %v447_v7, %v67_v18  ;;  %v340_v49 = vunpack.c.h.bf16 %v394_v33 }
  0x15   :  { %v137_v29 = vadd.f32 %v331_v14, %v89_v22  ;;  %v151_v34 = vmax.f32 %v135_v25, 0.0  ;;  %v152_v35 = vmax.f32 %v136_v26, 0.0 }
  0x16   :  { %v386_v5 = vld [vmem:[%s541_s0 + $0x30] sm:$0xff]   ;;  %v138_v36 = vadd.f32 %v332_v15, %v90_v27 }
  0x17   :  { %396 = vst [vmem:[%s545_s4 + $0x10] sm:$0xff] %v354_v0   ;;  %v303_v19 = vunpack.c.l.bf16 %v386_v5  ;;  %v304_v23 = vunpack.c.h.bf16 %v386_v5  ;;  %v153_v38 = vmax.f32 %v137_v29, 0.0  ;;  %v364_v42 = vpack.c.bf16 %v152_v35, %v151_v34 }
  0x18   :  { %v154_v43 = vmax.f32 %v138_v36, 0.0 }
  0x19   :  { %v68_v28 = vmul.f32 %v303_v19, %v433_v1  ;;  %v69_v30 = vmul.f32 %v304_v23, %v433_v1 }
  0x1a   :  { %v369_v50 = vpack.c.bf16 %v154_v43, %v153_v38 }
  0x1b   :  { %v91_v37 = vadd.f32 %v447_v7, %v68_v28  ;;  %v92_v39 = vadd.f32 %v447_v7, %v69_v30 }
  0x1d   :  { %v139_v44 = vadd.f32 %v335_v24, %v91_v37  ;;  %v140_v46 = vadd.f32 %v336_v31, %v92_v39 }
  0x1e   :  { %v387_v20 = vld [vmem:[%s541_s0 + $0x38] sm:$0xff]  }
  0x1f   :  { %397 = vst [vmem:[%s545_s4 + $0x18] sm:$0xff] %v359_v21   ;;  %v307_v32 = vunpack.c.l.bf16 %v387_v20  ;;  %v308_v40 = vunpack.c.h.bf16 %v387_v20  ;;  %398 = vst [vmem:[%s545_s4 + $0x20] sm:$0xff] %v364_v42   ;;  %v155_v51 = vmax.f32 %v139_v44, 0.0  ;;  %v156_v52 = vmax.f32 %v140_v46, 0.0 }
  0x20   :  { %399 = vst [vmem:[%s545_s4 + $0x28] sm:$0xff] %v369_v50  }
  0x21   :  { %v70_v41 = vmul.f32 %v307_v32, %v433_v1  ;;  %v71_v47 = vmul.f32 %v308_v40, %v433_v1  ;;  %v374_v55 = vpack.c.bf16 %v156_v52, %v155_v51 }
  0x23   :  { %v93_v48 = vadd.f32 %v447_v7, %v70_v41  ;;  %v94_v53 = vadd.f32 %v447_v7, %v71_v47  ;;  %400 = vst [vmem:[%s545_s4 + $0x30] sm:$0xff] %v374_v55  }
  0x25   :  { %v141_v54 = vadd.f32 %v339_v45, %v93_v48  ;;  %v142_v56 = vadd.f32 %v340_v49, %v94_v53 }
  0x27   :  { %v157_v1 = vmax.f32 %v141_v54, 0.0  ;;  %v158_v57 = vmax.f32 %v142_v56, 0.0 }
  0x29   :  { %v379_v58 = vpack.c.bf16 %v158_v57, %v157_v1 }
  0x2b   :  { %401 = vst [vmem:[%s545_s4 + $0x38] sm:$0xff] %v379_v58  }

// kernel: run.44
= control target key start
LH: loop header
LB: loop body
LE: loop exit
PB: predicated region body
PF: predicated region fallthrough
CT: control target
= control target key end

     0   :  { %s888_s1 = inlined_call_operand.vmem [shape: bf16[256,128], index: 1, kind: input, shape index: {}]   ;;  %s889_s0 = inlined_call_operand.vmem [shape: bf16[128,256], index: 0, kind: input, shape index: {}]   ;;  %s890_s2 = inlined_call_operand.vmem [shape: bf16[128,128], index: 2, kind: output, shape index: {0}]   ;;  %s891_s3 = inlined_call_operand.vmem [shape: f32[8,128], index: 3, kind: output, shape index: {1}]   ;;  %s892_s4 = inlined_call_operand.vmem [shape: f32[8,128], index: 4, kind: output, shape index: {2}]  }
   0x1   :  { %v679_v0 = vld [vmem:[%s888_s1 + $0x40] sm:$0xff]   ;;  %v681_v2 = vld [vmem:[%s888_s1 + $0x48] sm:$0xff]   ;;  %v683_v4 = vld [vmem:[%s888_s1 + $0x50] sm:$0xff]  }
   0x2   :  { %v680_v1 = vld [vmem:[%s888_s1] sm:$0xff]   ;;  %599 = vmatprep.subr.bf16.mxu0 %v679_v0  ;;  %663 = vmatprep.subr.bf16.mxu1 %v679_v0  ;;  %v682_v3 = vld [vmem:[%s888_s1 + $0x8] sm:$0xff]   ;;  %v684_v5 = vld [vmem:[%s888_s1 + $0x10] sm:$0xff]  }
   0x3   :  { %600 = vmatpush3.bf16.msra.mxu0 %v680_v1  ;;  %671 = vmatpush3.bf16.msra.mxu1 %v680_v1  ;;  %v685_v6 = vld [vmem:[%s888_s1 + $0x58] sm:$0xff]   ;;  %v687_v8 = vld [vmem:[%s888_s1 + $0x60] sm:$0xff]   ;;  %v689_v10 = vld [vmem:[%s888_s1 + $0x68] sm:$0xff]  }
   0x4   :  { %601 = vmatprep.subr.bf16.mxu0 %v681_v2  ;;  %664 = vmatprep.subr.bf16.mxu1 %v681_v2  ;;  %v686_v7 = vld [vmem:[%s888_s1 + $0x18] sm:$0xff]   ;;  %v688_v9 = vld [vmem:[%s888_s1 + $0x20] sm:$0xff]   ;;  %v690_v12 = vld [vmem:[%s888_s1 + $0x28] sm:$0xff]  }
   0x5   :  { %v697_v11 = vld [vmem:[%s889_s0 + $0x4] ss:$8 sps:$4 sm:$0xff]   ;;  %v691_v14 = vld [vmem:[%s888_s1 + $0x70] sm:$0xff]   ;;  %v693_v16 = vld [vmem:[%s888_s1 + $0x78] sm:$0xff]  }
   0x6   :  { %v703_v13 = vld [vmem:[%s889_s0 + $0x44] ss:$8 sps:$4 sm:$0xff]   ;;  %271 = vmatprep.mubr.bf16.mxu0 %v697_v11  ;;  %v692_v15 = vld [vmem:[%s888_s1 + $0x30] sm:$0xff]   ;;  %v694_v17 = vld [vmem:[%s888_s1 + $0x38] sm:$0xff]  }
   0x7   :  { %602 = vmatpush3.bf16.msra.mxu0 %v682_v3  ;;  %672 = vmatpush3.bf16.msra.mxu1 %v682_v3  ;;  %v695_v18 = vld [vmem:[%s889_s0] ss:$8 sps:$4 sm:$0xff]   ;;  %v698_v20 = vld [vmem:[%s889_s0 + $0x14] ss:$8 sps:$4 sm:$0xff]   ;;  %v700_v22 = vld [vmem:[%s889_s0 + $0x10] ss:$8 sps:$4 sm:$0xff]  }
   0x8   :  { %603 = vmatprep.subr.bf16.mxu0 %v683_v4  ;;  %665 = vmatprep.subr.bf16.mxu1 %v683_v4  ;;  %v701_v19 = vld [vmem:[%s889_s0 + $0x40] ss:$8 sps:$4 sm:$0xff]   ;;  %v707_v21 = vld [vmem:[%s889_s0 + $0x54] ss:$8 sps:$4 sm:$0xff]   ;;  %v709_v23 = vld [vmem:[%s889_s0 + $0x50] ss:$8 sps:$4 sm:$0xff]  }
   0x9   :  { %303 = vmatprep.mubr.bf16.mxu1 %v703_v13  ;;  %v704_v24 = vld [vmem:[%s889_s0 + $0x24] ss:$8 sps:$4 sm:$0xff]   ;;  %v706_v26 = vld [vmem:[%s889_s0 + $0x20] ss:$8 sps:$4 sm:$0xff]   ;;  %v710_v28 = vld [vmem:[%s889_s0 + $0x34] ss:$8 sps:$4 sm:$0xff]  }
   0xa   :  { %v713_v25 = vld [vmem:[%s889_s0 + $0x64] ss:$8 sps:$4 sm:$0xff]   ;;  %v715_v27 = vld [vmem:[%s889_s0 + $0x60] ss:$8 sps:$4 sm:$0xff]   ;;  %v716_v29 = vld [vmem:[%s889_s0 + $0x74] ss:$8 sps:$4 sm:$0xff]  }
   0xb   :  { %604 = vmatpush3.bf16.msra.mxu0 %v684_v5  ;;  %673 = vmatpush3.bf16.msra.mxu1 %v684_v5  ;;  %v712_v30 = vld [vmem:[%s889_s0 + $0x30] ss:$8 sps:$4 sm:$0xff]  }
   0xc   :  { %605 = vmatprep.subr.bf16.mxu0 %v685_v6  ;;  %666 = vmatprep.subr.bf16.mxu1 %v685_v6  ;;  %v718_v31 = vld [vmem:[%s889_s0 + $0x70] ss:$8 sps:$4 sm:$0xff]  }
   0xf   :  { %606 = vmatpush3.bf16.msra.mxu0 %v686_v7  ;;  %674 = vmatpush3.bf16.msra.mxu1 %v686_v7 }
  0x10   :  { %607 = vmatprep.subr.bf16.mxu0 %v687_v8  ;;  %667 = vmatprep.subr.bf16.mxu1 %v687_v8 }
  0x13   :  { %608 = vmatpush3.bf16.msra.mxu0 %v688_v9  ;;  %675 = vmatpush3.bf16.msra.mxu1 %v688_v9 }
  0x14   :  { %609 = vmatprep.subr.bf16.mxu0 %v689_v10  ;;  %668 = vmatprep.subr.bf16.mxu1 %v689_v10 }
  0x17   :  { %610 = vmatpush3.bf16.msra.mxu0 %v690_v12  ;;  %676 = vmatpush3.bf16.msra.mxu1 %v690_v12 }
  0x18   :  { %611 = vmatprep.subr.bf16.mxu0 %v691_v14  ;;  %669 = vmatprep.subr.bf16.mxu1 %v691_v14 }
  0x1b   :  { %612 = vmatpush3.bf16.msra.mxu0 %v692_v15  ;;  %677 = vmatpush3.bf16.msra.mxu1 %v692_v15 }
  0x1c   :  { %613 = vmatprep.subr.bf16.mxu0 %v693_v16  ;;  %670 = vmatprep.subr.bf16.mxu1 %v693_v16 }
  0x1f   :  { %614 = vmatpush3.bf16.msra.mxu0 %v694_v17  ;;  %678 = vmatpush3.bf16.msra.mxu1 %v694_v17 }
  0x22   :  { %272 = vmatmul.mubr.bf16.vlgmr.msra.gmra.mrb[0].mxu0 %v695_v18  ;;  %304 = vmatmul.mubr.bf16.vlgmr.msra.gmra.mrb[0].mxu1 %v701_v19 }
  0x23   :  { %279 = vmatprep.mubr.bf16.mxu0 %v698_v20  ;;  %311 = vmatprep.mubr.bf16.mxu1 %v707_v21 }
  0x2a   :  { %280 = vmatmul.mubr.bf16.gmra.mrb[4].mxu0 %v700_v22  ;;  %312 = vmatmul.mubr.bf16.gmra.mrb[4].mxu1 %v709_v23 }
  0x2b   :  { %287 = vmatprep.mubr.bf16.mxu0 %v704_v24  ;;  %319 = vmatprep.mubr.bf16.mxu1 %v713_v25 }
  0x32   :  { %288 = vmatmul.mubr.bf16.gmra.mrb[8].mxu0 %v706_v26  ;;  %320 = vmatmul.mubr.bf16.gmra.mrb[8].mxu1 %v715_v27 }
  0x33   :  { %295 = vmatprep.mubr.bf16.mxu0 %v710_v28  ;;  %327 = vmatprep.mubr.bf16.mxu1 %v716_v29 }
  0x3a   :  { %296 = vmatmul.mubr.bf16.gmra.mrb[12].mxu0 %v712_v30  ;;  %328 = vmatmul.mubr.bf16.gmra.mrb[12].mxu1 %v718_v31 }
  0xf5   :  { %v615_v32 = vpop.f32.mrb[0].mxu0  ;;  %v639_v33 = vpop.f32.mrb[0].mxu1 }
  0xf6   :  { %v616_v34 = vpop.f32.mrb[1].mxu0  ;;  %v640_v35 = vpop.f32.mrb[1].mxu1 }
  0xf7   :  { %v617_v36 = vadd.f32 %v616_v34, %v615_v32  ;;  %v618_v37 = vpop.f32.mrb[2].mxu0  ;;  %v840_v38 = vadd.f32 %v640_v35, %v639_v33  ;;  %v642_v39 = vpop.f32.mrb[2].mxu1 }
  0xf8   :  { %v619_v40 = vpop.f32.mrb[3].mxu0  ;;  %v643_v41 = vpop.f32.mrb[3].mxu1 }
  0xf9   :  { %v620_v42 = vadd.f32 %v619_v40, %v618_v37  ;;  %v842_v43 = vadd.f32 %v643_v41, %v642_v39  ;;  %v437_v44 = vmul.f32 %v617_v36, %v617_v36 }
  0xfb   :  { %v555_v45 = vpack.c.bf16 %v620_v42, %v617_v36  ;;  %v416_v46 = vadd.f32 %v620_v42, %v617_v36  ;;  %v438_v47 = vmul.f32 %v620_v42, %v620_v42  ;;  %v575_v48 = vpack.c.bf16 %v842_v43, %v840_v38 }
  0xfd   :  { %556 = vst [vmem:[%s890_s2] sm:$0xff] %v555_v45   ;;  %v453_v49 = vadd.f32 %v438_v47, %v437_v44  ;;  %v621_v50 = vpop.f32.mrb[4].mxu0  ;;  %595 = vst [vmem:[%s890_s2 + $0x20] sm:$0xff] %v575_v48   ;;  %v645_v51 = vpop.f32.mrb[4].mxu1  ;;  %v445_v47 = vmul.f32 %v840_v38, %v840_v38 }
  0xfe   :  { %v622_v52 = vpop.f32.mrb[5].mxu0  ;;  %v646_v53 = vpop.f32.mrb[5].mxu1 }
  0xff   :  { %v623_v54 = vadd.f32 %v622_v52, %v621_v50  ;;  %v624_v55 = vpop.f32.mrb[6].mxu0  ;;  %v852_v56 = vadd.f32 %v646_v53, %v645_v51  ;;  %v648_v57 = vpop.f32.mrb[6].mxu1  ;;  %v446_v50 = vmul.f32 %v842_v43, %v842_v43 }
 0x100   :  { %v625_v58 = vpop.f32.mrb[7].mxu0  ;;  %v649_v59 = vpop.f32.mrb[7].mxu1 }
 0x101   :  { %v417_v60 = vadd.f32 %v623_v54, %v416_v46  ;;  %v439_v61 = vmul.f32 %v623_v54, %v623_v54  ;;  %v626_v62 = vadd.f32 %v625_v58, %v624_v55  ;;  %v650_v63 = vadd.f32 %v649_v59, %v648_v57 }
 0x102   :  { %v447_v53 = vmul.f32 %v852_v56, %v852_v56 }
 0x103   :  { %v454_v0 = vadd.f32 %v453_v49, %v439_v61  ;;  %v560_v1 = vpack.c.bf16 %v626_v62, %v623_v54  ;;  %v418_v2 = vadd.f32 %v626_v62, %v417_v60  ;;  %v440_v3 = vmul.f32 %v626_v62, %v626_v62 }
 0x104   :  { %v580_v4 = vpack.c.bf16 %v650_v63, %v852_v56  ;;  %v448_v57 = vmul.f32 %v650_v63, %v650_v63 }
 0x105   :  { %592 = vst [vmem:[%s890_s2 + $0x8] sm:$0xff] %v560_v1   ;;  %v455_v5 = vadd.f32 %v454_v0, %v440_v3  ;;  %v627_v6 = vpop.f32.mrb[8].mxu0  ;;  %v651_v7 = vpop.f32.mrb[8].mxu1 }
 0x106   :  { %v628_v8 = vpop.f32.mrb[9].mxu0  ;;  %596 = vst [vmem:[%s890_s2 + $0x28] sm:$0xff] %v580_v4   ;;  %v652_v9 = vpop.f32.mrb[9].mxu1 }
 0x107   :  { %v629_v10 = vadd.f32 %v628_v8, %v627_v6  ;;  %v630_v11 = vpop.f32.mrb[10].mxu0  ;;  %v653_v12 = vadd.f32 %v652_v9, %v651_v7  ;;  %v654_v13 = vpop.f32.mrb[10].mxu1 }
 0x108   :  { %v631_v14 = vpop.f32.mrb[11].mxu0  ;;  %v655_v15 = vpop.f32.mrb[11].mxu1 }
 0x109   :  { %v419_v16 = vadd.f32 %v629_v10, %v418_v2  ;;  %v441_v17 = vmul.f32 %v629_v10, %v629_v10  ;;  %v632_v18 = vadd.f32 %v631_v14, %v630_v11  ;;  %v656_v19 = vadd.f32 %v655_v15, %v654_v13 }
 0x10a   :  { %v449_v60 = vmul.f32 %v653_v12, %v653_v12 }
 0x10b   :  { %v456_v20 = vadd.f32 %v455_v5, %v441_v17  ;;  %v565_v21 = vpack.c.bf16 %v632_v18, %v629_v10  ;;  %v420_v22 = vadd.f32 %v632_v18, %v419_v16  ;;  %v442_v23 = vmul.f32 %v632_v18, %v632_v18 }
 0x10c   :  { %v585_v24 = vpack.c.bf16 %v656_v19, %v653_v12  ;;  %v450_v1 = vmul.f32 %v656_v19, %v656_v19 }
 0x10d   :  { %593 = vst [vmem:[%s890_s2 + $0x10] sm:$0xff] %v565_v21   ;;  %v457_v25 = vadd.f32 %v456_v20, %v442_v23  ;;  %v633_v26 = vpop.f32.mrb[12].mxu0  ;;  %v657_v27 = vpop.f32.mrb[12].mxu1 }
 0x10e   :  { %v634_v28 = vpop.f32.mrb[13].mxu0  ;;  %597 = vst [vmem:[%s890_s2 + $0x30] sm:$0xff] %v585_v24   ;;  %v658_v29 = vpop.f32.mrb[13].mxu1 }
 0x10f   :  { %v635_v30 = vadd.f32 %v634_v28, %v633_v26  ;;  %v636_v31 = vpop.f32.mrb[14].mxu0  ;;  %v659_v32 = vadd.f32 %v658_v29, %v657_v27  ;;  %v660_v33 = vpop.f32.mrb[14].mxu1 }
 0x110   :  { %v637_v34 = vpop.f32.mrb[15].mxu0  ;;  %v661_v35 = vpop.f32.mrb[15].mxu1 }
 0x111   :  { %v421_v36 = vadd.f32 %v635_v30, %v420_v22  ;;  %v443_v37 = vmul.f32 %v635_v30, %v635_v30  ;;  %v638_v39 = vadd.f32 %v637_v34, %v636_v31  ;;  %v662_v40 = vadd.f32 %v661_v35, %v660_v33 }
 0x112   :  { %v451_v2 = vmul.f32 %v659_v32, %v659_v32 }
 0x113   :  { %v458_v41 = vadd.f32 %v457_v25, %v443_v37  ;;  %v570_v42 = vpack.c.bf16 %v638_v39, %v635_v30  ;;  %v422_v44 = vadd.f32 %v638_v39, %v421_v36  ;;  %v444_v45 = vmul.f32 %v638_v39, %v638_v39 }
 0x114   :  { %v590_v46 = vpack.c.bf16 %v662_v40, %v659_v32  ;;  %v452_v6 = vmul.f32 %v662_v40, %v662_v40 }
 0x115   :  { %594 = vst [vmem:[%s890_s2 + $0x18] sm:$0xff] %v570_v42   ;;  %v423_v48 = vadd.f32 %v840_v38, %v422_v44  ;;  %v459_v49 = vadd.f32 %v458_v41, %v444_v45 }
 0x116   :  { %598 = vst [vmem:[%s890_s2 + $0x38] sm:$0xff] %v590_v46  }
 0x117   :  { %v424_v51 = vadd.f32 %v842_v43, %v423_v48  ;;  %v460_v52 = vadd.f32 %v459_v49, %v445_v47 }
 0x119   :  { %v461_v54 = vadd.f32 %v460_v52, %v446_v50  ;;  %v425_v55 = vadd.f32 %v852_v56, %v424_v51 }
 0x11b   :  { %v426_v58 = vadd.f32 %v650_v63, %v425_v55  ;;  %v462_v38 = vadd.f32 %v461_v54, %v447_v53 }
 0x11d   :  { %v427_v59 = vadd.f32 %v653_v12, %v426_v58  ;;  %v463_v61 = vadd.f32 %v462_v38, %v448_v57 }
 0x11f   :  { %v464_v62 = vadd.f32 %v463_v61, %v449_v60  ;;  %v428_v0 = vadd.f32 %v656_v19, %v427_v59 }
 0x121   :  { %v465_v3 = vadd.f32 %v464_v62, %v450_v1  ;;  %v429_v4 = vadd.f32 %v659_v32, %v428_v0 }
 0x123   :  { %v466_v43 = vadd.f32 %v465_v3, %v451_v2  ;;  %v430_v5 = vadd.f32 %v662_v40, %v429_v4 }
 0x125   :  { %v431_v7 = vrot.slane %v430_v5, 4  ;;  %v467_v8 = vadd.f32 %v466_v43, %v452_v6 }
 0x127   :  { %v432_v9 = vadd.f32 %v431_v7, %v430_v5  ;;  %v468_v10 = vrot.slane %v467_v8, 4 }
 0x129   :  { %v433_v56 = vrot.slane %v432_v9, 2  ;;  %v469_v11 = vadd.f32 %v468_v10, %v467_v8 }
 0x12b   :  { %v434_v63 = vadd.f32 %v433_v56, %v432_v9  ;;  %v470_v13 = vrot.slane %v469_v11, 2 }
 0x12d   :  { %v435_v14 = vrot.slane %v434_v63, 1  ;;  %v471_v12 = vadd.f32 %v470_v13, %v469_v11 }
 0x12f   :  { %v436_v15 = vadd.f32 %v435_v14, %v434_v63  ;;  %v472_v16 = vrot.slane %v471_v12, 1 }
 0x131   :  { %v473_v17 = vadd.f32 %v472_v16, %v471_v12  ;;  %474 = vst [vmem:[%s891_s3] sm:$0xff] %v436_v15 }
 0x133   :  { %475 = vst [vmem:[%s892_s4] sm:$0xff] %v473_v17 }

// kernel: run.47
= control target key start
LH: loop header
LB: loop body
LE: loop exit
PB: predicated region body
PF: predicated region fallthrough
CT: control target
= control target key end

     0   :  { %s140_s0 = inlined_call_operand.vmem [shape: bf16[32,128], index: 0, kind: input, shape index: {}, may-alias: {0,3}]   ;;  %s141_s1 = inlined_call_operand.vmem [shape: f32[1,128], index: 1, kind: input, shape index: {}]   ;;  %s142_s2 = inlined_call_operand.vmem [shape: f32[1,128], index: 2, kind: input, shape index: {}]   ;;  %s143_s3 = inlined_call_operand.vmem [shape: bf16[32,128], index: 3, kind: output, shape index: {}, may-alias: {0,3}]  }
   0x1   :  { %v83_v0 = vld [vmem:[%s140_s0] sm:$0xff]   ;;  %v100_v4 = vld [vmem:[%s140_s0 + $0x8] sm:$0xff]  }
   0x2   :  { %v72_v1 = vld [vmem:[%s141_s1] ss:$0 sm:$0xff]  ;;  %v84_v2 = vunpack.c.l.bf16 %v83_v0  ;;  %v85_v3 = vunpack.c.h.bf16 %v83_v0  ;;  %v88_v6 = vunpack.c.l.bf16 %v100_v4  ;;  %v89_v7 = vunpack.c.h.bf16 %v100_v4 }
   0x3   :  { %v73_v5 = vld [vmem:[%s142_s2] ss:$0 sm:$0xff] }
   0x4   :  { %v29_v8 = vmul.f32 %v84_v2, %v72_v1  ;;  %v30_v9 = vmul.f32 %v85_v3, %v72_v1  ;;  %v31_v10 = vmul.f32 %v88_v6, %v72_v1  ;;  %v32_v11 = vmul.f32 %v89_v7, %v72_v1 }
   0x6   :  { %v40_v12 = vadd.f32 %v73_v5, %v29_v8  ;;  %v41_v13 = vadd.f32 %v73_v5, %v30_v9  ;;  %v42_v14 = vadd.f32 %v73_v5, %v31_v10  ;;  %v43_v15 = vadd.f32 %v73_v5, %v32_v11 }
   0x8   :  { %v44_v16 = vmax.f32 %v40_v12, 0.0  ;;  %v45_v17 = vmax.f32 %v41_v13, 0.0  ;;  %v46_v18 = vmax.f32 %v42_v14, 0.0  ;;  %v47_v19 = vmax.f32 %v43_v15, 0.0 }
   0xa   :  { %v93_v20 = vpack.c.bf16 %v45_v17, %v44_v16  ;;  %v98_v21 = vpack.c.bf16 %v47_v19, %v46_v18 }
   0xc   :  { %94 = vst [vmem:[%s143_s3] sm:$0xff] %v93_v20   ;;  %101 = vst [vmem:[%s143_s3 + $0x8] sm:$0xff] %v98_v21  }

// kernel: run.46
= control target key start
LH: loop header
LB: loop body
LE: loop exit
PB: predicated region body
PF: predicated region fallthrough
CT: control target
= control target key end

     0   :  { %s474_s1 = inlined_call_operand.vmem [shape: bf16[256,128], index: 1, kind: input, shape index: {}]   ;;  %s475_s0 = inlined_call_operand.vmem [shape: bf16[32,256], index: 0, kind: input, shape index: {}]   ;;  %s476_s2 = inlined_call_operand.vmem [shape: bf16[32,128], index: 2, kind: output, shape index: {0}]   ;;  %s477_s3 = inlined_call_operand.vmem [shape: f32[8,128], index: 3, kind: output, shape index: {1}]   ;;  %s478_s4 = inlined_call_operand.vmem [shape: f32[8,128], index: 4, kind: output, shape index: {2}]  }
   0x1   :  { %v355_v0 = vld [vmem:[%s474_s1 + $0x40] sm:$0xff]   ;;  %v357_v2 = vld [vmem:[%s474_s1 + $0x48] sm:$0xff]   ;;  %v359_v4 = vld [vmem:[%s474_s1 + $0x50] sm:$0xff]  }
   0x2   :  { %v356_v1 = vld [vmem:[%s474_s1] sm:$0xff]   ;;  %311 = vmatprep.subr.bf16.mxu0 %v355_v0  ;;  %339 = vmatprep.subr.bf16.mxu1 %v355_v0  ;;  %v358_v3 = vld [vmem:[%s474_s1 + $0x8] sm:$0xff]   ;;  %v360_v5 = vld [vmem:[%s474_s1 + $0x10] sm:$0xff]  }
   0x3   :  { %312 = vmatpush3.bf16.msra.mxu0 %v356_v1  ;;  %347 = vmatpush3.bf16.msra.mxu1 %v356_v1  ;;  %v361_v6 = vld [vmem:[%s474_s1 + $0x58] sm:$0xff]   ;;  %v363_v8 = vld [vmem:[%s474_s1 + $0x60] sm:$0xff]   ;;  %v365_v10 = vld [vmem:[%s474_s1 + $0x68] sm:$0xff]  }
   0x4   :  { %313 = vmatprep.subr.bf16.mxu0 %v357_v2  ;;  %340 = vmatprep.subr.bf16.mxu1 %v357_v2  ;;  %v362_v7 = vld [vmem:[%s474_s1 + $0x18] sm:$0xff]   ;;  %v364_v9 = vld [vmem:[%s474_s1 + $0x20] sm:$0xff]   ;;  %v366_v13 = vld [vmem:[%s474_s1 + $0x28] sm:$0xff]  }
   0x5   :  { %v373_v11 = vld [vmem:[%s475_s0 + $0x4] ss:$8 sps:$4 sm:$0xff]   ;;  %v376_v12 = vld [vmem:[%s475_s0 + $0x14] ss:$8 sps:$4 sm:$0xff]   ;;  %v371_v18 = vld [vmem:[%s475_s0] ss:$8 sps:$4 sm:$0xff]  }
   0x6   :  { %v367_v14 = vld [vmem:[%s474_s1 + $0x70] sm:$0xff]   ;;  %199 = vmatprep.mubr.bf16.mxu0 %v373_v11  ;;  %207 = vmatprep.mubr.bf16.mxu1 %v376_v12  ;;  %v369_v16 = vld [vmem:[%s474_s1 + $0x78] sm:$0xff]  }
   0x7   :  { %314 = vmatpush3.bf16.msra.mxu0 %v358_v3  ;;  %348 = vmatpush3.bf16.msra.mxu1 %v358_v3  ;;  %v368_v15 = vld [vmem:[%s474_s1 + $0x30] sm:$0xff]   ;;  %v370_v17 = vld [vmem:[%s474_s1 + $0x38] sm:$0xff]  }
   0x8   :  { %315 = vmatprep.subr.bf16.mxu0 %v359_v4  ;;  %341 = vmatprep.subr.bf16.mxu1 %v359_v4  ;;  %v374_v19 = vld [vmem:[%s475_s0 + $0x10] ss:$8 sps:$4 sm:$0xff]  }
   0xb   :  { %316 = vmatpush3.bf16.msra.mxu0 %v360_v5  ;;  %349 = vmatpush3.bf16.msra.mxu1 %v360_v5 }
   0xc   :  { %317 = vmatprep.subr.bf16.mxu0 %v361_v6  ;;  %342 = vmatprep.subr.bf16.mxu1 %v361_v6 }
   0xf   :  { %318 = vmatpush3.bf16.msra.mxu0 %v362_v7  ;;  %350 = vmatpush3.bf16.msra.mxu1 %v362_v7 }
  0x10   :  { %319 = vmatprep.subr.bf16.mxu0 %v363_v8  ;;  %343 = vmatprep.subr.bf16.mxu1 %v363_v8 }
  0x13   :  { %320 = vmatpush3.bf16.msra.mxu0 %v364_v9  ;;  %351 = vmatpush3.bf16.msra.mxu1 %v364_v9 }
  0x14   :  { %321 = vmatprep.subr.bf16.mxu0 %v365_v10  ;;  %344 = vmatprep.subr.bf16.mxu1 %v365_v10 }
  0x17   :  { %322 = vmatpush3.bf16.msra.mxu0 %v366_v13  ;;  %352 = vmatpush3.bf16.msra.mxu1 %v366_v13 }
  0x18   :  { %323 = vmatprep.subr.bf16.mxu0 %v367_v14  ;;  %345 = vmatprep.subr.bf16.mxu1 %v367_v14 }
  0x1b   :  { %324 = vmatpush3.bf16.msra.mxu0 %v368_v15  ;;  %353 = vmatpush3.bf16.msra.mxu1 %v368_v15 }
  0x1c   :  { %325 = vmatprep.subr.bf16.mxu0 %v369_v16  ;;  %346 = vmatprep.subr.bf16.mxu1 %v369_v16 }
  0x1f   :  { %326 = vmatpush3.bf16.msra.mxu0 %v370_v17  ;;  %354 = vmatpush3.bf16.msra.mxu1 %v370_v17 }
  0x22   :  { %200 = vmatmul.mubr.bf16.vlgmr.msra.gmra.mrb[0].mxu0 %v371_v18  ;;  %208 = vmatmul.mubr.bf16.vlgmr.msra.gmra.mrb[0].mxu1 %v374_v19 }
  0xf5   :  { %v327_v20 = vpop.f32.mrb[0].mxu0  ;;  %v333_v21 = vpop.f32.mrb[0].mxu1 }
  0xf6   :  { %v328_v22 = vpop.f32.mrb[1].mxu0  ;;  %v334_v23 = vpop.f32.mrb[1].mxu1 }
  0xf7   :  { %v329_v24 = vadd.f32 %v328_v22, %v327_v20  ;;  %v330_v25 = vpop.f32.mrb[2].mxu0  ;;  %v335_v26 = vadd.f32 %v334_v23, %v333_v21  ;;  %v336_v27 = vpop.f32.mrb[2].mxu1 }
  0xf8   :  { %v331_v28 = vpop.f32.mrb[3].mxu0  ;;  %v337_v29 = vpop.f32.mrb[3].mxu1 }
  0xf9   :  { %v332_v30 = vadd.f32 %v331_v28, %v330_v25  ;;  %v338_v31 = vadd.f32 %v337_v29, %v336_v27  ;;  %v245_v32 = vmul.f32 %v329_v24, %v329_v24  ;;  %v247_v33 = vmul.f32 %v335_v26, %v335_v26 }
  0xfb   :  { %v303_v34 = vpack.c.bf16 %v332_v30, %v329_v24  ;;  %v236_v35 = vadd.f32 %v332_v30, %v329_v24  ;;  %v246_v36 = vmul.f32 %v332_v30, %v332_v30  ;;  %v308_v37 = vpack.c.bf16 %v338_v31, %v335_v26 }
  0xfc   :  { %v248_v41 = vmul.f32 %v338_v31, %v338_v31 }
  0xfd   :  { %304 = vst [vmem:[%s476_s2] sm:$0xff] %v303_v34   ;;  %v249_v38 = vadd.f32 %v246_v36, %v245_v32  ;;  %310 = vst [vmem:[%s476_s2 + $0x8] sm:$0xff] %v308_v37   ;;  %v237_v39 = vadd.f32 %v335_v26, %v236_v35 }
  0xff   :  { %v238_v40 = vadd.f32 %v338_v31, %v237_v39  ;;  %v250_v42 = vadd.f32 %v249_v38, %v247_v33 }
 0x101   :  { %v239_v43 = vrot.slane %v238_v40, 4  ;;  %v251_v44 = vadd.f32 %v250_v42, %v248_v41 }
 0x103   :  { %v240_v45 = vadd.f32 %v239_v43, %v238_v40  ;;  %v252_v46 = vrot.slane %v251_v44, 4 }
 0x105   :  { %v241_v47 = vrot.slane %v240_v45, 2  ;;  %v253_v48 = vadd.f32 %v252_v46, %v251_v44 }
 0x107   :  { %v242_v49 = vadd.f32 %v241_v47, %v240_v45  ;;  %v254_v50 = vrot.slane %v253_v48, 2 }
 0x109   :  { %v243_v51 = vrot.slane %v242_v49, 1  ;;  %v255_v52 = vadd.f32 %v254_v50, %v253_v48 }
 0x10b   :  { %v244_v53 = vadd.f32 %v243_v51, %v242_v49  ;;  %v256_v54 = vrot.slane %v255_v52, 1 }
 0x10d   :  { %v257_v55 = vadd.f32 %v256_v54, %v255_v52  ;;  %258 = vst [vmem:[%s477_s3] sm:$0xff] %v244_v53 }
 0x10f   :  { %259 = vst [vmem:[%s478_s4] sm:$0xff] %v257_v55 }

// kernel: run.49
= control target key start
LH: loop header
LB: loop body
LE: loop exit
PB: predicated region body
PF: predicated region fallthrough
CT: control target
= control target key end

     0   :  { %s136_s0 = inlined_call_operand.vmem [shape: bf16[32,128], index: 0, kind: input, shape index: {}, may-alias: {0,3}]   ;;  %s137_s1 = inlined_call_operand.vmem [shape: f32[1,128], index: 1, kind: input, shape index: {}]   ;;  %s138_s2 = inlined_call_operand.vmem [shape: f32[1,128], index: 2, kind: input, shape index: {}]   ;;  %s139_s3 = inlined_call_operand.vmem [shape: bf16[32,128], index: 3, kind: output, shape index: {}, may-alias: {0,3}]  }
   0x1   :  { %v79_v0 = vld [vmem:[%s136_s0] sm:$0xff]   ;;  %v96_v4 = vld [vmem:[%s136_s0 + $0x8] sm:$0xff]  }
   0x2   :  { %v68_v1 = vld [vmem:[%s137_s1] ss:$0 sm:$0xff]  ;;  %v80_v2 = vunpack.c.l.bf16 %v79_v0  ;;  %v81_v3 = vunpack.c.h.bf16 %v79_v0  ;;  %v84_v6 = vunpack.c.l.bf16 %v96_v4  ;;  %v85_v7 = vunpack.c.h.bf16 %v96_v4 }
   0x3   :  { %v69_v5 = vld [vmem:[%s138_s2] ss:$0 sm:$0xff] }
   0x4   :  { %v29_v8 = vmul.f32 %v80_v2, %v68_v1  ;;  %v30_v9 = vmul.f32 %v81_v3, %v68_v1  ;;  %v31_v10 = vmul.f32 %v84_v6, %v68_v1  ;;  %v32_v11 = vmul.f32 %v85_v7, %v68_v1 }
   0x6   :  { %v40_v12 = vadd.f32 %v69_v5, %v29_v8  ;;  %v41_v13 = vadd.f32 %v69_v5, %v30_v9  ;;  %v42_v14 = vadd.f32 %v69_v5, %v31_v10  ;;  %v43_v15 = vadd.f32 %v69_v5, %v32_v11 }
   0x8   :  { %v89_v16 = vpack.c.bf16 %v41_v13, %v40_v12  ;;  %v94_v17 = vpack.c.bf16 %v43_v15, %v42_v14 }
   0xa   :  { %90 = vst [vmem:[%s139_s3] sm:$0xff] %v89_v16   ;;  %97 = vst [vmem:[%s139_s3 + $0x8] sm:$0xff] %v94_v17  }

// kernel: run.50
= control target key start
LH: loop header
LB: loop body
LE: loop exit
PB: predicated region body
PF: predicated region fallthrough
CT: control target
= control target key end

     0   :  { %s667_s1 = inlined_call_operand.vmem [shape: bf16[384,128], index: 1, kind: input, shape index: {}]   ;;  %s668_s0 = inlined_call_operand.vmem [shape: bf16[32,384], index: 0, kind: input, shape index: {}]   ;;  %s669_s2 = inlined_call_operand.vmem [shape: bf16[32,128], index: 2, kind: output, shape index: {0}]   ;;  %s670_s3 = inlined_call_operand.vmem [shape: f32[8,128], index: 3, kind: output, shape index: {1}]   ;;  %s671_s4 = inlined_call_operand.vmem [shape: f32[8,128], index: 4, kind: output, shape index: {2}]  }
   0x1   :  { %v508_v0 = vld [vmem:[%s667_s1 + $0x40] sm:$0xff]   ;;  %v511_v3 = vld [vmem:[%s667_s1 + $0x48] sm:$0xff]   ;;  %v514_v6 = vld [vmem:[%s667_s1 + $0x50] sm:$0xff]  }
   0x2   :  { %v509_v1 = vld [vmem:[%s667_s1] sm:$0xff]   ;;  %450 = vmatprep.subr.bf16.mxu0 %v508_v0  ;;  %v512_v4 = vld [vmem:[%s667_s1 + $0x8] sm:$0xff]   ;;  %v515_v7 = vld [vmem:[%s667_s1 + $0x10] sm:$0xff]  }
   0x3   :  { %v510_v2 = vld [vmem:[%s667_s1 + $0x80] sm:$0xff]   ;;  %451 = vmatpush3.bf16.msra.mxu0 %v509_v1  ;;  %v513_v5 = vld [vmem:[%s667_s1 + $0x88] sm:$0xff]   ;;  %v516_v8 = vld [vmem:[%s667_s1 + $0x90] sm:$0xff]  }
   0x4   :  { %488 = vmatprep.subr.bf16.mxu1 %v510_v2  ;;  %452 = vmatprep.subr.bf16.mxu0 %v511_v3  ;;  %v517_v9 = vld [vmem:[%s667_s1 + $0x58] sm:$0xff]   ;;  %v520_v12 = vld [vmem:[%s667_s1 + $0x60] sm:$0xff]   ;;  %v523_v15 = vld [vmem:[%s667_s1 + $0x68] sm:$0xff]  }
   0x5   :  { %489 = vmatpush3.bf16.msra.mxu1 %v510_v2  ;;  %v518_v10 = vld [vmem:[%s667_s1 + $0x18] sm:$0xff]   ;;  %v522_v13 = vld [vmem:[%s667_s1 + $0xa0] sm:$0xff]   ;;  %v525_v16 = vld [vmem:[%s667_s1 + $0xa8] sm:$0xff]  }
   0x6   :  { %490 = vmatprep.subr.bf16.mxu1 %v513_v5  ;;  %v519_v11 = vld [vmem:[%s667_s1 + $0x98] sm:$0xff]   ;;  %v521_v14 = vld [vmem:[%s667_s1 + $0x20] sm:$0xff]   ;;  %v524_v17 = vld [vmem:[%s667_s1 + $0x28] sm:$0xff]  }
   0x7   :  { %453 = vmatpush3.bf16.msra.mxu0 %v512_v4  ;;  %v526_v18 = vld [vmem:[%s667_s1 + $0x70] sm:$0xff]   ;;  %v529_v21 = vld [vmem:[%s667_s1 + $0x78] sm:$0xff]   ;;  %v532_v26 = vld [vmem:[%s668_s0] ss:$12 sps:$4 sm:$0xff]  }
   0x8   :  { %454 = vmatprep.subr.bf16.mxu0 %v514_v6  ;;  %v527_v19 = vld [vmem:[%s667_s1 + $0x30] sm:$0xff]   ;;  %v531_v22 = vld [vmem:[%s667_s1 + $0xb8] sm:$0xff]   ;;  %v536_v28 = vld [vmem:[%s668_s0 + $0x20] ss:$12 sps:$4 sm:$0xff]  }
   0x9   :  { %491 = vmatpush3.bf16.msra.mxu1 %v513_v5  ;;  %v528_v20 = vld [vmem:[%s667_s1 + $0xb0] sm:$0xff]   ;;  %v530_v25 = vld [vmem:[%s667_s1 + $0x38] sm:$0xff]  }
   0xa   :  { %492 = vmatprep.subr.bf16.mxu1 %v516_v8  ;;  %v534_v23 = vld [vmem:[%s668_s0 + $0x4] ss:$12 sps:$4 sm:$0xff]   ;;  %v535_v24 = vld [vmem:[%s668_s0 + $0x8] ss:$12 sps:$4 sm:$0xff]  }
   0xb   :  { %455 = vmatpush3.bf16.msra.mxu0 %v515_v7  ;;  %279 = vmatprep.mubr.bf16.mxu0 %v534_v23  ;;  %v537_v27 = vld [vmem:[%s668_s0 + $0x1c] ss:$12 sps:$4 sm:$0xff]   ;;  %v539_v29 = vld [vmem:[%s668_s0 + $0x18] ss:$12 sps:$4 sm:$0xff]  }
   0xc   :  { %456 = vmatprep.subr.bf16.mxu0 %v517_v9  ;;  %504 = vmatprep.mubr.bf16.mxu1 %v535_v24 }
   0xd   :  { %493 = vmatpush3.bf16.msra.mxu1 %v516_v8 }
   0xe   :  { %494 = vmatprep.subr.bf16.mxu1 %v519_v11 }
   0xf   :  { %457 = vmatpush3.bf16.msra.mxu0 %v518_v10 }
  0x10   :  { %458 = vmatprep.subr.bf16.mxu0 %v520_v12 }
  0x11   :  { %495 = vmatpush3.bf16.msra.mxu1 %v519_v11 }
  0x12   :  { %496 = vmatprep.subr.bf16.mxu1 %v522_v13 }
  0x13   :  { %459 = vmatpush3.bf16.msra.mxu0 %v521_v14 }
  0x14   :  { %460 = vmatprep.subr.bf16.mxu0 %v523_v15 }
  0x15   :  { %497 = vmatpush3.bf16.msra.mxu1 %v522_v13 }
  0x16   :  { %498 = vmatprep.subr.bf16.mxu1 %v525_v16 }
  0x17   :  { %461 = vmatpush3.bf16.msra.mxu0 %v524_v17 }
  0x18   :  { %462 = vmatprep.subr.bf16.mxu0 %v526_v18 }
  0x19   :  { %499 = vmatpush3.bf16.msra.mxu1 %v525_v16 }
  0x1a   :  { %500 = vmatprep.subr.bf16.mxu1 %v528_v20 }
  0x1b   :  { %463 = vmatpush3.bf16.msra.mxu0 %v527_v19 }
  0x1c   :  { %464 = vmatprep.subr.bf16.mxu0 %v529_v21 }
  0x1d   :  { %501 = vmatpush3.bf16.msra.mxu1 %v528_v20 }
  0x1e   :  { %502 = vmatprep.subr.bf16.mxu1 %v531_v22 }
  0x1f   :  { %465 = vmatpush3.bf16.msra.mxu0 %v530_v25 }
  0x21   :  { %503 = vmatpush3.bf16.msra.mxu1 %v531_v22 }
  0x22   :  { %280 = vmatmul.mubr.bf16.vlgmr.msra.gmra.mrb[0].mxu0 %v532_v26 }
  0x23   :  { %287 = vmatprep.mubr.bf16.mxu0 %v537_v27 }
  0x24   :  { %505 = vmatmul.mubr.bf16.vlgmr.msra.gmra.mrb[0].mxu1 %v536_v28 }
  0x2a   :  { %288 = vmatmul.mubr.bf16.gmra.mrb[4].mxu0 %v539_v29 }
  0xf5   :  { %v466_v30 = vpop.f32.mrb[0].mxu0 }
  0xf6   :  { %v467_v31 = vpop.f32.mrb[1].mxu0 }
  0xf7   :  { %v468_v32 = vadd.f32 %v467_v31, %v466_v30  ;;  %v469_v33 = vpop.f32.mrb[2].mxu0  ;;  %v506_v34 = vpop.f32.mrb[0].mxu1 }
  0xf8   :  { %v470_v35 = vpop.f32.mrb[3].mxu0  ;;  %v330_v36 = vpop.f32.mrb[1].mxu1 }
  0xf9   :  { %v471_v37 = vadd.f32 %v470_v35, %v469_v33  ;;  %v331_v38 = vadd.f32 %v468_v32, %v330_v36  ;;  %v507_v39 = vpop.f32.mrb[2].mxu1 }
  0xfa   :  { %v333_v40 = vpop.f32.mrb[3].mxu1 }
  0xfb   :  { %v334_v41 = vadd.f32 %v471_v37, %v333_v40  ;;  %v374_v42 = vmul.f32 %v331_v38, %v331_v38 }
  0xfd   :  { %v442_v43 = vpack.c.bf16 %v334_v41, %v331_v38  ;;  %v365_v44 = vadd.f32 %v334_v41, %v331_v38  ;;  %v375_v45 = vmul.f32 %v334_v41, %v334_v41  ;;  %v472_v46 = vpop.f32.mrb[4].mxu0 }
  0xfe   :  { %v473_v47 = vpop.f32.mrb[5].mxu0 }
  0xff   :  { %443 = vst [vmem:[%s669_s2] sm:$0xff] %v442_v43   ;;  %v378_v48 = vadd.f32 %v375_v45, %v374_v42  ;;  %v474_v49 = vadd.f32 %v473_v47, %v472_v46  ;;  %v475_v50 = vpop.f32.mrb[6].mxu0 }
 0x100   :  { %v476_v51 = vpop.f32.mrb[7].mxu0 }
 0x101   :  { %v339_v52 = vadd.f32 %v506_v34, %v474_v49  ;;  %v477_v53 = vadd.f32 %v476_v51, %v475_v50 }
 0x103   :  { %v366_v54 = vadd.f32 %v365_v44, %v339_v52  ;;  %v376_v55 = vmul.f32 %v339_v52, %v339_v52  ;;  %v342_v56 = vadd.f32 %v507_v39, %v477_v53 }
 0x105   :  { %v379_v57 = vadd.f32 %v378_v48, %v376_v55  ;;  %v447_v58 = vpack.c.bf16 %v342_v56, %v339_v52  ;;  %v367_v59 = vadd.f32 %v366_v54, %v342_v56  ;;  %v377_v60 = vmul.f32 %v342_v56, %v342_v56 }
 0x107   :  { %449 = vst [vmem:[%s669_s2 + $0x8] sm:$0xff] %v447_v58   ;;  %v368_v61 = vrot.slane %v367_v59, 4  ;;  %v380_v62 = vadd.f32 %v379_v57, %v377_v60 }
 0x109   :  { %v369_v63 = vadd.f32 %v368_v61, %v367_v59  ;;  %v381_v0 = vrot.slane %v380_v62, 4 }
 0x10b   :  { %v370_v1 = vrot.slane %v369_v63, 2  ;;  %v382_v2 = vadd.f32 %v381_v0, %v380_v62 }
 0x10d   :  { %v371_v3 = vadd.f32 %v370_v1, %v369_v63  ;;  %v383_v4 = vrot.slane %v382_v2, 2 }
 0x10f   :  { %v372_v5 = vrot.slane %v371_v3, 1  ;;  %v384_v6 = vadd.f32 %v383_v4, %v382_v2 }
 0x111   :  { %v373_v7 = vadd.f32 %v372_v5, %v371_v3  ;;  %v385_v8 = vrot.slane %v384_v6, 1 }
 0x113   :  { %v386_v9 = vadd.f32 %v385_v8, %v384_v6  ;;  %387 = vst [vmem:[%s670_s3] sm:$0xff] %v373_v7 }
 0x115   :  { %388 = vst [vmem:[%s671_s4] sm:$0xff] %v386_v9 }

// kernel: run.51
= control target key start
LH: loop header
LB: loop body
LE: loop exit
PB: predicated region body
PF: predicated region fallthrough
CT: control target
= control target key end

     0   :  { %s175_s0 = inlined_call_operand.vmem [shape: bf16[32,128], index: 0, kind: input, shape index: {}, may-alias: {0,4}]   ;;  %s176_s1 = inlined_call_operand.vmem [shape: f32[1,128], index: 1, kind: input, shape index: {}]   ;;  %s177_s2 = inlined_call_operand.vmem [shape: f32[1,128], index: 2, kind: input, shape index: {}]   ;;  %s178_s3 = inlined_call_operand.vmem [shape: bf16[32,128], index: 3, kind: input, shape index: {}]   ;;  %s179_s4 = inlined_call_operand.vmem [shape: bf16[32,128], index: 4, kind: output, shape index: {}, may-alias: {0,4}]  }
   0x1   :  { %v98_v0 = vld [vmem:[%s175_s0] sm:$0xff]   ;;  %v123_v5 = vld [vmem:[%s175_s0 + $0x8] sm:$0xff]  }
   0x2   :  { %v87_v1 = vld [vmem:[%s176_s1] ss:$0 sm:$0xff]  ;;  %v99_v2 = vunpack.c.l.bf16 %v98_v0  ;;  %v100_v3 = vunpack.c.h.bf16 %v98_v0  ;;  %v124_v6 = vld [vmem:[%s178_s3 + $0x8] sm:$0xff]   ;;  %v103_v8 = vunpack.c.l.bf16 %v123_v5  ;;  %v104_v9 = vunpack.c.h.bf16 %v123_v5 }
   0x3   :  { %v106_v4 = vld [vmem:[%s178_s3] sm:$0xff]   ;;  %v111_v16 = vunpack.c.l.bf16 %v124_v6  ;;  %v112_v17 = vunpack.c.h.bf16 %v124_v6 }
   0x4   :  { %v88_v7 = vld [vmem:[%s177_s2] ss:$0 sm:$0xff]  ;;  %v32_v10 = vmul.f32 %v99_v2, %v87_v1  ;;  %v33_v11 = vmul.f32 %v100_v3, %v87_v1  ;;  %v107_v12 = vunpack.c.l.bf16 %v106_v4  ;;  %v108_v13 = vunpack.c.h.bf16 %v106_v4 }
   0x5   :  { %v34_v14 = vmul.f32 %v103_v8, %v87_v1  ;;  %v35_v15 = vmul.f32 %v104_v9, %v87_v1 }
   0x6   :  { %v43_v18 = vadd.f32 %v88_v7, %v32_v10  ;;  %v44_v19 = vadd.f32 %v88_v7, %v33_v11 }
   0x7   :  { %v45_v20 = vadd.f32 %v88_v7, %v34_v14  ;;  %v46_v21 = vadd.f32 %v88_v7, %v35_v15 }
   0x8   :  { %v55_v22 = vadd.f32 %v107_v12, %v43_v18  ;;  %v56_v23 = vadd.f32 %v108_v13, %v44_v19 }
   0x9   :  { %v57_v24 = vadd.f32 %v111_v16, %v45_v20  ;;  %v58_v25 = vadd.f32 %v112_v17, %v46_v21 }
   0xa   :  { %v59_v26 = vmax.f32 %v55_v22, 0.0  ;;  %v60_v27 = vmax.f32 %v56_v23, 0.0 }
   0xb   :  { %v61_v28 = vmax.f32 %v57_v24, 0.0  ;;  %v62_v29 = vmax.f32 %v58_v25, 0.0 }
   0xc   :  { %v116_v30 = vpack.c.bf16 %v60_v27, %v59_v26 }
   0xd   :  { %v121_v31 = vpack.c.bf16 %v62_v29, %v61_v28 }
   0xe   :  { %117 = vst [vmem:[%s179_s4] sm:$0xff] %v116_v30  }
   0xf   :  { %125 = vst [vmem:[%s179_s4 + $0x8] sm:$0xff] %v121_v31  }

// kernel: run.48
= control target key start
LH: loop header
LB: loop body
LE: loop exit
PB: predicated region body
PF: predicated region fallthrough
CT: control target
= control target key end

     0   :  { %s336_s1 = inlined_call_operand.vmem [shape: bf16[128,128], index: 1, kind: input, shape index: {}]   ;;  %s337_s0 = inlined_call_operand.vmem [shape: bf16[32,128], index: 0, kind: input, shape index: {}]   ;;  %s338_s2 = inlined_call_operand.vmem [shape: bf16[32,128], index: 2, kind: output, shape index: {0}]   ;;  %s339_s3 = inlined_call_operand.vmem [shape: f32[8,128], index: 3, kind: output, shape index: {1}]   ;;  %s340_s4 = inlined_call_operand.vmem [shape: f32[8,128], index: 4, kind: output, shape index: {2}]  }
   0x1   :  { %v259_v0 = vld [vmem:[%s336_s1] sm:$0xff]   ;;  %v260_v1 = vld [vmem:[%s336_s1 + $0x8] sm:$0xff]   ;;  %v261_v2 = vld [vmem:[%s336_s1 + $0x10] sm:$0xff]  }
   0x2   :  { %239 = vmatprep.subr.bf16.mxu0 %v259_v0  ;;  %v262_v3 = vld [vmem:[%s336_s1 + $0x18] sm:$0xff]   ;;  %v267_v4 = vld [vmem:[%s337_s0] sm:$0xff]   ;;  %v264_v6 = vld [vmem:[%s336_s1 + $0x28] sm:$0xff]  }
   0x3   :  { %240 = vmatpush3.bf16.msra.mxu0 %v259_v0  ;;  %255 = vmatprep.mubr.bf16.mxu0 %v267_v4  ;;  %v263_v5 = vld [vmem:[%s336_s1 + $0x20] sm:$0xff]   ;;  %v265_v7 = vld [vmem:[%s336_s1 + $0x30] sm:$0xff]   ;;  %v266_v8 = vld [vmem:[%s336_s1 + $0x38] sm:$0xff]  }
   0x4   :  { %241 = vmatprep.subr.bf16.mxu0 %v260_v1  ;;  %v268_v9 = vld [vmem:[%s337_s0 + $0x8] sm:$0xff]  }
   0x7   :  { %242 = vmatpush3.bf16.msra.mxu0 %v260_v1 }
   0x8   :  { %243 = vmatprep.subr.bf16.mxu0 %v261_v2 }
   0xb   :  { %244 = vmatpush3.bf16.msra.mxu0 %v261_v2 }
   0xc   :  { %245 = vmatprep.subr.bf16.mxu0 %v262_v3 }
   0xf   :  { %246 = vmatpush3.bf16.msra.mxu0 %v262_v3 }
  0x10   :  { %247 = vmatprep.subr.bf16.mxu0 %v263_v5 }
  0x13   :  { %248 = vmatpush3.bf16.msra.mxu0 %v263_v5 }
  0x14   :  { %249 = vmatprep.subr.bf16.mxu0 %v264_v6 }
  0x17   :  { %250 = vmatpush3.bf16.msra.mxu0 %v264_v6 }
  0x18   :  { %251 = vmatprep.subr.bf16.mxu0 %v265_v7 }
  0x1b   :  { %252 = vmatpush3.bf16.msra.mxu0 %v265_v7 }
  0x1c   :  { %253 = vmatprep.subr.bf16.mxu0 %v266_v8 }
  0x1f   :  { %254 = vmatpush3.bf16.msra.mxu0 %v266_v8 }
  0x22   :  { %256 = vmatmul.mubr.bf16.vlgmr.msra.gmra.mrb[0].mxu0 %v268_v9 }
  0xf5   :  { %v257_v10 = vpop.f32.mrb[0].mxu0 }
  0xf6   :  { %v129_v11 = vpop.f32.mrb[1].mxu0  ;;  %v175_v19 = vmul.f32 %v257_v10, %v257_v10 }
  0xf7   :  { %v258_v12 = vpop.f32.mrb[2].mxu0  ;;  %v173_v15 = vmul.f32 %v129_v11, %v129_v11 }
  0xf8   :  { %v226_v13 = vpack.c.bf16 %v258_v12, %v257_v10  ;;  %v132_v14 = vpop.f32.mrb[3].mxu0  ;;  %v176_v22 = vmul.f32 %v258_v12, %v258_v12 }
  0xf9   :  { %v221_v16 = vpack.c.bf16 %v132_v14, %v129_v11  ;;  %v164_v17 = vadd.f32 %v132_v14, %v129_v11  ;;  %v174_v18 = vmul.f32 %v132_v14, %v132_v14 }
  0xfa   :  { %228 = vst [vmem:[%s338_s2 + $0x8] sm:$0xff] %v226_v13  }
  0xfb   :  { %222 = vst [vmem:[%s338_s2] sm:$0xff] %v221_v16   ;;  %v165_v20 = vadd.f32 %v257_v10, %v164_v17  ;;  %v177_v21 = vadd.f32 %v174_v18, %v173_v15 }
  0xfd   :  { %v166_v23 = vadd.f32 %v258_v12, %v165_v20  ;;  %v178_v24 = vadd.f32 %v177_v21, %v175_v19 }
  0xff   :  { %v167_v25 = vrot.slane %v166_v23, 4  ;;  %v179_v26 = vadd.f32 %v178_v24, %v176_v22 }
 0x101   :  { %v168_v27 = vadd.f32 %v167_v25, %v166_v23  ;;  %v180_v28 = vrot.slane %v179_v26, 4 }
 0x103   :  { %v169_v29 = vrot.slane %v168_v27, 2  ;;  %v181_v30 = vadd.f32 %v180_v28, %v179_v26 }
 0x105   :  { %v170_v31 = vadd.f32 %v169_v29, %v168_v27  ;;  %v182_v32 = vrot.slane %v181_v30, 2 }
 0x107   :  { %v171_v33 = vrot.slane %v170_v31, 1  ;;  %v183_v34 = vadd.f32 %v182_v32, %v181_v30 }
 0x109   :  { %v172_v35 = vadd.f32 %v171_v33, %v170_v31  ;;  %v184_v36 = vrot.slane %v183_v34, 1 }
 0x10b   :  { %v185_v37 = vadd.f32 %v184_v36, %v183_v34  ;;  %186 = vst [vmem:[%s339_s3] sm:$0xff] %v172_v35 }
 0x10d   :  { %187 = vst [vmem:[%s340_s4] sm:$0xff] %v185_v37 }

// kernel: run.56
= control target key start
LH: loop header
LB: loop body
LE: loop exit
PB: predicated region body
PF: predicated region fallthrough
CT: control target
= control target key end

     0   :  { %s998_s1 = inlined_call_operand.vmem [shape: bf16[640,128], index: 1, kind: input, shape index: {}]   ;;  %s999_s0 = inlined_call_operand.vmem [shape: bf16[32,640], index: 0, kind: input, shape index: {}]   ;;  %s1000_s2 = inlined_call_operand.vmem [shape: bf16[32,128], index: 2, kind: output, shape index: {0}]   ;;  %s1001_s3 = inlined_call_operand.vmem [shape: f32[8,128], index: 3, kind: output, shape index: {1}]   ;;  %s1002_s4 = inlined_call_operand.vmem [shape: f32[8,128], index: 4, kind: output, shape index: {2}]  }
   0x1   :  { %v757_v0 = vld [vmem:[%s998_s1 + $0x40] sm:$0xff]   ;;  %v761_v4 = vld [vmem:[%s998_s1 + $0x48] sm:$0xff]   ;;  %v765_v8 = vld [vmem:[%s998_s1 + $0x50] sm:$0xff]  }
   0x2   :  { %v758_v1 = vld [vmem:[%s998_s1 + $0xc0] sm:$0xff]   ;;  %671 = vmatprep.subr.bf16.mxu0 %v757_v0  ;;  %v762_v5 = vld [vmem:[%s998_s1 + $0xc8] sm:$0xff]   ;;  %v766_v9 = vld [vmem:[%s998_s1 + $0xd0] sm:$0xff]  }
   0x3   :  { %v759_v2 = vld [vmem:[%s998_s1] sm:$0xff]   ;;  %699 = vmatprep.subr.bf16.mxu1 %v758_v1  ;;  %v763_v6 = vld [vmem:[%s998_s1 + $0x8] sm:$0xff]   ;;  %v767_v10 = vld [vmem:[%s998_s1 + $0x10] sm:$0xff]  }
   0x4   :  { %v760_v3 = vld [vmem:[%s998_s1 + $0x80] sm:$0xff]   ;;  %672 = vmatpush3.bf16.msra.mxu0 %v759_v2  ;;  %v764_v7 = vld [vmem:[%s998_s1 + $0x88] sm:$0xff]   ;;  %v768_v11 = vld [vmem:[%s998_s1 + $0x90] sm:$0xff]  }
   0x5   :  { %700 = vmatpush3.bf16.msra.mxu1 %v760_v3  ;;  %673 = vmatprep.subr.bf16.mxu0 %v761_v4  ;;  %v769_v12 = vld [vmem:[%s998_s1 + $0x58] sm:$0xff]   ;;  %v773_v16 = vld [vmem:[%s998_s1 + $0x60] sm:$0xff]   ;;  %v777_v20 = vld [vmem:[%s998_s1 + $0x68] sm:$0xff]  }
   0x6   :  { %701 = vmatprep.subr.bf16.mxu1 %v762_v5  ;;  %v770_v13 = vld [vmem:[%s998_s1 + $0xd8] sm:$0xff]   ;;  %v774_v17 = vld [vmem:[%s998_s1 + $0xe0] sm:$0xff]   ;;  %v778_v21 = vld [vmem:[%s998_s1 + $0xe8] sm:$0xff]  }
   0x7   :  { %v771_v14 = vld [vmem:[%s998_s1 + $0x18] sm:$0xff]   ;;  %v775_v18 = vld [vmem:[%s998_s1 + $0x20] sm:$0xff]   ;;  %v779_v22 = vld [vmem:[%s998_s1 + $0x28] sm:$0xff]  }
   0x8   :  { %674 = vmatpush3.bf16.msra.mxu0 %v763_v6  ;;  %v772_v15 = vld [vmem:[%s998_s1 + $0x98] sm:$0xff]   ;;  %v776_v19 = vld [vmem:[%s998_s1 + $0xa0] sm:$0xff]   ;;  %v780_v23 = vld [vmem:[%s998_s1 + $0xa8] sm:$0xff]  }
   0x9   :  { %702 = vmatpush3.bf16.msra.mxu1 %v764_v7  ;;  %675 = vmatprep.subr.bf16.mxu0 %v765_v8  ;;  %v781_v24 = vld [vmem:[%s998_s1 + $0x70] sm:$0xff]   ;;  %v785_v28 = vld [vmem:[%s998_s1 + $0x78] sm:$0xff]   ;;  %v794_v35 = vld [vmem:[%s999_s0 + $0xc] ss:$20 sps:$4 sm:$0xff]  }
   0xa   :  { %703 = vmatprep.subr.bf16.mxu1 %v766_v9  ;;  %v782_v25 = vld [vmem:[%s998_s1 + $0xf0] sm:$0xff]   ;;  %v786_v29 = vld [vmem:[%s998_s1 + $0xf8] sm:$0xff]   ;;  %v795_v36 = vld [vmem:[%s998_s1 + $0x100] sm:$0xff]   ;;  %480 = vmatprep.mubr.bf16.mxu1 %v794_v35 }
   0xb   :  { %v783_v26 = vld [vmem:[%s998_s1 + $0x30] sm:$0xff]   ;;  %v787_v30 = vld [vmem:[%s998_s1 + $0x38] sm:$0xff]   ;;  %v796_v37 = vld [vmem:[%s998_s1 + $0x108] sm:$0xff]  }
   0xc   :  { %676 = vmatpush3.bf16.msra.mxu0 %v767_v10  ;;  %v784_v27 = vld [vmem:[%s998_s1 + $0xb0] sm:$0xff]   ;;  %v788_v31 = vld [vmem:[%s998_s1 + $0xb8] sm:$0xff]   ;;  %v800_v39 = vld [vmem:[%s999_s0 + $0x2c] ss:$20 sps:$4 sm:$0xff]  }
   0xd   :  { %704 = vmatpush3.bf16.msra.mxu1 %v768_v11  ;;  %677 = vmatprep.subr.bf16.mxu0 %v769_v12  ;;  %v789_v32 = vld [vmem:[%s999_s0] ss:$20 sps:$4 sm:$0xff]   ;;  %v791_v33 = vld [vmem:[%s999_s0 + $0x4] ss:$20 sps:$4 sm:$0xff]   ;;  %v792_v34 = vld [vmem:[%s999_s0 + $0x8] ss:$20 sps:$4 sm:$0xff]  }
   0xe   :  { %705 = vmatprep.subr.bf16.mxu1 %v770_v13  ;;  %431 = vmatprep.mubr.bf16.mxu0 %v791_v33  ;;  %v797_v38 = vld [vmem:[%s998_s1 + $0x110] sm:$0xff]   ;;  %v798_v41 = vld [vmem:[%s998_s1 + $0x118] sm:$0xff]   ;;  %v799_v45 = vld [vmem:[%s998_s1 + $0x120] sm:$0xff]  }
   0xf   :  { %v802_v40 = vld [vmem:[%s999_s0 + $0x34] ss:$20 sps:$4 sm:$0xff]   ;;  %v806_v43 = vld [vmem:[%s999_s0 + $0x30] ss:$20 sps:$4 sm:$0xff]   ;;  %v808_v48 = vld [vmem:[%s998_s1 + $0x138] sm:$0xff]  }
  0x10   :  { %678 = vmatpush3.bf16.msra.mxu0 %v771_v14  ;;  %v805_v42 = vld [vmem:[%s999_s0 + $0x28] ss:$20 sps:$4 sm:$0xff]   ;;  %v809_v44 = vld [vmem:[%s999_s0 + $0x10] ss:$20 sps:$4 sm:$0xff]   ;;  %v810_v49 = vld [vmem:[%s999_s0 + $0x38] ss:$20 sps:$4 sm:$0xff]  }
  0x11   :  { %706 = vmatpush3.bf16.msra.mxu1 %v772_v15  ;;  %679 = vmatprep.subr.bf16.mxu0 %v773_v16  ;;  %v804_v46 = vld [vmem:[%s998_s1 + $0x128] sm:$0xff]   ;;  %v807_v47 = vld [vmem:[%s998_s1 + $0x130] sm:$0xff]  }
  0x12   :  { %707 = vmatprep.subr.bf16.mxu1 %v774_v17 }
  0x14   :  { %680 = vmatpush3.bf16.msra.mxu0 %v775_v18 }
  0x15   :  { %708 = vmatpush3.bf16.msra.mxu1 %v776_v19  ;;  %681 = vmatprep.subr.bf16.mxu0 %v777_v20 }
  0x16   :  { %709 = vmatprep.subr.bf16.mxu1 %v778_v21 }
  0x18   :  { %682 = vmatpush3.bf16.msra.mxu0 %v779_v22 }
  0x19   :  { %710 = vmatpush3.bf16.msra.mxu1 %v780_v23  ;;  %683 = vmatprep.subr.bf16.mxu0 %v781_v24 }
  0x1a   :  { %711 = vmatprep.subr.bf16.mxu1 %v782_v25 }
  0x1c   :  { %684 = vmatpush3.bf16.msra.mxu0 %v783_v26 }
  0x1d   :  { %712 = vmatpush3.bf16.msra.mxu1 %v784_v27  ;;  %685 = vmatprep.subr.bf16.mxu0 %v785_v28 }
  0x1e   :  { %713 = vmatprep.subr.bf16.mxu1 %v786_v29 }
  0x20   :  { %686 = vmatpush3.bf16.msra.mxu0 %v787_v30 }
  0x21   :  { %714 = vmatpush3.bf16.msra.mxu1 %v788_v31  ;;  %737 = vmatprep.subr.bf16.mxu0 %v795_v36 }
  0x23   :  { %432 = vmatmul.mubr.bf16.vlgmr.msra.gmra.mrb[0].mxu0 %v789_v32 }
  0x24   :  { %481 = vmatmul.mubr.bf16.vlgmr.msra.gmra.mrb[0].mxu1 %v792_v34  ;;  %738 = vmatpush3.bf16.msra.mxu0 %v795_v36 }
  0x25   :  { %739 = vmatprep.subr.bf16.mxu0 %v796_v37  ;;  %439 = vmatprep.mubr.bf16.mxu0 %v800_v39 }
  0x26   :  { %488 = vmatprep.mubr.bf16.mxu1 %v802_v40 }
  0x28   :  { %740 = vmatpush3.bf16.msra.mxu0 %v796_v37 }
  0x29   :  { %741 = vmatprep.subr.bf16.mxu0 %v797_v38 }
  0x2b   :  { %440 = vmatmul.mubr.bf16.gmra.mrb[4].mxu0 %v805_v42 }
  0x2c   :  { %489 = vmatmul.mubr.bf16.gmra.mrb[4].mxu1 %v806_v43  ;;  %742 = vmatpush3.bf16.msra.mxu0 %v797_v38 }
  0x2d   :  { %743 = vmatprep.subr.bf16.mxu0 %v798_v41  ;;  %753 = vmatprep.mubr.bf16.mxu0 %v809_v44 }
  0x30   :  { %744 = vmatpush3.bf16.msra.mxu0 %v798_v41 }
  0x31   :  { %745 = vmatprep.subr.bf16.mxu0 %v799_v45 }
  0x34   :  { %746 = vmatpush3.bf16.msra.mxu0 %v799_v45 }
  0x35   :  { %747 = vmatprep.subr.bf16.mxu0 %v804_v46 }
  0x38   :  { %748 = vmatpush3.bf16.msra.mxu0 %v804_v46 }
  0x39   :  { %749 = vmatprep.subr.bf16.mxu0 %v807_v47 }
  0x3c   :  { %750 = vmatpush3.bf16.msra.mxu0 %v807_v47 }
  0x3d   :  { %751 = vmatprep.subr.bf16.mxu0 %v808_v48 }
  0x40   :  { %752 = vmatpush3.bf16.msra.mxu0 %v808_v48 }
  0x43   :  { %754 = vmatmul.mubr.bf16.vlgmr.msra.gmra.mrb[8].mxu0 %v810_v49 }
  0xf6   :  { %v687_v50 = vpop.f32.mrb[0].mxu0 }
  0xf7   :  { %v715_v51 = vpop.f32.mrb[0].mxu1  ;;  %v688_v52 = vpop.f32.mrb[1].mxu0 }
  0xf8   :  { %v689_v53 = vadd.f32 %v688_v52, %v687_v50  ;;  %v716_v54 = vpop.f32.mrb[1].mxu1  ;;  %v690_v55 = vpop.f32.mrb[2].mxu0 }
  0xf9   :  { %v717_v56 = vadd.f32 %v716_v54, %v715_v51  ;;  %v718_v57 = vpop.f32.mrb[2].mxu1  ;;  %v691_v58 = vpop.f32.mrb[3].mxu0 }
  0xfa   :  { %v692_v59 = vadd.f32 %v691_v58, %v690_v55  ;;  %v719_v60 = vpop.f32.mrb[3].mxu1 }
  0xfb   :  { %v720_v61 = vadd.f32 %v719_v60, %v718_v57  ;;  %v483_v62 = vadd.f32 %v717_v56, %v689_v53 }
  0xfd   :  { %v486_v63 = vadd.f32 %v720_v61, %v692_v59 }
  0xfe   :  { %v693_v0 = vpop.f32.mrb[4].mxu0 }
  0xff   :  { %v721_v1 = vpop.f32.mrb[4].mxu1  ;;  %v694_v2 = vpop.f32.mrb[5].mxu0 }
 0x100   :  { %v695_v3 = vadd.f32 %v694_v2, %v693_v0  ;;  %v722_v4 = vpop.f32.mrb[5].mxu1  ;;  %v696_v5 = vpop.f32.mrb[6].mxu0 }
 0x101   :  { %v723_v6 = vadd.f32 %v722_v4, %v721_v1  ;;  %v724_v7 = vpop.f32.mrb[6].mxu1  ;;  %v697_v8 = vpop.f32.mrb[7].mxu0 }
 0x102   :  { %v698_v9 = vadd.f32 %v697_v8, %v696_v5  ;;  %v725_v10 = vpop.f32.mrb[7].mxu1 }
 0x103   :  { %v726_v11 = vadd.f32 %v725_v10, %v724_v7  ;;  %v491_v12 = vadd.f32 %v723_v6, %v695_v3 }
 0x105   :  { %v494_v13 = vadd.f32 %v726_v11, %v698_v9 }
 0x116   :  { %v755_v14 = vpop.f32.mrb[8].mxu0 }
 0x117   :  { %v540_v15 = vadd.f32 %v755_v14, %v491_v12  ;;  %v531_v16 = vpop.f32.mrb[9].mxu0 }
 0x118   :  { %v532_v17 = vadd.f32 %v531_v16, %v483_v62  ;;  %v756_v18 = vpop.f32.mrb[10].mxu0 }
 0x119   :  { %v543_v19 = vadd.f32 %v756_v18, %v494_v13  ;;  %v534_v20 = vpop.f32.mrb[11].mxu0  ;;  %v577_v27 = vmul.f32 %v540_v15, %v540_v15 }
 0x11a   :  { %v535_v21 = vadd.f32 %v534_v20, %v486_v63  ;;  %v575_v23 = vmul.f32 %v532_v17, %v532_v17 }
 0x11b   :  { %v668_v22 = vpack.c.bf16 %v543_v19, %v540_v15  ;;  %v578_v30 = vmul.f32 %v543_v19, %v543_v19 }
 0x11c   :  { %v663_v24 = vpack.c.bf16 %v535_v21, %v532_v17  ;;  %v566_v25 = vadd.f32 %v535_v21, %v532_v17  ;;  %v576_v26 = vmul.f32 %v535_v21, %v535_v21 }
 0x11d   :  { %670 = vst [vmem:[%s1000_s2 + $0x8] sm:$0xff] %v668_v22  }
 0x11e   :  { %664 = vst [vmem:[%s1000_s2] sm:$0xff] %v663_v24   ;;  %v567_v28 = vadd.f32 %v566_v25, %v540_v15  ;;  %v579_v29 = vadd.f32 %v576_v26, %v575_v23 }
 0x120   :  { %v568_v31 = vadd.f32 %v567_v28, %v543_v19  ;;  %v580_v32 = vadd.f32 %v579_v29, %v577_v27 }
 0x122   :  { %v569_v33 = vrot.slane %v568_v31, 4  ;;  %v581_v34 = vadd.f32 %v580_v32, %v578_v30 }
 0x124   :  { %v570_v35 = vadd.f32 %v569_v33, %v568_v31  ;;  %v582_v36 = vrot.slane %v581_v34, 4 }
 0x126   :  { %v571_v37 = vrot.slane %v570_v35, 2  ;;  %v583_v38 = vadd.f32 %v582_v36, %v581_v34 }
 0x128   :  { %v572_v39 = vadd.f32 %v571_v37, %v570_v35  ;;  %v584_v40 = vrot.slane %v583_v38, 2 }
 0x12a   :  { %v573_v41 = vrot.slane %v572_v39, 1  ;;  %v585_v42 = vadd.f32 %v584_v40, %v583_v38 }
 0x12c   :  { %v574_v43 = vadd.f32 %v573_v41, %v572_v39  ;;  %v586_v44 = vrot.slane %v585_v42, 1 }
 0x12e   :  { %v587_v45 = vadd.f32 %v586_v44, %v585_v42  ;;  %588 = vst [vmem:[%s1001_s3] sm:$0xff] %v574_v43 }
 0x130   :  { %589 = vst [vmem:[%s1002_s4] sm:$0xff] %v587_v45 }

// kernel: run.63
= control target key start
LH: loop header
LB: loop body
LE: loop exit
PB: predicated region body
PF: predicated region fallthrough
CT: control target
= control target key end

     0   :  { %v28_v0 = vlaneseq  ;;  %s184_s0 = inlined_call_operand.vmem [shape: bf16[16,512], index: 0, kind: input, shape index: {}, may-alias: {0,3}]   ;;  %s185_s1 = inlined_call_operand.vmem [shape: f32[1,512], index: 1, kind: input, shape index: {}]   ;;  %s186_s2 = inlined_call_operand.vmem [shape: f32[1,512], index: 2, kind: input, shape index: {}]   ;;  %s187_s3 = inlined_call_operand.vmem [shape: bf16[16,512], index: 3, kind: output, shape index: {}, may-alias: {0,3}]  }
   0x1   :  { %v14_v1 = vld [vmem:[%s184_s0] sm:$0xff]  ;;  %v15_v3 = vld [vmem:[%s184_s0 + $0x8] sm:$0xff]  ;;  %v16_v4 = vld [vmem:[%s184_s0 + $0x10] sm:$0xff] }
   0x2   :  { %v29_v2 = vshrl.u32 %v28_v0, 7  ;;  %v17_v5 = vld [vmem:[%s184_s0 + $0x18] sm:$0xff]  ;;  %v18_v6 = vunpack.c.l.bf16 %v14_v1  ;;  %v19_v7 = vunpack.c.h.bf16 %v14_v1  ;;  %v26_v8 = vld [vmem:[%s185_s1] sm:$0xf]  ;;  %v22_v10 = vunpack.c.l.bf16 %v16_v4 }
   0x3   :  { %v56_v9 = vld [vmem:[%s186_s2] sm:$0xf]  ;;  %v23_v11 = vunpack.c.h.bf16 %v16_v4  ;;  %v20_v16 = vunpack.c.l.bf16 %v15_v3  ;;  %v21_v17 = vunpack.c.h.bf16 %v15_v3  ;;  %v24_v18 = vunpack.c.l.bf16 %v17_v5 }
   0x4   :  { %v30_v12 = vsub.s32 0, %v29_v2  ;;  %v34_v13 = vsub.s32 1, %v29_v2  ;;  %v38_v14 = vsub.s32 2, %v29_v2  ;;  %v42_v15 = vsub.s32 3, %v29_v2 }
   0x5   :  { %v25_v19 = vunpack.c.h.bf16 %v17_v5 }
   0x6   :  { %v31_v20 = vrot.slane %v26_v8, %v30_v12  ;;  %v35_v21 = vrot.slane %v26_v8, %v34_v13  ;;  %v61_v22 = vrot.slane %v56_v9, %v30_v12  ;;  %v65_v23 = vrot.slane %v56_v9, %v34_v13 }
   0x7   :  { %v39_v24 = vrot.slane %v26_v8, %v38_v14  ;;  %v43_v25 = vrot.slane %v26_v8, %v42_v15  ;;  %v69_v26 = vrot.slane %v56_v9, %v38_v14  ;;  %v73_v27 = vrot.slane %v56_v9, %v42_v15 }
   0x8   :  { %v48_v28 = vmul.f32 %v31_v20, %v18_v6  ;;  %v49_v29 = vmul.f32 %v35_v21, %v19_v7  ;;  %v52_v30 = vmul.f32 %v31_v20, %v22_v10  ;;  %v53_v31 = vmul.f32 %v35_v21, %v23_v11 }
   0x9   :  { %v50_v32 = vmul.f32 %v39_v24, %v20_v16  ;;  %v51_v33 = vmul.f32 %v43_v25, %v21_v17  ;;  %v54_v34 = vmul.f32 %v39_v24, %v24_v18  ;;  %v55_v35 = vmul.f32 %v43_v25, %v25_v19 }
   0xa   :  { %v78_v36 = vadd.f32 %v61_v22, %v48_v28  ;;  %v79_v37 = vadd.f32 %v65_v23, %v49_v29  ;;  %v82_v38 = vadd.f32 %v61_v22, %v52_v30  ;;  %v83_v39 = vadd.f32 %v65_v23, %v53_v31 }
   0xb   :  { %v80_v40 = vadd.f32 %v69_v26, %v50_v32  ;;  %v81_v41 = vadd.f32 %v73_v27, %v51_v33  ;;  %v84_v42 = vadd.f32 %v69_v26, %v54_v34  ;;  %v85_v43 = vadd.f32 %v73_v27, %v55_v35 }
   0xc   :  { %v86_v44 = vmax.f32 %v78_v36, 0.0  ;;  %v87_v45 = vmax.f32 %v79_v37, 0.0  ;;  %v90_v46 = vmax.f32 %v82_v38, 0.0  ;;  %v91_v47 = vmax.f32 %v83_v39, 0.0 }
   0xd   :  { %v88_v48 = vmax.f32 %v80_v40, 0.0  ;;  %v89_v49 = vmax.f32 %v81_v41, 0.0  ;;  %v92_v50 = vmax.f32 %v84_v42, 0.0  ;;  %v93_v51 = vmax.f32 %v85_v43, 0.0 }
   0xe   :  { %v130_v52 = vpack.c.bf16 %v87_v45, %v86_v44  ;;  %v132_v53 = vpack.c.bf16 %v91_v47, %v90_v46 }
   0xf   :  { %v131_v54 = vpack.c.bf16 %v89_v49, %v88_v48  ;;  %v133_v55 = vpack.c.bf16 %v93_v51, %v92_v50 }
  0x10   :  { %118 = vst [vmem:[%s187_s3] sm:$0xff] %v130_v52  ;;  %120 = vst [vmem:[%s187_s3 + $0x10] sm:$0xff] %v132_v53 }
  0x11   :  { %119 = vst [vmem:[%s187_s3 + $0x8] sm:$0xff] %v131_v54  ;;  %121 = vst [vmem:[%s187_s3 + $0x18] sm:$0xff] %v133_v55 }

// kernel: run.62
= control target key start
LH: loop header
LB: loop body
LE: loop exit
PB: predicated region body
PF: predicated region fallthrough
CT: control target
= control target key end

     0   :  { %s1040_s1 = inlined_call_operand.vmem [shape: bf16[256,512], index: 1, kind: input, shape index: {}]   ;;  %s1041_s0 = inlined_call_operand.vmem [shape: bf16[16,256], index: 0, kind: input, shape index: {}]   ;;  %s1042_s2 = inlined_call_operand.vmem [shape: bf16[16,512], index: 2, kind: output, shape index: {0}]   ;;  %s1043_s3 = inlined_call_operand.vmem [shape: f32[8,512], index: 3, kind: output, shape index: {1}]   ;;  %s1044_s4 = inlined_call_operand.vmem [shape: f32[8,512], index: 4, kind: output, shape index: {2}]  }
   0x1   :  { %v682_v0 = vld [vmem:[%s1040_s1 + $0x4] ss:$16 sps:$4 sm:$0xff]   ;;  %v684_v1 = vld [vmem:[%s1040_s1 + $0xc] ss:$16 sps:$4 sm:$0xff]   ;;  %v686_v2 = vld [vmem:[%s1040_s1] ss:$16 sps:$4 sm:$0xff]  }
   0x2   :  { %410 = vmatprep.subr.bf16.mxu0 %v682_v0  ;;  %v687_v3 = vld [vmem:[%s1040_s1 + $0x8] ss:$16 sps:$4 sm:$0xff]   ;;  %453 = vmatprep.subr.bf16.mxu1 %v684_v1  ;;  %v688_v4 = vld [vmem:[%s1040_s1 + $0x24] ss:$16 sps:$4 sm:$0xff]   ;;  %v690_v5 = vld [vmem:[%s1040_s1 + $0x2c] ss:$16 sps:$4 sm:$0xff]  }
   0x3   :  { %411 = vmatpush1.bf16.msra.mxu0 %v686_v2  ;;  %454 = vmatpush1.bf16.msra.mxu1 %v687_v3  ;;  %v692_v6 = vld [vmem:[%s1040_s1 + $0x20] ss:$16 sps:$4 sm:$0xff]   ;;  %v693_v7 = vld [vmem:[%s1040_s1 + $0x28] ss:$16 sps:$4 sm:$0xff]   ;;  %v694_v8 = vld [vmem:[%s1040_s1 + $0x44] ss:$16 sps:$4 sm:$0xff]  }
   0x4   :  { %412 = vmatprep.subr.bf16.mxu0 %v688_v4  ;;  %455 = vmatprep.subr.bf16.mxu1 %v690_v5  ;;  %v696_v9 = vld [vmem:[%s1040_s1 + $0x4c] ss:$16 sps:$4 sm:$0xff]   ;;  %v698_v10 = vld [vmem:[%s1040_s1 + $0x40] ss:$16 sps:$4 sm:$0xff]   ;;  %v699_v11 = vld [vmem:[%s1040_s1 + $0x48] ss:$16 sps:$4 sm:$0xff]  }
   0x5   :  { %v700_v12 = vld [vmem:[%s1040_s1 + $0x64] ss:$16 sps:$4 sm:$0xff]   ;;  %v702_v13 = vld [vmem:[%s1040_s1 + $0x6c] ss:$16 sps:$4 sm:$0xff]   ;;  %v704_v14 = vld [vmem:[%s1040_s1 + $0x60] ss:$16 sps:$4 sm:$0xff]  }
   0x6   :  { %v705_v15 = vld [vmem:[%s1040_s1 + $0x68] ss:$16 sps:$4 sm:$0xff]   ;;  %v706_v16 = vld [vmem:[%s1040_s1 + $0x84] ss:$16 sps:$4 sm:$0xff]   ;;  %v708_v17 = vld [vmem:[%s1040_s1 + $0x8c] ss:$16 sps:$4 sm:$0xff]  }
   0x7   :  { %413 = vmatpush1.bf16.msra.mxu0 %v692_v6  ;;  %456 = vmatpush1.bf16.msra.mxu1 %v693_v7  ;;  %v710_v18 = vld [vmem:[%s1040_s1 + $0x80] ss:$16 sps:$4 sm:$0xff]   ;;  %v711_v19 = vld [vmem:[%s1040_s1 + $0x88] ss:$16 sps:$4 sm:$0xff]   ;;  %v712_v20 = vld [vmem:[%s1040_s1 + $0xa4] ss:$16 sps:$4 sm:$0xff]  }
   0x8   :  { %414 = vmatprep.subr.bf16.mxu0 %v694_v8  ;;  %457 = vmatprep.subr.bf16.mxu1 %v696_v9  ;;  %v714_v21 = vld [vmem:[%s1040_s1 + $0xac] ss:$16 sps:$4 sm:$0xff]   ;;  %v716_v22 = vld [vmem:[%s1040_s1 + $0xa0] ss:$16 sps:$4 sm:$0xff]   ;;  %v717_v23 = vld [vmem:[%s1040_s1 + $0xa8] ss:$16 sps:$4 sm:$0xff]  }
   0x9   :  { %v718_v24 = vld [vmem:[%s1040_s1 + $0xc4] ss:$16 sps:$4 sm:$0xff]   ;;  %v720_v25 = vld [vmem:[%s1040_s1 + $0xcc] ss:$16 sps:$4 sm:$0xff]   ;;  %v722_v26 = vld [vmem:[%s1040_s1 + $0xc0] ss:$16 sps:$4 sm:$0xff]  }
   0xa   :  { %v723_v27 = vld [vmem:[%s1040_s1 + $0xc8] ss:$16 sps:$4 sm:$0xff]   ;;  %v724_v28 = vld [vmem:[%s1040_s1 + $0xe4] ss:$16 sps:$4 sm:$0xff]   ;;  %v726_v29 = vld [vmem:[%s1040_s1 + $0xec] ss:$16 sps:$4 sm:$0xff]  }
   0xb   :  { %415 = vmatpush1.bf16.msra.mxu0 %v698_v10  ;;  %458 = vmatpush1.bf16.msra.mxu1 %v699_v11  ;;  %v728_v30 = vld [vmem:[%s1040_s1 + $0xe0] ss:$16 sps:$4 sm:$0xff]   ;;  %v729_v31 = vld [vmem:[%s1040_s1 + $0xe8] ss:$16 sps:$4 sm:$0xff]   ;;  %v730_v32 = vld [vmem:[%s1040_s1 + $0x104] ss:$16 sps:$4 sm:$0xff]  }
   0xc   :  { %416 = vmatprep.subr.bf16.mxu0 %v700_v12  ;;  %459 = vmatprep.subr.bf16.mxu1 %v702_v13  ;;  %v732_v33 = vld [vmem:[%s1040_s1 + $0x10c] ss:$16 sps:$4 sm:$0xff]   ;;  %v734_v34 = vld [vmem:[%s1040_s1 + $0x100] ss:$16 sps:$4 sm:$0xff]   ;;  %v735_v35 = vld [vmem:[%s1040_s1 + $0x108] ss:$16 sps:$4 sm:$0xff]  }
   0xd   :  { %v736_v36 = vld [vmem:[%s1040_s1 + $0x124] ss:$16 sps:$4 sm:$0xff]   ;;  %v738_v37 = vld [vmem:[%s1040_s1 + $0x12c] ss:$16 sps:$4 sm:$0xff]   ;;  %v740_v38 = vld [vmem:[%s1040_s1 + $0x120] ss:$16 sps:$4 sm:$0xff]  }
   0xe   :  { %v741_v39 = vld [vmem:[%s1040_s1 + $0x128] ss:$16 sps:$4 sm:$0xff]   ;;  %v742_v40 = vld [vmem:[%s1040_s1 + $0x144] ss:$16 sps:$4 sm:$0xff]   ;;  %v744_v41 = vld [vmem:[%s1040_s1 + $0x14c] ss:$16 sps:$4 sm:$0xff]  }
   0xf   :  { %417 = vmatpush1.bf16.msra.mxu0 %v704_v14  ;;  %460 = vmatpush1.bf16.msra.mxu1 %v705_v15  ;;  %v746_v42 = vld [vmem:[%s1040_s1 + $0x140] ss:$16 sps:$4 sm:$0xff]   ;;  %v747_v43 = vld [vmem:[%s1040_s1 + $0x148] ss:$16 sps:$4 sm:$0xff]   ;;  %v748_v44 = vld [vmem:[%s1040_s1 + $0x164] ss:$16 sps:$4 sm:$0xff]  }
  0x10   :  { %418 = vmatprep.subr.bf16.mxu0 %v706_v16  ;;  %461 = vmatprep.subr.bf16.mxu1 %v708_v17  ;;  %v750_v45 = vld [vmem:[%s1040_s1 + $0x16c] ss:$16 sps:$4 sm:$0xff]   ;;  %v752_v47 = vld [vmem:[%s1040_s1 + $0x160] ss:$16 sps:$4 sm:$0xff]   ;;  %v753_v48 = vld [vmem:[%s1040_s1 + $0x168] ss:$16 sps:$4 sm:$0xff]  }
  0x11   :  { %v780_v46 = vld [vmem:[%s1041_s0 + $0x4] ss:$8 sps:$4 sm:$0xff]   ;;  %v758_v51 = vld [vmem:[%s1040_s1 + $0x180] ss:$16 sps:$4 sm:$0xff]   ;;  %v759_v52 = vld [vmem:[%s1040_s1 + $0x188] ss:$16 sps:$4 sm:$0xff]  }
  0x12   :  { %v754_v49 = vld [vmem:[%s1040_s1 + $0x184] ss:$16 sps:$4 sm:$0xff]   ;;  %v756_v50 = vld [vmem:[%s1040_s1 + $0x18c] ss:$16 sps:$4 sm:$0xff]   ;;  %442 = vmatprep.mubr.bf16.mxu0 %v780_v46  ;;  %485 = vmatprep.mubr.bf16.mxu1 %v780_v46  ;;  %v764_v55 = vld [vmem:[%s1040_s1 + $0x1a0] ss:$16 sps:$4 sm:$0xff]  }
  0x13   :  { %419 = vmatpush1.bf16.msra.mxu0 %v710_v18  ;;  %462 = vmatpush1.bf16.msra.mxu1 %v711_v19  ;;  %v760_v53 = vld [vmem:[%s1040_s1 + $0x1a4] ss:$16 sps:$4 sm:$0xff]   ;;  %v762_v54 = vld [vmem:[%s1040_s1 + $0x1ac] ss:$16 sps:$4 sm:$0xff]   ;;  %v765_v56 = vld [vmem:[%s1040_s1 + $0x1a8] ss:$16 sps:$4 sm:$0xff]  }
  0x14   :  { %420 = vmatprep.subr.bf16.mxu0 %v712_v20  ;;  %463 = vmatprep.subr.bf16.mxu1 %v714_v21  ;;  %v766_v57 = vld [vmem:[%s1040_s1 + $0x1c4] ss:$16 sps:$4 sm:$0xff]   ;;  %v768_v58 = vld [vmem:[%s1040_s1 + $0x1cc] ss:$16 sps:$4 sm:$0xff]   ;;  %v770_v59 = vld [vmem:[%s1040_s1 + $0x1c0] ss:$16 sps:$4 sm:$0xff]  }
  0x15   :  { %v771_v60 = vld [vmem:[%s1040_s1 + $0x1c8] ss:$16 sps:$4 sm:$0xff]   ;;  %v772_v61 = vld [vmem:[%s1040_s1 + $0x1e4] ss:$16 sps:$4 sm:$0xff]   ;;  %v774_v62 = vld [vmem:[%s1040_s1 + $0x1ec] ss:$16 sps:$4 sm:$0xff]  }
  0x16   :  { %v776_v63 = vld [vmem:[%s1040_s1 + $0x1e0] ss:$16 sps:$4 sm:$0xff]   ;;  %v777_v0 = vld [vmem:[%s1040_s1 + $0x1e8] ss:$16 sps:$4 sm:$0xff]  }
  0x17   :  { %421 = vmatpush1.bf16.msra.mxu0 %v716_v22  ;;  %464 = vmatpush1.bf16.msra.mxu1 %v717_v23  ;;  %v778_v1 = vld [vmem:[%s1041_s0] ss:$8 sps:$4 sm:$0xff]  }
  0x18   :  { %422 = vmatprep.subr.bf16.mxu0 %v718_v24  ;;  %465 = vmatprep.subr.bf16.mxu1 %v720_v25 }
  0x1b   :  { %423 = vmatpush1.bf16.msra.mxu0 %v722_v26  ;;  %466 = vmatpush1.bf16.msra.mxu1 %v723_v27 }
  0x1c   :  { %424 = vmatprep.subr.bf16.mxu0 %v724_v28  ;;  %467 = vmatprep.subr.bf16.mxu1 %v726_v29 }
  0x1f   :  { %425 = vmatpush1.bf16.msra.mxu0 %v728_v30  ;;  %468 = vmatpush1.bf16.msra.mxu1 %v729_v31 }
  0x20   :  { %426 = vmatprep.subr.bf16.mxu0 %v730_v32  ;;  %469 = vmatprep.subr.bf16.mxu1 %v732_v33 }
  0x23   :  { %427 = vmatpush1.bf16.msra.mxu0 %v734_v34  ;;  %470 = vmatpush1.bf16.msra.mxu1 %v735_v35 }
  0x24   :  { %428 = vmatprep.subr.bf16.mxu0 %v736_v36  ;;  %471 = vmatprep.subr.bf16.mxu1 %v738_v37 }
  0x27   :  { %429 = vmatpush1.bf16.msra.mxu0 %v740_v38  ;;  %472 = vmatpush1.bf16.msra.mxu1 %v741_v39 }
  0x28   :  { %430 = vmatprep.subr.bf16.mxu0 %v742_v40  ;;  %473 = vmatprep.subr.bf16.mxu1 %v744_v41 }
  0x2b   :  { %431 = vmatpush1.bf16.msra.mxu0 %v746_v42  ;;  %474 = vmatpush1.bf16.msra.mxu1 %v747_v43 }
  0x2c   :  { %432 = vmatprep.subr.bf16.mxu0 %v748_v44  ;;  %475 = vmatprep.subr.bf16.mxu1 %v750_v45 }
  0x2f   :  { %433 = vmatpush1.bf16.msra.mxu0 %v752_v47  ;;  %476 = vmatpush1.bf16.msra.mxu1 %v753_v48 }
  0x30   :  { %434 = vmatprep.subr.bf16.mxu0 %v754_v49  ;;  %477 = vmatprep.subr.bf16.mxu1 %v756_v50 }
  0x33   :  { %435 = vmatpush1.bf16.msra.mxu0 %v758_v51  ;;  %478 = vmatpush1.bf16.msra.mxu1 %v759_v52 }
  0x34   :  { %436 = vmatprep.subr.bf16.mxu0 %v760_v53  ;;  %479 = vmatprep.subr.bf16.mxu1 %v762_v54 }
  0x37   :  { %437 = vmatpush1.bf16.msra.mxu0 %v764_v55  ;;  %480 = vmatpush1.bf16.msra.mxu1 %v765_v56 }
  0x38   :  { %438 = vmatprep.subr.bf16.mxu0 %v766_v57  ;;  %481 = vmatprep.subr.bf16.mxu1 %v768_v58 }
  0x3b   :  { %439 = vmatpush1.bf16.msra.mxu0 %v770_v59  ;;  %482 = vmatpush1.bf16.msra.mxu1 %v771_v60 }
  0x3c   :  { %440 = vmatprep.subr.bf16.mxu0 %v772_v61  ;;  %483 = vmatprep.subr.bf16.mxu1 %v774_v62 }
  0x3f   :  { %441 = vmatpush1.bf16.msra.mxu0 %v776_v63  ;;  %484 = vmatpush1.bf16.msra.mxu1 %v777_v0 }
  0x42   :  { %443 = vmatmul.mubr.bf16.vlgmr.msra.gmra.mrb[0].mxu0 %v778_v1  ;;  %486 = vmatmul.mubr.bf16.vlgmr.msra.gmra.mrb[0].mxu1 %v778_v1 }
 0x115   :  { %v444_v2 = vpop.f32.mrb[0].mxu0  ;;  %v487_v3 = vpop.f32.mrb[0].mxu1 }
 0x116   :  { %v552_v4 = vmul.f32 %v444_v2, %v444_v2  ;;  %v554_v5 = vmul.f32 %v487_v3, %v487_v3  ;;  %v446_v6 = vpop.f32.mrb[1].mxu0  ;;  %v489_v7 = vpop.f32.mrb[1].mxu1 }
 0x117   :  { %v678_v8 = vpack.c.bf16 %v446_v6, %v444_v2  ;;  %v553_v9 = vmul.f32 %v446_v6, %v446_v6  ;;  %v679_v10 = vpack.c.bf16 %v489_v7, %v487_v3  ;;  %v555_v11 = vmul.f32 %v489_v7, %v489_v7  ;;  %v448_v12 = vpop.f32.mrb[2].mxu0  ;;  %v491_v13 = vpop.f32.mrb[2].mxu1 }
 0x118   :  { %v524_v14 = vadd.f32 %v448_v12, %v444_v2  ;;  %v556_v15 = vmul.f32 %v448_v12, %v448_v12  ;;  %v538_v16 = vadd.f32 %v491_v13, %v487_v3  ;;  %v558_v17 = vmul.f32 %v491_v13, %v491_v13  ;;  %v450_v18 = vpop.f32.mrb[3].mxu0  ;;  %v493_v19 = vpop.f32.mrb[3].mxu1 }
 0x119   :  { %520 = vst [vmem:[%s1042_s2] sm:$0xff] %v678_v8  ;;  %521 = vst [vmem:[%s1042_s2 + $0x8] sm:$0xff] %v679_v10  ;;  %v680_v20 = vpack.c.bf16 %v450_v18, %v448_v12  ;;  %v531_v21 = vadd.f32 %v450_v18, %v446_v6  ;;  %v557_v22 = vmul.f32 %v450_v18, %v450_v18 }
 0x11a   :  { %v681_v23 = vpack.c.bf16 %v493_v19, %v491_v13  ;;  %v525_v24 = vrot.slane %v524_v14, 4  ;;  %v560_v25 = vadd.f32 %v556_v15, %v552_v4  ;;  %v539_v26 = vrot.slane %v538_v16, 4 }
 0x11b   :  { %v574_v27 = vadd.f32 %v558_v17, %v554_v5  ;;  %522 = vst [vmem:[%s1042_s2 + $0x10] sm:$0xff] %v680_v20  ;;  %v532_v28 = vrot.slane %v531_v21, 4  ;;  %v567_v29 = vadd.f32 %v557_v22, %v553_v9  ;;  %v545_v30 = vadd.f32 %v493_v19, %v489_v7 }
 0x11c   :  { %523 = vst [vmem:[%s1042_s2 + $0x18] sm:$0xff] %v681_v23  ;;  %v559_v31 = vmul.f32 %v493_v19, %v493_v19  ;;  %v526_v32 = vadd.f32 %v525_v24, %v524_v14  ;;  %v561_v33 = vrot.slane %v560_v25, 4  ;;  %v540_v34 = vadd.f32 %v539_v26, %v538_v16 }
 0x11d   :  { %v575_v35 = vrot.slane %v574_v27, 4  ;;  %v533_v36 = vadd.f32 %v532_v28, %v531_v21  ;;  %v568_v37 = vrot.slane %v567_v29, 4  ;;  %v546_v38 = vrot.slane %v545_v30, 4 }
 0x11e   :  { %v581_v39 = vadd.f32 %v559_v31, %v555_v11  ;;  %v527_v40 = vrot.slane %v526_v32, 2  ;;  %v562_v41 = vadd.f32 %v561_v33, %v560_v25  ;;  %v541_v42 = vrot.slane %v540_v34, 2 }
 0x11f   :  { %v576_v43 = vadd.f32 %v575_v35, %v574_v27  ;;  %v534_v44 = vrot.slane %v533_v36, 2  ;;  %v569_v45 = vadd.f32 %v568_v37, %v567_v29  ;;  %v547_v46 = vadd.f32 %v546_v38, %v545_v30 }
 0x120   :  { %v582_v47 = vrot.slane %v581_v39, 4  ;;  %v528_v48 = vadd.f32 %v527_v40, %v526_v32  ;;  %v563_v49 = vrot.slane %v562_v41, 2  ;;  %v542_v50 = vadd.f32 %v541_v42, %v540_v34 }
 0x121   :  { %v577_v51 = vrot.slane %v576_v43, 2  ;;  %v535_v52 = vadd.f32 %v534_v44, %v533_v36  ;;  %v570_v53 = vrot.slane %v569_v45, 2  ;;  %v548_v54 = vrot.slane %v547_v46, 2 }
 0x122   :  { %v583_v55 = vadd.f32 %v582_v47, %v581_v39  ;;  %v529_v56 = vrot.slane %v528_v48, 1  ;;  %v564_v57 = vadd.f32 %v563_v49, %v562_v41  ;;  %v543_v58 = vrot.slane %v542_v50, 1 }
 0x123   :  { %v578_v59 = vadd.f32 %v577_v51, %v576_v43  ;;  %v536_v60 = vrot.slane %v535_v52, 1  ;;  %v571_v61 = vadd.f32 %v570_v53, %v569_v45  ;;  %v549_v62 = vadd.f32 %v548_v54, %v547_v46 }
 0x124   :  { %v584_v63 = vrot.slane %v583_v55, 2  ;;  %v530_v0 = vadd.f32 %v529_v56, %v528_v48  ;;  %v565_v1 = vrot.slane %v564_v57, 1  ;;  %v544_v2 = vadd.f32 %v543_v58, %v542_v50 }
 0x125   :  { %v579_v3 = vrot.slane %v578_v59, 1  ;;  %v537_v4 = vadd.f32 %v536_v60, %v535_v52  ;;  %v572_v5 = vrot.slane %v571_v61, 1  ;;  %v550_v6 = vrot.slane %v549_v62, 1 }
 0x126   :  { %v585_v7 = vadd.f32 %v584_v63, %v583_v55  ;;  %v566_v8 = vadd.f32 %v565_v1, %v564_v57  ;;  %588 = vst [vmem:[%s1043_s3] sm:$0xff] %v530_v0  ;;  %590 = vst [vmem:[%s1043_s3 + $0x10] sm:$0xff] %v544_v2 }
 0x127   :  { %v580_v9 = vadd.f32 %v579_v3, %v578_v59  ;;  %v573_v10 = vadd.f32 %v572_v5, %v571_v61  ;;  %589 = vst [vmem:[%s1043_s3 + $0x8] sm:$0xff] %v537_v4  ;;  %v551_v11 = vadd.f32 %v550_v6, %v549_v62 }
 0x128   :  { %v586_v12 = vrot.slane %v585_v7, 1  ;;  %592 = vst [vmem:[%s1044_s4] sm:$0xff] %v566_v8 }
 0x129   :  { %594 = vst [vmem:[%s1044_s4 + $0x10] sm:$0xff] %v580_v9  ;;  %593 = vst [vmem:[%s1044_s4 + $0x8] sm:$0xff] %v573_v10 }
 0x12a   :  { %v587_v13 = vadd.f32 %v586_v12, %v585_v7  ;;  %591 = vst [vmem:[%s1043_s3 + $0x18] sm:$0xff] %v551_v11 }
 0x12c   :  { %595 = vst [vmem:[%s1044_s4 + $0x18] sm:$0xff] %v587_v13 }

</bundles_post_ra>
